<compile_context>
chip_gen: v7x
topology: tpu7x:2x2x1
jax: 0.10.0
libtpu: 0.0.40
codegen_flags: <defaults>
</compile_context>

<pallas_src>
import numpy as np
import jax
import jax.numpy as jnp
from jax import lax
from jax.experimental import pallas as pl
from jax.experimental.pallas import tpu as pltpu


# dot_general dims for A @ B^T (contract the last dim of both operands) — the
# standard "trans_b" MXU pattern, which lets the batch tile stay in natural
# (TB, features) layout without any wrapper-side transpose of x.
_TRANS_B_DIMS = (((1,), (1,)), ((), ()))


# ----------------------------------------------------------------------------
# Pallas kernel
# ----------------------------------------------------------------------------
def _make_kernel(n_wide, L1, L2, L3, L4):
    C1 = 32  # conv1 output channels (fixed by the torch model)

    def kernel(x_ref, nT_ref, wcbT_ref, w1_ref, b1_ref, w2_ref, b2_ref,
               wd_ref, bd_ref, out_ref):
        # ---- PhaseShifter codebook (+ additive noise) ----------------------
        # bf^T = wcb^T @ x^T via a trans_b contraction; x tile stays (TB, 2Na).
        bfT = lax.dot_general(wcbT_ref[...], x_ref[...], _TRANS_B_DIMS,
                              preferred_element_type=jnp.float32)
        bfT = bfT + nT_ref[...]                                   # (2*Nw, TB)

        # ---- ComputePower: |.|^2 of the complex beamformed signal ----------
        re = bfT[:n_wide, :]
        im = bfT[n_wide:, :]
        p = re * re + im * im                                     # (Nw, TB)

        # ---- conv1 (1 -> 32, k=2) as ONE matmul with an im2col-style weight.
        # Rows are l*32 + c, so ReLU/pool below are vreg-aligned sublane slices.
        # (w1sp has only 2 of n_wide nonzeros per row; negligible waste at
        #  n_wide=16 — switch to data-side im2col if n_wide ever scales up.)
        h1 = jnp.dot(w1_ref[...], p,
                     preferred_element_type=jnp.float32) + b1_ref[...]
        h1 = jnp.maximum(h1, 0.0)                                 # (L1*32, TB)

        # ---- MaxPool1d(k=2, stride=1): pair (l, l+1) of the same channel ----
        m1 = jnp.maximum(h1[:L2 * C1, :], h1[C1:(L2 + 1) * C1, :])  # (L2*32, TB)

        # ---- conv2 + ReLU + MaxPool2 + dense, fully fused -------------------
        # No h2/m2 buffers and no jnp.concatenate: each position's ReLU'd conv2
        # output lives only as `prev`/`cur` (16 vregs each); the pool-pair max
        # feeds straight into a small dense accumulation.
        w2 = w2_ref[...]                                          # (64, 64)
        b2 = b2_ref[...]                                          # (64, 1)
        wd = wd_ref[...]                                          # (L4, n_narrow, 64)

        prev = None
        acc = None
        for l in range(L3):
            win = m1[l * C1:(l + 2) * C1, :]                      # (64, TB), aligned
            cur = jnp.maximum(
                jnp.dot(w2, win, preferred_element_type=jnp.float32) + b2,
                0.0)                                              # (64, TB)
            if l >= 1:
                m2_l = jnp.maximum(prev, cur)                     # pool pos l-1
                term = jnp.dot(wd[l - 1], m2_l,
                               preferred_element_type=jnp.float32)  # (n_narrow, TB)
                acc = term if acc is None else acc + term
            prev = cur

        # Lane-dense output store.
        out_ref[...] = acc + bd_ref[...]                          # (n_narrow, TB)

    return kernel


# ----------------------------------------------------------------------------
# Wrapper
# ----------------------------------------------------------------------------
def beam_classifier_cnn_rsrp(x, noise, params, *, tb=256):
    """x: (B, 2*n_antenna), noise: (B, 2*n_wide) -> (B, n_narrow)."""
    wcbT, w1sp, b1r, w2c, b2c, wd3, bd_col = params
    B = x.shape[0]
    two_na = x.shape[1]
    two_nw = wcbT.shape[0]
    n_wide = two_nw // 2
    L1, L2, L3, L4 = n_wide - 1, n_wide - 2, n_wide - 3, n_wide - 4
    n_narrow = bd_col.shape[0]

    TB = int(tb)
    Bp = ((B + TB - 1) // TB) * TB                 # pad batch to a tile multiple
    # v7x: keep Bp // TB >= 2 so the "parallel" grid axis feeds both
    # TensorCores; on v5e/v6e (1 TC) prefer the largest TB fitting scoped VMEM.

    # x stays in natural layout (zero-padded on batch only); its transpose is
    # folded into the first matmul inside the kernel.  The noise tile is tiny,
    # so transposing it here is acceptable wrapper plumbing.
    xp = jnp.pad(x.astype(jnp.float32), ((0, Bp - B), (0, 0)))
    nT = jnp.pad(noise.astype(jnp.float32).T, ((0, 0), (0, Bp - B)))

    kernel = _make_kernel(n_wide, L1, L2, L3, L4)

    def wspec(a):  # full-array weight block, constant index map (DMA'd once)
        return pl.BlockSpec(a.shape, lambda b, nd=a.ndim: (0,) * nd)

    flops = Bp * (2 * two_na * two_nw                 # codebook
                  + 2 * (L1 * 32) * n_wide            # conv1 (im2col matmul)
                  + L3 * 2 * 64 * 64                  # conv2
                  + L4 * 2 * n_narrow * 64)           # dense (fused accumulation)
    bytes_accessed = 4 * (xp.size + nT.size + n_narrow * Bp
                          + sum(int(a.size) for a in params))

    outT = pl.pallas_call(
        kernel,
        out_shape=jax.ShapeDtypeStruct((n_narrow, Bp), jnp.float32),
        grid=(Bp // TB,),
        in_specs=[
            pl.BlockSpec((TB, two_na), lambda b: (b, 0)),   # x batch tile (natural)
            pl.BlockSpec((two_nw, TB), lambda b: (0, b)),   # noise^T batch tile
            wspec(wcbT), wspec(w1sp), wspec(b1r),
            wspec(w2c), wspec(b2c), wspec(wd3), wspec(bd_col),
        ],
        out_specs=pl.BlockSpec((n_narrow, TB), lambda b: (0, b)),  # lane-dense
        compiler_params=pltpu.CompilerParams(
            dimension_semantics=("parallel",),
            vmem_limit_bytes=32 * 1024 * 1024),
        cost_estimate=pl.CostEstimate(flops=flops, transcendentals=0,
                                      bytes_accessed=bytes_accessed),
    )(xp, nT, wcbT, w1sp, b1r, w2c, b2c, wd3, bd_col)

    return outT[:, :B].T                               # back to (B, n_narrow)


# ----------------------------------------------------------------------------
# Deterministic parameter initialization (shapes from the torch __init__)
# ----------------------------------------------------------------------------
def init_params(key, n_antenna, n_wide, n_narrow):
    L4 = n_wide - 4
    flatten_dim = 64 * L4
    keys = jax.random.split(key, 7)
    theta = jax.random.uniform(keys[0], (n_antenna, n_wide), jnp.float32,
                               0.0, 2.0 * np.pi)
    W1 = jax.random.uniform(keys[1], (32, 1, 2), jnp.float32, -0.5, 0.5)
    b1 = jax.random.uniform(keys[2], (32,), jnp.float32, -0.5, 0.5)
    W2 = jax.random.uniform(keys[3], (64, 32, 2), jnp.float32, -0.2, 0.2)
    b2 = jax.random.uniform(keys[4], (64,), jnp.float32, -0.2, 0.2)
    Wd = jax.random.uniform(keys[5], (n_narrow, flatten_dim), jnp.float32,
                            -0.05, 0.05)
    bd = jax.random.uniform(keys[6], (n_narrow,), jnp.float32, -0.05, 0.05)
    return theta, W1, b1, W2, b2, Wd, bd


def pack_kernel_params(theta, W1, b1, W2, b2, Wd, bd, n_antenna):
    """All weight-layout plumbing happens here, once, on the host."""
    theta = np.asarray(theta); W1 = np.asarray(W1); b1 = np.asarray(b1)
    W2 = np.asarray(W2); b2 = np.asarray(b2)
    Wd = np.asarray(Wd); bd = np.asarray(bd)
    n_wide = theta.shape[1]
    L1, L4 = n_wide - 1, n_wide - 4
    n_narrow = Wd.shape[0]

    # PhaseShifter block matrix [[cos, -sin], [sin, cos]] / sqrt(n_antenna),
    # stored transposed so the kernel computes bf^T = wcb^T @ x^T.
    scale = float(np.sqrt(n_antenna))
    rk = np.cos(theta) / scale
    ik = np.sin(theta) / scale
    wcb = np.concatenate([np.concatenate([rk, -ik], axis=1),
                          np.concatenate([ik, rk], axis=1)], axis=0)   # (2Na, 2Nw)
    wcbT = np.ascontiguousarray(wcb.T).astype(np.float32)              # (2Nw, 2Na)

    # conv1 as a single matmul: im2col on the weight side.
    # w1sp[l*32 + c, j] = W1[c,0,0] if j==l, W1[c,0,1] if j==l+1, else 0.
    w1sp = np.zeros((L1 * 32, n_wide), np.float32)
    for l in range(L1):
        w1sp[l * 32:(l + 1) * 32, l] = W1[:, 0, 0]
        w1sp[l * 32:(l + 1) * 32, l + 1] = W1[:, 0, 1]
    b1r = np.tile(b1, L1).reshape(L1 * 32, 1).astype(np.float32)

    # conv2: fuse both taps into one (64, 64) weight [W2[:,:,0] | W2[:,:,1]].
    w2c = np.concatenate([W2[:, :, 0], W2[:, :, 1]], axis=1).astype(np.float32)
    b2c = b2.reshape(64, 1).astype(np.float32)

    # dense: torch flatten index is c*L4 + l; the fused kernel consumes one
    # (n_narrow, 64) slab per pooled position l, so store the dense weight as
    # wd3[l, n, c] = Wd[n, c*L4 + l].
    wd3 = np.transpose(Wd.reshape(n_narrow, 64, L4), (2, 0, 1)).astype(np.float32)
    bd_col = bd.reshape(n_narrow, 1).astype(np.float32)

    return tuple(jnp.asarray(a) for a in
                 (wcbT, w1sp, b1r, w2c, b2c, wd3, bd_col))


# ----------------------------------------------------------------------------
# Pure-JAX reference (mirrors the torch forward exactly) for validation
# ----------------------------------------------------------------------------
def reference_forward(x, theta, W1, b1, W2, b2, Wd, bd, noise, n_antenna, n_wide):
    scale = float(np.sqrt(n_antenna))
    rk = jnp.cos(theta) / scale
    ik = jnp.sin(theta) / scale
    wcb = jnp.concatenate([jnp.concatenate([rk, -ik], axis=1),
                           jnp.concatenate([ik, rk], axis=1)], axis=0)
    bf = jnp.dot(x, wcb, precision=lax.Precision.HIGHEST) + noise
    power = bf[:, :n_wide] ** 2 + bf[:, n_wide:] ** 2
    h = power[:, None, :]                                    # (B, 1, Nw)  NCL
    dn = ('NCH', 'OIH', 'NCH')
    h = lax.conv_general_dilated(h, W1, (1,), 'VALID', dimension_numbers=dn,
                                 precision=lax.Precision.HIGHEST) + b1[None, :, None]
    h = jnp.maximum(h, 0.0)
    h = jnp.maximum(h[:, :, :-1], h[:, :, 1:])               # MaxPool1d(2, stride=1)
    h = lax.conv_general_dilated(h, W2, (1,), 'VALID', dimension_numbers=dn,
                                 precision=lax.Precision.HIGHEST) + b2[None, :, None]
    h = jnp.maximum(h, 0.0)
    h = jnp.maximum(h[:, :, :-1], h[:, :, 1:])               # MaxPool1d(2, stride=1)
    flat = h.reshape(h.shape[0], -1)                         # channel-major flatten
    return jnp.dot(flat, Wd.T, precision=lax.Precision.HIGHEST) + bd[None, :]


# ----------------------------------------------------------------------------
if __name__ == "__main__":
    B = 512                      # two batch tiles -> feeds both v7x TensorCores
    n_antenna = 8
    n_wide = 16
    n_narrow = 8
    noise_power = 0.0            # torch default argument
    norm_factor = 1.0

    key = jax.random.PRNGKey(0)
    kx, kn, kp = jax.random.split(key, 3)

    theta, W1, b1, W2, b2, Wd, bd = init_params(kp, n_antenna, n_wide, n_narrow)
    params = pack_kernel_params(theta, W1, b1, W2, b2, Wd, bd, n_antenna)

    x = jax.random.normal(kx, (B, 2 * n_antenna), jnp.float32)
    # torch.normal(0,1)*sqrt(noise_power/2)/norm_factor; the RNG is wrapper
    # glue, the noise addition itself happens inside the kernel.
    noise = (jax.random.normal(kn, (B, 2 * n_wide), jnp.float32)
             * float(np.sqrt(noise_power / 2.0)) / norm_factor)

    out = beam_classifier_cnn_rsrp(x, noise, params, tb=256)
    out = jax.block_until_ready(out)

    ref = reference_forward(x, theta, W1, b1, W2, b2, Wd, bd, noise,
                            n_antenna, n_wide)
    np.testing.assert_allclose(np.asarray(out), np.asarray(ref),
                               rtol=1e-4, atol=1e-4)
    print("KERNEL_OK")
</pallas_src>

<mosaic_0001>
module attributes {stable_mosaic.version = 11 : i64} {
  func.func @kernel(%arg0: i32, %arg1: memref<256x16xf32, #tpu.memory_space<vmem>>, %arg2: memref<32x256xf32, #tpu.memory_space<vmem>>, %arg3: memref<32x16xf32, #tpu.memory_space<vmem>>, %arg4: memref<480x16xf32, #tpu.memory_space<vmem>>, %arg5: memref<480x1xf32, #tpu.memory_space<vmem>>, %arg6: memref<64x64xf32, #tpu.memory_space<vmem>>, %arg7: memref<64x1xf32, #tpu.memory_space<vmem>>, %arg8: memref<12x8x64xf32, #tpu.memory_space<vmem>>, %arg9: memref<8x1xf32, #tpu.memory_space<vmem>>, %arg10: memref<8x256xf32, #tpu.memory_space<vmem>>) attributes {dimension_semantics = [#tpu.dimension_semantics<parallel>], iteration_bounds = array<i64: 2>, scalar_prefetch = 0 : i64, scratch_operands = 0 : i64, tpu.core_type = #tpu.core_type<tc>, window_params = [{transform_indices = @transform_0, window_bounds = array<i64: 256, 16>}, {transform_indices = @transform_1, window_bounds = array<i64: 32, 256>}, {pipeline_mode = #tpu.pipeline_mode<synchronous>, transform_indices = @transform_2, window_bounds = array<i64: 32, 16>}, {pipeline_mode = #tpu.pipeline_mode<synchronous>, transform_indices = @transform_3, window_bounds = array<i64: 480, 16>}, {pipeline_mode = #tpu.pipeline_mode<synchronous>, transform_indices = @transform_4, window_bounds = array<i64: 480, 1>}, {pipeline_mode = #tpu.pipeline_mode<synchronous>, transform_indices = @transform_5, window_bounds = array<i64: 64, 64>}, {pipeline_mode = #tpu.pipeline_mode<synchronous>, transform_indices = @transform_6, window_bounds = array<i64: 64, 1>}, {pipeline_mode = #tpu.pipeline_mode<synchronous>, transform_indices = @transform_7, window_bounds = array<i64: 12, 8, 64>}, {pipeline_mode = #tpu.pipeline_mode<synchronous>, transform_indices = @transform_8, window_bounds = array<i64: 8, 1>}, {transform_indices = @transform_9, window_bounds = array<i64: 8, 256>}]} {
    %c0 = arith.constant 0 : index
    %c0_0 = arith.constant 0 : index
    %0 = vector.load %arg3[%c0, %c0_0] : memref<32x16xf32, #tpu.memory_space<vmem>>, vector<32x16xf32>
    %c0_1 = arith.constant 0 : index
    %c0_2 = arith.constant 0 : index
    %1 = vector.load %arg1[%c0_1, %c0_2] : memref<256x16xf32, #tpu.memory_space<vmem>>, vector<256x16xf32>
    %cst = arith.constant dense<0.000000e+00> : vector<32x256xf32>
    %2 = tpu.matmul %0, %1, %cst {dimension_numbers = #tpu.dot_dimension_numbers<[1], [1], [0], [0], [0, 0, 1, 0], [], []>} : vector<32x16xf32>, vector<256x16xf32>, vector<32x256xf32> -> vector<32x256xf32>
    %c0_3 = arith.constant 0 : index
    %c0_4 = arith.constant 0 : index
    %3 = vector.load %arg2[%c0_3, %c0_4] : memref<32x256xf32, #tpu.memory_space<vmem>>, vector<32x256xf32>
    %4 = arith.addf %2, %3 : vector<32x256xf32>
    %5 = vector.extract_strided_slice %4 {offsets = [0, 0], sizes = [16, 256], strides = [1, 1]} : vector<32x256xf32> to vector<16x256xf32>
    %6 = vector.extract_strided_slice %4 {offsets = [16, 0], sizes = [16, 256], strides = [1, 1]} : vector<32x256xf32> to vector<16x256xf32>
    %7 = arith.mulf %5, %5 : vector<16x256xf32>
    %8 = arith.mulf %6, %6 : vector<16x256xf32>
    %9 = arith.addf %7, %8 : vector<16x256xf32>
    %c0_5 = arith.constant 0 : index
    %c0_6 = arith.constant 0 : index
    %10 = vector.load %arg4[%c0_5, %c0_6] : memref<480x16xf32, #tpu.memory_space<vmem>>, vector<480x16xf32>
    %cst_7 = arith.constant dense<0.000000e+00> : vector<480x256xf32>
    %11 = tpu.matmul %10, %9, %cst_7 {dimension_numbers = #tpu.dot_dimension_numbers<[1], [0], [0], [1], [0, 0, 1, 1], [], []>} : vector<480x16xf32>, vector<16x256xf32>, vector<480x256xf32> -> vector<480x256xf32>
    %c0_8 = arith.constant 0 : index
    %c0_9 = arith.constant 0 : index
    %12 = vector.load %arg5[%c0_8, %c0_9] : memref<480x1xf32, #tpu.memory_space<vmem>>, vector<480x1xf32>
    %13 = vector.broadcast %12 : vector<480x1xf32> to vector<480x256xf32>
    %14 = arith.addf %11, %13 : vector<480x256xf32>
    %cst_10 = arith.constant 0.000000e+00 : f32
    %15 = vector.broadcast %cst_10 : f32 to vector<480x256xf32>
    %16 = arith.maximumf %14, %15 : vector<480x256xf32>
    %17 = vector.extract_strided_slice %16 {offsets = [0, 0], sizes = [448, 256], strides = [1, 1]} : vector<480x256xf32> to vector<448x256xf32>
    %18 = vector.extract_strided_slice %16 {offsets = [32, 0], sizes = [448, 256], strides = [1, 1]} : vector<480x256xf32> to vector<448x256xf32>
    %19 = arith.maximumf %17, %18 : vector<448x256xf32>
    %c0_11 = arith.constant 0 : index
    %c0_12 = arith.constant 0 : index
    %20 = vector.load %arg6[%c0_11, %c0_12] : memref<64x64xf32, #tpu.memory_space<vmem>>, vector<64x64xf32>
    %c0_13 = arith.constant 0 : index
    %c0_14 = arith.constant 0 : index
    %21 = vector.load %arg7[%c0_13, %c0_14] : memref<64x1xf32, #tpu.memory_space<vmem>>, vector<64x1xf32>
    %c0_15 = arith.constant 0 : index
    %c0_16 = arith.constant 0 : index
    %c0_17 = arith.constant 0 : index
    %22 = vector.load %arg8[%c0_15, %c0_16, %c0_17] : memref<12x8x64xf32, #tpu.memory_space<vmem>>, vector<12x8x64xf32>
    %23 = vector.extract_strided_slice %19 {offsets = [0, 0], sizes = [64, 256], strides = [1, 1]} : vector<448x256xf32> to vector<64x256xf32>
    %cst_18 = arith.constant dense<0.000000e+00> : vector<64x256xf32>
    %24 = tpu.matmul %20, %23, %cst_18 {dimension_numbers = #tpu.dot_dimension_numbers<[1], [0], [0], [1], [0, 0, 1, 1], [], []>} : vector<64x64xf32>, vector<64x256xf32>, vector<64x256xf32> -> vector<64x256xf32>
    %25 = vector.broadcast %21 : vector<64x1xf32> to vector<64x256xf32>
    %26 = arith.addf %24, %25 : vector<64x256xf32>
    %cst_19 = arith.constant 0.000000e+00 : f32
    %27 = vector.broadcast %cst_19 : f32 to vector<64x256xf32>
    %28 = arith.maximumf %26, %27 : vector<64x256xf32>
    %29 = vector.extract_strided_slice %19 {offsets = [32, 0], sizes = [64, 256], strides = [1, 1]} : vector<448x256xf32> to vector<64x256xf32>
    %cst_20 = arith.constant dense<0.000000e+00> : vector<64x256xf32>
    %30 = tpu.matmul %20, %29, %cst_20 {dimension_numbers = #tpu.dot_dimension_numbers<[1], [0], [0], [1], [0, 0, 1, 1], [], []>} : vector<64x64xf32>, vector<64x256xf32>, vector<64x256xf32> -> vector<64x256xf32>
    %31 = vector.broadcast %21 : vector<64x1xf32> to vector<64x256xf32>
    %32 = arith.addf %30, %31 : vector<64x256xf32>
    %cst_21 = arith.constant 0.000000e+00 : f32
    %33 = vector.broadcast %cst_21 : f32 to vector<64x256xf32>
    %34 = arith.maximumf %32, %33 : vector<64x256xf32>
    %35 = arith.maximumf %28, %34 : vector<64x256xf32>
    %36 = vector.extract_strided_slice %22 {offsets = [0, 0, 0], sizes = [1, 8, 64], strides = [1, 1, 1]} : vector<12x8x64xf32> to vector<1x8x64xf32>
    %37 = vector.shape_cast %36 : vector<1x8x64xf32> to vector<8x64xf32>
    %cst_22 = arith.constant dense<0.000000e+00> : vector<8x256xf32>
    %38 = tpu.matmul %37, %35, %cst_22 {dimension_numbers = #tpu.dot_dimension_numbers<[1], [0], [0], [1], [0, 0, 1, 1], [], []>} : vector<8x64xf32>, vector<64x256xf32>, vector<8x256xf32> -> vector<8x256xf32>
    %39 = vector.extract_strided_slice %19 {offsets = [64, 0], sizes = [64, 256], strides = [1, 1]} : vector<448x256xf32> to vector<64x256xf32>
    %cst_23 = arith.constant dense<0.000000e+00> : vector<64x256xf32>
    %40 = tpu.matmul %20, %39, %cst_23 {dimension_numbers = #tpu.dot_dimension_numbers<[1], [0], [0], [1], [0, 0, 1, 1], [], []>} : vector<64x64xf32>, vector<64x256xf32>, vector<64x256xf32> -> vector<64x256xf32>
    %41 = vector.broadcast %21 : vector<64x1xf32> to vector<64x256xf32>
    %42 = arith.addf %40, %41 : vector<64x256xf32>
    %cst_24 = arith.constant 0.000000e+00 : f32
    %43 = vector.broadcast %cst_24 : f32 to vector<64x256xf32>
    %44 = arith.maximumf %42, %43 : vector<64x256xf32>
    %45 = arith.maximumf %34, %44 : vector<64x256xf32>
    %46 = vector.extract_strided_slice %22 {offsets = [1, 0, 0], sizes = [1, 8, 64], strides = [1, 1, 1]} : vector<12x8x64xf32> to vector<1x8x64xf32>
    %47 = vector.shape_cast %46 : vector<1x8x64xf32> to vector<8x64xf32>
    %cst_25 = arith.constant dense<0.000000e+00> : vector<8x256xf32>
    %48 = tpu.matmul %47, %45, %cst_25 {dimension_numbers = #tpu.dot_dimension_numbers<[1], [0], [0], [1], [0, 0, 1, 1], [], []>} : vector<8x64xf32>, vector<64x256xf32>, vector<8x256xf32> -> vector<8x256xf32>
    %49 = arith.addf %38, %48 : vector<8x256xf32>
    %50 = vector.extract_strided_slice %19 {offsets = [96, 0], sizes = [64, 256], strides = [1, 1]} : vector<448x256xf32> to vector<64x256xf32>
    %cst_26 = arith.constant dense<0.000000e+00> : vector<64x256xf32>
    %51 = tpu.matmul %20, %50, %cst_26 {dimension_numbers = #tpu.dot_dimension_numbers<[1], [0], [0], [1], [0, 0, 1, 1], [], []>} : vector<64x64xf32>, vector<64x256xf32>, vector<64x256xf32> -> vector<64x256xf32>
    %52 = vector.broadcast %21 : vector<64x1xf32> to vector<64x256xf32>
    %53 = arith.addf %51, %52 : vector<64x256xf32>
    %cst_27 = arith.constant 0.000000e+00 : f32
    %54 = vector.broadcast %cst_27 : f32 to vector<64x256xf32>
    %55 = arith.maximumf %53, %54 : vector<64x256xf32>
    %56 = arith.maximumf %44, %55 : vector<64x256xf32>
    %57 = vector.extract_strided_slice %22 {offsets = [2, 0, 0], sizes = [1, 8, 64], strides = [1, 1, 1]} : vector<12x8x64xf32> to vector<1x8x64xf32>
    %58 = vector.shape_cast %57 : vector<1x8x64xf32> to vector<8x64xf32>
    %cst_28 = arith.constant dense<0.000000e+00> : vector<8x256xf32>
    %59 = tpu.matmul %58, %56, %cst_28 {dimension_numbers = #tpu.dot_dimension_numbers<[1], [0], [0], [1], [0, 0, 1, 1], [], []>} : vector<8x64xf32>, vector<64x256xf32>, vector<8x256xf32> -> vector<8x256xf32>
    %60 = arith.addf %49, %59 : vector<8x256xf32>
    %61 = vector.extract_strided_slice %19 {offsets = [128, 0], sizes = [64, 256], strides = [1, 1]} : vector<448x256xf32> to vector<64x256xf32>
    %cst_29 = arith.constant dense<0.000000e+00> : vector<64x256xf32>
    %62 = tpu.matmul %20, %61, %cst_29 {dimension_numbers = #tpu.dot_dimension_numbers<[1], [0], [0], [1], [0, 0, 1, 1], [], []>} : vector<64x64xf32>, vector<64x256xf32>, vector<64x256xf32> -> vector<64x256xf32>
    %63 = vector.broadcast %21 : vector<64x1xf32> to vector<64x256xf32>
    %64 = arith.addf %62, %63 : vector<64x256xf32>
    %cst_30 = arith.constant 0.000000e+00 : f32
    %65 = vector.broadcast %cst_30 : f32 to vector<64x256xf32>
    %66 = arith.maximumf %64, %65 : vector<64x256xf32>
    %67 = arith.maximumf %55, %66 : vector<64x256xf32>
    %68 = vector.extract_strided_slice %22 {offsets = [3, 0, 0], sizes = [1, 8, 64], strides = [1, 1, 1]} : vector<12x8x64xf32> to vector<1x8x64xf32>
    %69 = vector.shape_cast %68 : vector<1x8x64xf32> to vector<8x64xf32>
    %cst_31 = arith.constant dense<0.000000e+00> : vector<8x256xf32>
    %70 = tpu.matmul %69, %67, %cst_31 {dimension_numbers = #tpu.dot_dimension_numbers<[1], [0], [0], [1], [0, 0, 1, 1], [], []>} : vector<8x64xf32>, vector<64x256xf32>, vector<8x256xf32> -> vector<8x256xf32>
    %71 = arith.addf %60, %70 : vector<8x256xf32>
    %72 = vector.extract_strided_slice %19 {offsets = [160, 0], sizes = [64, 256], strides = [1, 1]} : vector<448x256xf32> to vector<64x256xf32>
    %cst_32 = arith.constant dense<0.000000e+00> : vector<64x256xf32>
    %73 = tpu.matmul %20, %72, %cst_32 {dimension_numbers = #tpu.dot_dimension_numbers<[1], [0], [0], [1], [0, 0, 1, 1], [], []>} : vector<64x64xf32>, vector<64x256xf32>, vector<64x256xf32> -> vector<64x256xf32>
    %74 = vector.broadcast %21 : vector<64x1xf32> to vector<64x256xf32>
    %75 = arith.addf %73, %74 : vector<64x256xf32>
    %cst_33 = arith.constant 0.000000e+00 : f32
    %76 = vector.broadcast %cst_33 : f32 to vector<64x256xf32>
    %77 = arith.maximumf %75, %76 : vector<64x256xf32>
    %78 = arith.maximumf %66, %77 : vector<64x256xf32>
    %79 = vector.extract_strided_slice %22 {offsets = [4, 0, 0], sizes = [1, 8, 64], strides = [1, 1, 1]} : vector<12x8x64xf32> to vector<1x8x64xf32>
    %80 = vector.shape_cast %79 : vector<1x8x64xf32> to vector<8x64xf32>
    %cst_34 = arith.constant dense<0.000000e+00> : vector<8x256xf32>
    %81 = tpu.matmul %80, %78, %cst_34 {dimension_numbers = #tpu.dot_dimension_numbers<[1], [0], [0], [1], [0, 0, 1, 1], [], []>} : vector<8x64xf32>, vector<64x256xf32>, vector<8x256xf32> -> vector<8x256xf32>
    %82 = arith.addf %71, %81 : vector<8x256xf32>
    %83 = vector.extract_strided_slice %19 {offsets = [192, 0], sizes = [64, 256], strides = [1, 1]} : vector<448x256xf32> to vector<64x256xf32>
    %cst_35 = arith.constant dense<0.000000e+00> : vector<64x256xf32>
    %84 = tpu.matmul %20, %83, %cst_35 {dimension_numbers = #tpu.dot_dimension_numbers<[1], [0], [0], [1], [0, 0, 1, 1], [], []>} : vector<64x64xf32>, vector<64x256xf32>, vector<64x256xf32> -> vector<64x256xf32>
    %85 = vector.broadcast %21 : vector<64x1xf32> to vector<64x256xf32>
    %86 = arith.addf %84, %85 : vector<64x256xf32>
    %cst_36 = arith.constant 0.000000e+00 : f32
    %87 = vector.broadcast %cst_36 : f32 to vector<64x256xf32>
    %88 = arith.maximumf %86, %87 : vector<64x256xf32>
    %89 = arith.maximumf %77, %88 : vector<64x256xf32>
    %90 = vector.extract_strided_slice %22 {offsets = [5, 0, 0], sizes = [1, 8, 64], strides = [1, 1, 1]} : vector<12x8x64xf32> to vector<1x8x64xf32>
    %91 = vector.shape_cast %90 : vector<1x8x64xf32> to vector<8x64xf32>
    %cst_37 = arith.constant dense<0.000000e+00> : vector<8x256xf32>
    %92 = tpu.matmul %91, %89, %cst_37 {dimension_numbers = #tpu.dot_dimension_numbers<[1], [0], [0], [1], [0, 0, 1, 1], [], []>} : vector<8x64xf32>, vector<64x256xf32>, vector<8x256xf32> -> vector<8x256xf32>
    %93 = arith.addf %82, %92 : vector<8x256xf32>
    %94 = vector.extract_strided_slice %19 {offsets = [224, 0], sizes = [64, 256], strides = [1, 1]} : vector<448x256xf32> to vector<64x256xf32>
    %cst_38 = arith.constant dense<0.000000e+00> : vector<64x256xf32>
    %95 = tpu.matmul %20, %94, %cst_38 {dimension_numbers = #tpu.dot_dimension_numbers<[1], [0], [0], [1], [0, 0, 1, 1], [], []>} : vector<64x64xf32>, vector<64x256xf32>, vector<64x256xf32> -> vector<64x256xf32>
    %96 = vector.broadcast %21 : vector<64x1xf32> to vector<64x256xf32>
    %97 = arith.addf %95, %96 : vector<64x256xf32>
    %cst_39 = arith.constant 0.000000e+00 : f32
    %98 = vector.broadcast %cst_39 : f32 to vector<64x256xf32>
    %99 = arith.maximumf %97, %98 : vector<64x256xf32>
    %100 = arith.maximumf %88, %99 : vector<64x256xf32>
    %101 = vector.extract_strided_slice %22 {offsets = [6, 0, 0], sizes = [1, 8, 64], strides = [1, 1, 1]} : vector<12x8x64xf32> to vector<1x8x64xf32>
    %102 = vector.shape_cast %101 : vector<1x8x64xf32> to vector<8x64xf32>
    %cst_40 = arith.constant dense<0.000000e+00> : vector<8x256xf32>
    %103 = tpu.matmul %102, %100, %cst_40 {dimension_numbers = #tpu.dot_dimension_numbers<[1], [0], [0], [1], [0, 0, 1, 1], [], []>} : vector<8x64xf32>, vector<64x256xf32>, vector<8x256xf32> -> vector<8x256xf32>
    %104 = arith.addf %93, %103 : vector<8x256xf32>
    %105 = vector.extract_strided_slice %19 {offsets = [256, 0], sizes = [64, 256], strides = [1, 1]} : vector<448x256xf32> to vector<64x256xf32>
    %cst_41 = arith.constant dense<0.000000e+00> : vector<64x256xf32>
    %106 = tpu.matmul %20, %105, %cst_41 {dimension_numbers = #tpu.dot_dimension_numbers<[1], [0], [0], [1], [0, 0, 1, 1], [], []>} : vector<64x64xf32>, vector<64x256xf32>, vector<64x256xf32> -> vector<64x256xf32>
    %107 = vector.broadcast %21 : vector<64x1xf32> to vector<64x256xf32>
    %108 = arith.addf %106, %107 : vector<64x256xf32>
    %cst_42 = arith.constant 0.000000e+00 : f32
    %109 = vector.broadcast %cst_42 : f32 to vector<64x256xf32>
    %110 = arith.maximumf %108, %109 : vector<64x256xf32>
    %111 = arith.maximumf %99, %110 : vector<64x256xf32>
    %112 = vector.extract_strided_slice %22 {offsets = [7, 0, 0], sizes = [1, 8, 64], strides = [1, 1, 1]} : vector<12x8x64xf32> to vector<1x8x64xf32>
    %113 = vector.shape_cast %112 : vector<1x8x64xf32> to vector<8x64xf32>
    %cst_43 = arith.constant dense<0.000000e+00> : vector<8x256xf32>
    %114 = tpu.matmul %113, %111, %cst_43 {dimension_numbers = #tpu.dot_dimension_numbers<[1], [0], [0], [1], [0, 0, 1, 1], [], []>} : vector<8x64xf32>, vector<64x256xf32>, vector<8x256xf32> -> vector<8x256xf32>
    %115 = arith.addf %104, %114 : vector<8x256xf32>
    %116 = vector.extract_strided_slice %19 {offsets = [288, 0], sizes = [64, 256], strides = [1, 1]} : vector<448x256xf32> to vector<64x256xf32>
    %cst_44 = arith.constant dense<0.000000e+00> : vector<64x256xf32>
    %117 = tpu.matmul %20, %116, %cst_44 {dimension_numbers = #tpu.dot_dimension_numbers<[1], [0], [0], [1], [0, 0, 1, 1], [], []>} : vector<64x64xf32>, vector<64x256xf32>, vector<64x256xf32> -> vector<64x256xf32>
    %118 = vector.broadcast %21 : vector<64x1xf32> to vector<64x256xf32>
    %119 = arith.addf %117, %118 : vector<64x256xf32>
    %cst_45 = arith.constant 0.000000e+00 : f32
    %120 = vector.broadcast %cst_45 : f32 to vector<64x256xf32>
    %121 = arith.maximumf %119, %120 : vector<64x256xf32>
    %122 = arith.maximumf %110, %121 : vector<64x256xf32>
    %123 = vector.extract_strided_slice %22 {offsets = [8, 0, 0], sizes = [1, 8, 64], strides = [1, 1, 1]} : vector<12x8x64xf32> to vector<1x8x64xf32>
    %124 = vector.shape_cast %123 : vector<1x8x64xf32> to vector<8x64xf32>
    %cst_46 = arith.constant dense<0.000000e+00> : vector<8x256xf32>
    %125 = tpu.matmul %124, %122, %cst_46 {dimension_numbers = #tpu.dot_dimension_numbers<[1], [0], [0], [1], [0, 0, 1, 1], [], []>} : vector<8x64xf32>, vector<64x256xf32>, vector<8x256xf32> -> vector<8x256xf32>
    %126 = arith.addf %115, %125 : vector<8x256xf32>
    %127 = vector.extract_strided_slice %19 {offsets = [320, 0], sizes = [64, 256], strides = [1, 1]} : vector<448x256xf32> to vector<64x256xf32>
    %cst_47 = arith.constant dense<0.000000e+00> : vector<64x256xf32>
    %128 = tpu.matmul %20, %127, %cst_47 {dimension_numbers = #tpu.dot_dimension_numbers<[1], [0], [0], [1], [0, 0, 1, 1], [], []>} : vector<64x64xf32>, vector<64x256xf32>, vector<64x256xf32> -> vector<64x256xf32>
    %129 = vector.broadcast %21 : vector<64x1xf32> to vector<64x256xf32>
    %130 = arith.addf %128, %129 : vector<64x256xf32>
    %cst_48 = arith.constant 0.000000e+00 : f32
    %131 = vector.broadcast %cst_48 : f32 to vector<64x256xf32>
    %132 = arith.maximumf %130, %131 : vector<64x256xf32>
    %133 = arith.maximumf %121, %132 : vector<64x256xf32>
    %134 = vector.extract_strided_slice %22 {offsets = [9, 0, 0], sizes = [1, 8, 64], strides = [1, 1, 1]} : vector<12x8x64xf32> to vector<1x8x64xf32>
    %135 = vector.shape_cast %134 : vector<1x8x64xf32> to vector<8x64xf32>
    %cst_49 = arith.constant dense<0.000000e+00> : vector<8x256xf32>
    %136 = tpu.matmul %135, %133, %cst_49 {dimension_numbers = #tpu.dot_dimension_numbers<[1], [0], [0], [1], [0, 0, 1, 1], [], []>} : vector<8x64xf32>, vector<64x256xf32>, vector<8x256xf32> -> vector<8x256xf32>
    %137 = arith.addf %126, %136 : vector<8x256xf32>
    %138 = vector.extract_strided_slice %19 {offsets = [352, 0], sizes = [64, 256], strides = [1, 1]} : vector<448x256xf32> to vector<64x256xf32>
    %cst_50 = arith.constant dense<0.000000e+00> : vector<64x256xf32>
    %139 = tpu.matmul %20, %138, %cst_50 {dimension_numbers = #tpu.dot_dimension_numbers<[1], [0], [0], [1], [0, 0, 1, 1], [], []>} : vector<64x64xf32>, vector<64x256xf32>, vector<64x256xf32> -> vector<64x256xf32>
    %140 = vector.broadcast %21 : vector<64x1xf32> to vector<64x256xf32>
    %141 = arith.addf %139, %140 : vector<64x256xf32>
    %cst_51 = arith.constant 0.000000e+00 : f32
    %142 = vector.broadcast %cst_51 : f32 to vector<64x256xf32>
    %143 = arith.maximumf %141, %142 : vector<64x256xf32>
    %144 = arith.maximumf %132, %143 : vector<64x256xf32>
    %145 = vector.extract_strided_slice %22 {offsets = [10, 0, 0], sizes = [1, 8, 64], strides = [1, 1, 1]} : vector<12x8x64xf32> to vector<1x8x64xf32>
    %146 = vector.shape_cast %145 : vector<1x8x64xf32> to vector<8x64xf32>
    %cst_52 = arith.constant dense<0.000000e+00> : vector<8x256xf32>
    %147 = tpu.matmul %146, %144, %cst_52 {dimension_numbers = #tpu.dot_dimension_numbers<[1], [0], [0], [1], [0, 0, 1, 1], [], []>} : vector<8x64xf32>, vector<64x256xf32>, vector<8x256xf32> -> vector<8x256xf32>
    %148 = arith.addf %137, %147 : vector<8x256xf32>
    %149 = vector.extract_strided_slice %19 {offsets = [384, 0], sizes = [64, 256], strides = [1, 1]} : vector<448x256xf32> to vector<64x256xf32>
    %cst_53 = arith.constant dense<0.000000e+00> : vector<64x256xf32>
    %150 = tpu.matmul %20, %149, %cst_53 {dimension_numbers = #tpu.dot_dimension_numbers<[1], [0], [0], [1], [0, 0, 1, 1], [], []>} : vector<64x64xf32>, vector<64x256xf32>, vector<64x256xf32> -> vector<64x256xf32>
    %151 = vector.broadcast %21 : vector<64x1xf32> to vector<64x256xf32>
    %152 = arith.addf %150, %151 : vector<64x256xf32>
    %cst_54 = arith.constant 0.000000e+00 : f32
    %153 = vector.broadcast %cst_54 : f32 to vector<64x256xf32>
    %154 = arith.maximumf %152, %153 : vector<64x256xf32>
    %155 = arith.maximumf %143, %154 : vector<64x256xf32>
    %156 = vector.extract_strided_slice %22 {offsets = [11, 0, 0], sizes = [1, 8, 64], strides = [1, 1, 1]} : vector<12x8x64xf32> to vector<1x8x64xf32>
    %157 = vector.shape_cast %156 : vector<1x8x64xf32> to vector<8x64xf32>
    %cst_55 = arith.constant dense<0.000000e+00> : vector<8x256xf32>
    %158 = tpu.matmul %157, %155, %cst_55 {dimension_numbers = #tpu.dot_dimension_numbers<[1], [0], [0], [1], [0, 0, 1, 1], [], []>} : vector<8x64xf32>, vector<64x256xf32>, vector<8x256xf32> -> vector<8x256xf32>
    %159 = arith.addf %148, %158 : vector<8x256xf32>
    %c0_56 = arith.constant 0 : index
    %c0_57 = arith.constant 0 : index
    %160 = vector.load %arg9[%c0_56, %c0_57] : memref<8x1xf32, #tpu.memory_space<vmem>>, vector<8x1xf32>
    %161 = vector.broadcast %160 : vector<8x1xf32> to vector<8x256xf32>
    %162 = arith.addf %159, %161 : vector<8x256xf32>
    %c0_58 = arith.constant 0 : index
    %c0_59 = arith.constant 0 : index
    %163 = vector.load %arg10[%c0_58, %c0_59] : memref<8x256xf32, #tpu.memory_space<vmem>>, vector<8x256xf32>
    tpu.vector_store %arg10[%c0_58, %c0_59], %162 {strides = array<i32>} : memref<8x256xf32, #tpu.memory_space<vmem>>, vector<8x256xf32>,
    return
  }
  func.func @transform_0(%arg0: i32) -> (i32, i32) {
    %c0_i32 = arith.constant 0 : i32
    %c0_i32_0 = arith.constant 0 : i32
    return %arg0, %c0_i32 : i32, i32
  }
  func.func @transform_1(%arg0: i32) -> (i32, i32) {
    %c0_i32 = arith.constant 0 : i32
    %c0_i32_0 = arith.constant 0 : i32
    return %c0_i32, %arg0 : i32, i32
  }
  func.func @transform_2(%arg0: i32) -> (i32, i32) {
    %c0_i32 = arith.constant 0 : i32
    %c0_i32_0 = arith.constant 0 : i32
    %c0_i32_1 = arith.constant 0 : i32
    return %c0_i32, %c0_i32_0 : i32, i32
  }
  func.func @transform_3(%arg0: i32) -> (i32, i32) {
    %c0_i32 = arith.constant 0 : i32
    %c0_i32_0 = arith.constant 0 : i32
    %c0_i32_1 = arith.constant 0 : i32
    return %c0_i32, %c0_i32_0 : i32, i32
  }
  func.func @transform_4(%arg0: i32) -> (i32, i32) {
    %c0_i32 = arith.constant 0 : i32
    %c0_i32_0 = arith.constant 0 : i32
    %c0_i32_1 = arith.constant 0 : i32
    return %c0_i32, %c0_i32_0 : i32, i32
  }
  func.func @transform_5(%arg0: i32) -> (i32, i32) {
    %c0_i32 = arith.constant 0 : i32
    %c0_i32_0 = arith.constant 0 : i32
    %c0_i32_1 = arith.constant 0 : i32
    return %c0_i32, %c0_i32_0 : i32, i32
  }
  func.func @transform_6(%arg0: i32) -> (i32, i32) {
    %c0_i32 = arith.constant 0 : i32
    %c0_i32_0 = arith.constant 0 : i32
    %c0_i32_1 = arith.constant 0 : i32
    return %c0_i32, %c0_i32_0 : i32, i32
  }
  func.func @transform_7(%arg0: i32) -> (i32, i32, i32) {
    %c0_i32 = arith.constant 0 : i32
    %c0_i32_0 = arith.constant 0 : i32
    %c0_i32_1 = arith.constant 0 : i32
    %c0_i32_2 = arith.constant 0 : i32
    return %c0_i32, %c0_i32_0, %c0_i32_1 : i32, i32, i32
  }
  func.func @transform_8(%arg0: i32) -> (i32, i32) {
    %c0_i32 = arith.constant 0 : i32
    %c0_i32_0 = arith.constant 0 : i32
    %c0_i32_1 = arith.constant 0 : i32
    return %c0_i32, %c0_i32_0 : i32, i32
  }
  func.func @transform_9(%arg0: i32) -> (i32, i32) {
    %c0_i32 = arith.constant 0 : i32
    %c0_i32_0 = arith.constant 0 : i32
    return %c0_i32, %arg0 : i32, i32
  }
}

</mosaic_0001>

<bundles_post_ra>
// kernel: tpu_custom_call.1
= control target key start
LH: loop header
LB: loop body
LE: loop exit
PB: predicated region body
PF: predicated region fallthrough
CT: control target
= control target key end

     0   :  { %14 = vsyncpa [#allocation4], 0  ;;  %s9359_s0 = inlined_call_operand.vmem [shape: f32[512,16], index: 0, kind: input, shape index: {}]   ;;  %s9360_s1 = inlined_call_operand.vmem [shape: f32[32,512], index: 1, kind: input, shape index: {}]   ;;  %s9361_s2 = inlined_call_operand.vmem [shape: f32[32,16], index: 2, kind: input, shape index: {}]   ;;  %s9362_s3 = inlined_call_operand.vmem [shape: f32[480,16], index: 3, kind: input, shape index: {}]   ;;  %s9363_s4 = inlined_call_operand.vmem [shape: f32[480,1], index: 4, kind: input, shape index: {}]   ;;  %s9364_s5 = inlined_call_operand.vmem [shape: f32[64,64], index: 5, kind: input, shape index: {}]   ;;  %s9365_s6 = inlined_call_operand.vmem [shape: f32[64,1], index: 6, kind: input, shape index: {}]   ;;  %s9366_s7 = inlined_call_operand.vmem [shape: f32[12,8,64], index: 7, kind: input, shape index: {}]   ;;  %s9367_s8 = inlined_call_operand.vmem [shape: f32[8,1], index: 8, kind: input, shape index: {}]   ;;  %s9368_s9 = inlined_call_operand.hbm [shape: f32[8,512], index: 9, kind: output, shape index: {}]  }
   0x1   :  { %16 = vsyncpa [#allocation4 + $0x1], 0  ;;  %s5792_s30 = smov 0   ;;  %s5794_s10 = smov 0  }
   0x2   :  { %s5796_s11 = smov 0   ;;  %s5798_s12 = smov 0  }
   0x3 LB: > { %s5813_s13 = sadd.s32 4294967295, %s5737_s12   ;;  %s4872_s14 = sadd.s32 4294967294, %s5737_s12   ;;  %s5737_s12 = sphi %s5798_s12, %s10138_s12   ;;  %s5733_s11 = sphi %s5796_s11, %s10137_s11   ;;  %s5729_s10 = sphi %s5794_s10, %s10136_s10   ;;  %s5725_s30 = sphi %s5792_s30, %s10135_s30  }
   0x4   : > { %s5817_s15 = sadd.s32 1, %s5737_s12   ;;  %s55_s16 = sadd.s32 1, %s5733_s11 }
   0x5   : > { %s52_s17 = ssub.s32 %s5737_s12, %s5817_s15  ;;  %p62_p0 = scmp.ne.s32.totalorder %s5733_s11, %s5729_s10 }
   0x6   : > { %p53_p1 = scmp.eq.s32.totalorder %s52_s17, 0  ;;  %p63_p2 = scmp.eq.s32.totalorder %s5737_s12, 0 }
   0x7   : > { %p239_p3 = scmp.eq.s32.totalorder %s5813_s13, 1  ;;  %p244_p4 = scmp.ne.s32.totalorder %s5729_s10, %s5725_s30 }
   0x8   : > { %s5829_s18 = scalar_select %p53_p1, %s5733_s11, %s55_s16  }
   0x9   : > { %p64_p5 = por %p63_p2, %p62_p0  ;;  %p5831_p6 = por %p239_p3, %p62_p0 }
   0xa   : > { %p245_p7 = scmp.eq.s32.totalorder %s4872_s14, 1  ;;  %p4874_p9 = scmp.ge.s32.totalorder %s5737_s12, 2 }
   0xc   : > { %p5835_p8 = por %p245_p7, %p244_p4  ;;  %282 = sbr.rel (%p4874_p9) target bundleno = 27 (0x1b), region = 44 }
  0x13   : > { %294 = sbr.rel (!%p64_p5) target bundleno = 27 (0x1b), region = 52  ;;  %s296_s21 = sand.u32 (%p64_p5), 1, %s5733_s11  }
  0x14   : > { %s5100_s22 = sshll.u32 (%p64_p5), %s5737_s12, 4  ;;  %s4875_s23 = sshll.u32 (%p64_p5), %s296_s21, 6 }
  0x15   : > { %s301_s26 = scalar_lea.vmem (%p64_p5), %s9360_s1, %s5100_s22  ;;  %s298_s27 = scalar_lea.vmem (%p64_p5), [#allocation2], %s4875_s23 }
  0x16   : > { %v314_v0 = vld [vmem:[%s301_s26] sm:$0xff] (%p64_p5)  ;;  %v316_v1 = vld [vmem:[%s301_s26 + $0x8] sm:$0xff] (%p64_p5) }
  0x17   : > { %v318_v2 = vld [vmem:[%s301_s26 + $0x20] sm:$0xff] (%p64_p5)  ;;  %315 = vst [vmem:[%s298_s27] sm:$0xff] (%p64_p5), %v314_v0  ;;  %317 = vst [vmem:[%s298_s27 + $0x8] sm:$0xff] (%p64_p5), %v316_v1  ;;  %v320_v3 = vld [vmem:[%s301_s26 + $0x28] sm:$0xff] (%p64_p5) }
  0x18   : > { %319 = vst [vmem:[%s298_s27 + $0x10] sm:$0xff] (%p64_p5), %v318_v2  ;;  %v322_v4 = vld [vmem:[%s301_s26 + $0x40] sm:$0xff] (%p64_p5)  ;;  %v324_v5 = vld [vmem:[%s301_s26 + $0x48] sm:$0xff] (%p64_p5)  ;;  %321 = vst [vmem:[%s298_s27 + $0x18] sm:$0xff] (%p64_p5), %v320_v3 }
  0x19   : > { %323 = vst [vmem:[%s298_s27 + $0x20] sm:$0xff] (%p64_p5), %v322_v4  ;;  %325 = vst [vmem:[%s298_s27 + $0x28] sm:$0xff] (%p64_p5), %v324_v5  ;;  %v326_v6 = vld [vmem:[%s301_s26 + $0x60] sm:$0xff] (%p64_p5)  ;;  %v328_v7 = vld [vmem:[%s301_s26 + $0x68] sm:$0xff] (%p64_p5) }
  0x1a   : > { %327 = vst [vmem:[%s298_s27 + $0x30] sm:$0xff] %v326_v6  ;;  %329 = vst [vmem:[%s298_s27 + $0x38] sm:$0xff] %v328_v7 }
  0x1b PF: > { %p4878_p10 = scmp.ge.s32.totalorder %s5737_s12, 1  ;;  %p334_p11 = scmp.lt.s32.totalorder %s5737_s12, 3 }
  0x1d   : > { %p335_p12 = pnand %p4878_p10, %p334_p11 }
  0x1f   : > { %338 = sbr.rel (%p335_p12) target bundleno = 2098 (0x832), region = 75 }
  0x26   : > { %s4881_s28 = sshll.u32 %s5813_s13, 5  ;;  %vm433_vm0 = vcmask 130048   ;;  %v5853_v8 = vld [vmem:[%s9361_s2] sm:$0xff]  ;;  %v5739_v9 = vmov 0   ;;  %v390_v60 = vld [vmem:[%s9361_s2 + $0x8] sm:$0xff]  ;;  %v391_v61 = vld [vmem:[%s9361_s2 + $0x10] sm:$0xff] }
  0x27   : > { %p382_p13 = scmp.lt.s32.totalorder %s4881_s28, 63  ;;  %5134 = vmatprep.mubr.msk.f32.mxu0 %vm433_vm0, %v5853_v8  ;;  %5657 = vset.pattern.permute.xlu0 %v5739_v9  ;;  %v703_v10 = vld [vmem:[%s9363_s4] sm:$0xff]  ;;  %vm5867_vm1 = vmpackc.low %vm433_vm0, %vm433_vm0  ;;  %v392_v62 = vld [vmem:[%s9361_s2 + $0x18] sm:$0xff]  ;;  %v9380_v11 = vmov 0.0   ;;  %s6141_s23 = sand.u32 1, %s5729_s10   ;;  %vm1968_vm2 = vcmask 523264  }
  0x28   : > { %765 = vperm.xlu0 %5657, %v703_v10   ;;  %5658 = vset.pattern.permute.xlu1 %v5739_v9  ;;  %v707_v63 = vld [vmem:[%s9363_s4 + $0x20] sm:$0xff]  ;;  %v704_v0 = vld [vmem:[%s9363_s4 + $0x8] sm:$0xff]  ;;  %v705_v2 = vld [vmem:[%s9363_s4 + $0x10] sm:$0xff]  ;;  %s4880_s17 = sshll.u32 %s6141_s23, 4  ;;  %s5741_s29 = smov [#allocation3]  }
  0x29   : > { %s10140_s28 = smov (!%p382_p13, %s4881_s28), 63  ;;  %785 = vperm.xlu1 %5658, %v707_v63   ;;  %v708_v1 = vld [vmem:[%s9363_s4 + $0x28] sm:$0xff]  ;;  %v706_v3 = vld [vmem:[%s9363_s4 + $0x18] sm:$0xff]  ;;  %v709_v4 = vld [vmem:[%s9363_s4 + $0x30] sm:$0xff]  ;;  %1307 = vmatprep.mubr.f32.mxu1 %v9380_v11  ;;  %s380_s22 = scalar_lea.vmem [#allocation3], %s4880_s17 }
  0x2a   : > { %s4882_s21 = sshll.u32 %s10140_s28, 3  ;;  %v710_v5 = vld [vmem:[%s9363_s4 + $0x38] sm:$0xff]  ;;  %v711_v6 = vld [vmem:[%s9363_s4 + $0x40] sm:$0xff]  ;;  %v712_v7 = vld [vmem:[%s9363_s4 + $0x48] sm:$0xff]  ;;  %s4795_s25 = sshll.u32 %s380_s22, 4  ;;  %s9317_s25 = int_to_ptr.vmem [resolvable:$true] %s4795_s25 }
  0x2b   : > { %s5863_s24 = scalar_lea.vmem %s9359_s0, %s4882_s21  ;;  %v714_v9 = vld [vmem:[%s9363_s4 + $0x58] sm:$0xff]  ;;  %v715_v10 = vld [vmem:[%s9363_s4 + $0x60] sm:$0xff]  ;;  %s5675_s28 = scalar_lea.vmem %s9317_s25, 256 }
  0x2c   : > { %v409_v12 = vld [vmem:[%s5863_s24 + $0x80] sm:$0xff]  ;;  %v410_v13 = vld [vmem:[%s5863_s24 + $0x88] sm:$0xff]  ;;  %v411_v17 = vld [vmem:[%s5863_s24 + $0x90] sm:$0xff]  ;;  %770 = vperm.xlu0 %5657, %v704_v0   ;;  %p5676_p0 = scmp.ne.s32.totalorder %s9317_s25, %s5675_s28  ;;  %s5679_s14 = sshll.u32 %s5741_s29, 4  ;;  %s5680_s14 = int_to_ptr.vmem [resolvable:$false] %s5679_s14 }
  0x2d   : > { %v393_v14 = vld [vmem:[%s5863_s24] sm:$0xff]  ;;  %v5142_v15 = vpack.c.bf16 %v410_v13, %v409_v12  ;;  %v394_v16 = vld [vmem:[%s5863_s24 + $0x8] sm:$0xff]  ;;  %v412_v18 = vld [vmem:[%s5863_s24 + $0x98] sm:$0xff]  ;;  %790 = vperm.xlu1 %5658, %v708_v1   ;;  %s5681_s16 = scalar_lea.vmem %s5680_s14, 512  ;;  %p5682_p3 = scmp.lt.s32.totalorder %s9317_s25, %s5680_s14 }
  0x2e   : > { %v5145_v19 = vpack.c.bf16 %v394_v16, %v393_v14  ;;  %v5148_v20 = vpack.c.bf16 %v412_v18, %v411_v17  ;;  %v395_v21 = vld [vmem:[%s5863_s24 + $0x10] sm:$0xff]  ;;  %v396_v22 = vld [vmem:[%s5863_s24 + $0x18] sm:$0xff]  ;;  %v413_v23 = vld [vmem:[%s5863_s24 + $0xa0] sm:$0xff]  ;;  %p5677_p1 = pnand %p5676_p0, %p5831_p6  ;;  %p5683_p4 = scmp.lt.s32.totalorder %s5681_s16, %s5675_s28 }
  0x2f   : > { %5144 = vmatprep.subr.msk.bf16.mxu0 %vm5867_vm1, %v5142_v15  ;;  %v414_v24 = vld [vmem:[%s5863_s24 + $0xa8] sm:$0xff]  ;;  %v5151_v25 = vpack.c.bf16 %v396_v22, %v395_v21  ;;  %v397_v27 = vld [vmem:[%s5863_s24 + $0x20] sm:$0xff]  ;;  %v415_v29 = vld [vmem:[%s5863_s24 + $0xb0] sm:$0xff] }
  0x30   : > { %5147 = vmatpush3.bf16.xpose.msk.msra.mxu0 %vm5867_vm1, %v5145_v19  ;;  %v5154_v26 = vpack.c.bf16 %v414_v24, %v413_v23  ;;  %v398_v28 = vld [vmem:[%s5863_s24 + $0x28] sm:$0xff]  ;;  %v416_v30 = vld [vmem:[%s5863_s24 + $0xb8] sm:$0xff]  ;;  %v399_v33 = vld [vmem:[%s5863_s24 + $0x30] sm:$0xff]  ;;  %775 = vperm.xlu0 %5657, %v705_v2   ;;  %p5678_p2 = pneg %p5677_p1  ;;  %p5684_p5 = por %p5683_p4, %p5682_p3 }
  0x31   : > { %5150 = vmatprep.subr.msk.bf16.mxu0 %vm5867_vm1, %v5148_v20  ;;  %v5157_v31 = vpack.c.bf16 %v398_v28, %v397_v27  ;;  %v5160_v32 = vpack.c.bf16 %v416_v30, %v415_v29  ;;  %v400_v34 = vld [vmem:[%s5863_s24 + $0x38] sm:$0xff]  ;;  %v417_v35 = vld [vmem:[%s5863_s24 + $0xc0] sm:$0xff]  ;;  %v418_v36 = vld [vmem:[%s5863_s24 + $0xc8] sm:$0xff]  ;;  %780 = vperm.xlu1 %5658, %v706_v3  }
  0x32   : > { %v5163_v37 = vpack.c.bf16 %v400_v34, %v399_v33  ;;  %v5166_v38 = vpack.c.bf16 %v418_v36, %v417_v35  ;;  %v401_v39 = vld [vmem:[%s5863_s24 + $0x40] sm:$0xff]  ;;  %v402_v40 = vld [vmem:[%s5863_s24 + $0x48] sm:$0xff]  ;;  %v419_v41 = vld [vmem:[%s5863_s24 + $0xd0] sm:$0xff]  ;;  %p5685_p7 = pnand %p5684_p5, %p5678_p2 }
  0x33   : > { %v420_v42 = vld [vmem:[%s5863_s24 + $0xd8] sm:$0xff]  ;;  %v5169_v43 = vpack.c.bf16 %v402_v40, %v401_v39  ;;  %v403_v45 = vld [vmem:[%s5863_s24 + $0x50] sm:$0xff]  ;;  %v421_v47 = vld [vmem:[%s5863_s24 + $0xe0] sm:$0xff] }
  0x34   : > { %v5172_v44 = vpack.c.bf16 %v420_v42, %v419_v41  ;;  %v404_v46 = vld [vmem:[%s5863_s24 + $0x58] sm:$0xff]  ;;  %v422_v48 = vld [vmem:[%s5863_s24 + $0xe8] sm:$0xff]  ;;  %v405_v51 = vld [vmem:[%s5863_s24 + $0x60] sm:$0xff]  ;;  %795 = vperm.xlu0 %5657, %v709_v4  }
  0x35   : > { %v5175_v49 = vpack.c.bf16 %v404_v46, %v403_v45  ;;  %v5178_v50 = vpack.c.bf16 %v422_v48, %v421_v47  ;;  %v406_v52 = vld [vmem:[%s5863_s24 + $0x68] sm:$0xff]  ;;  %v423_v53 = vld [vmem:[%s5863_s24 + $0xf0] sm:$0xff]  ;;  %v424_v54 = vld [vmem:[%s5863_s24 + $0xf8] sm:$0xff]  ;;  %800 = vperm.xlu1 %5658, %v710_v5  }
  0x36   : > { %v5181_v55 = vpack.c.bf16 %v406_v52, %v405_v51  ;;  %v5184_v56 = vpack.c.bf16 %v424_v54, %v423_v53  ;;  %v407_v57 = vld [vmem:[%s5863_s24 + $0x70] sm:$0xff]  ;;  %v408_v58 = vld [vmem:[%s5863_s24 + $0x78] sm:$0xff]  ;;  %v716_v12 = vld [vmem:[%s9363_s4 + $0x68] sm:$0xff]  ;;  %s4879_s24 = sshll.u32 %s6141_s23, 6 }
  0x37   : > { %v5187_v59 = vpack.c.bf16 %v408_v58, %v407_v57  ;;  %v717_v13 = vld [vmem:[%s9363_s4 + $0x70] sm:$0xff]  ;;  %v718_v14 = vld [vmem:[%s9363_s4 + $0x78] sm:$0xff]  ;;  %v719_v15 = vld [vmem:[%s9363_s4 + $0x80] sm:$0xff]  ;;  %s343_s21 = scalar_lea.vmem [#allocation2], %s4879_s24 }
  0x38   : > { %5153 = vmatpush3.bf16.xpose.msk.msra.mxu0 %vm5867_vm1, %v5151_v25  ;;  %805 = vperm.xlu0 %5657, %v711_v6   ;;  %v720_v16 = vld [vmem:[%s9363_s4 + $0x88] sm:$0xff]  ;;  %v721_v17 = vld [vmem:[%s9363_s4 + $0x90] sm:$0xff]  ;;  %v722_v18 = vld [vmem:[%s9363_s4 + $0x98] sm:$0xff] }
  0x39   : > { %5156 = vmatprep.subr.msk.bf16.mxu0 %vm5867_vm1, %v5154_v26  ;;  %810 = vperm.xlu1 %5658, %v712_v7   ;;  %v1908_v19 = vld [vmem:[%s9365_s6] sm:$0xff]  ;;  %v1909_v20 = vld [vmem:[%s9365_s6 + $0x8] sm:$0xff]  ;;  %v1910_v21 = vld [vmem:[%s9365_s6 + $0x10] sm:$0xff] }
  0x3a   : > { %v1911_v22 = vld [vmem:[%s9365_s6 + $0x18] sm:$0xff]  ;;  %v1912_v23 = vld [vmem:[%s9365_s6 + $0x20] sm:$0xff]  ;;  %v1913_v24 = vld [vmem:[%s9365_s6 + $0x28] sm:$0xff] }
  0x3b   : > { %v1914_v25 = vld [vmem:[%s9365_s6 + $0x30] sm:$0xff]  ;;  %v1915_v26 = vld [vmem:[%s9365_s6 + $0x38] sm:$0xff]  ;;  %v723_v27 = vld [vmem:[%s9363_s4 + $0xa0] sm:$0xff] }
  0x3c   : > { %v724_v28 = vld [vmem:[%s9363_s4 + $0xa8] sm:$0xff]  ;;  %v725_v29 = vld [vmem:[%s9363_s4 + $0xb0] sm:$0xff]  ;;  %v726_v30 = vld [vmem:[%s9363_s4 + $0xb8] sm:$0xff] }
  0x3d   : > { %820 = vperm.xlu1 %5658, %v714_v9   ;;  %v729_v33 = vld [vmem:[%s9363_s4 + $0xd0] sm:$0xff]  ;;  %v730_v34 = vld [vmem:[%s9363_s4 + $0xd8] sm:$0xff]  ;;  %v731_v35 = vld [vmem:[%s9363_s4 + $0xe0] sm:$0xff] }
  0x3e   : > { %v732_v36 = vld [vmem:[%s9363_s4 + $0xe8] sm:$0xff]  ;;  %v735_v39 = vld [vmem:[%s9363_s4 + $0x100] sm:$0xff]  ;;  %v737_v41 = vld [vmem:[%s9363_s4 + $0x110] sm:$0xff] }
  0x3f   : > { %v736_v40 = vld [vmem:[%s9363_s4 + $0x108] sm:$0xff]  ;;  %v738_v42 = vld [vmem:[%s9363_s4 + $0x118] sm:$0xff]  ;;  %v741_v45 = vld [vmem:[%s9363_s4 + $0x130] sm:$0xff] }
  0x40   : > { %5159 = vmatpush3.bf16.xpose.msk.msra.mxu0 %vm5867_vm1, %v5157_v31  ;;  %v727_v31 = vld [vmem:[%s9363_s4 + $0xc0] sm:$0xff]  ;;  %v742_v46 = vld [vmem:[%s9363_s4 + $0x138] sm:$0xff]  ;;  %v744_v48 = vld [vmem:[%s9363_s4 + $0x148] sm:$0xff] }
  0x41   : > { %5162 = vmatprep.subr.msk.bf16.mxu0 %vm5867_vm1, %v5160_v32  ;;  %830 = vperm.xlu1 %5658, %v716_v12   ;;  %v728_v32 = vld [vmem:[%s9363_s4 + $0xc8] sm:$0xff]  ;;  %v743_v47 = vld [vmem:[%s9363_s4 + $0x140] sm:$0xff]  ;;  %v749_v53 = vld [vmem:[%s9363_s4 + $0x170] sm:$0xff] }
  0x42   : > { %v747_v51 = vld [vmem:[%s9363_s4 + $0x160] sm:$0xff]  ;;  %v748_v52 = vld [vmem:[%s9363_s4 + $0x168] sm:$0xff]  ;;  %v750_v54 = vld [vmem:[%s9363_s4 + $0x178] sm:$0xff] }
  0x43   : > { %v753_v57 = vld [vmem:[%s9363_s4 + $0x190] sm:$0xff]  ;;  %v754_v58 = vld [vmem:[%s9363_s4 + $0x198] sm:$0xff]  ;;  %v759_v63 = vld [vmem:[%s9363_s4 + $0x1c0] sm:$0xff] }
  0x44   : > { %v760_v2 = vld [vmem:[%s9363_s4 + $0x1c8] sm:$0xff]  ;;  %v761_v3 = vld [vmem:[%s9363_s4 + $0x1d0] sm:$0xff]  ;;  %v425_v4 = vld [vmem:[%s343_s21] sm:$0xff] }
  0x45   : > { %840 = vperm.xlu1 %5658, %v718_v14   ;;  %v426_v6 = vld [vmem:[%s343_s21 + $0x8] sm:$0xff]  ;;  %v762_v9 = vld [vmem:[%s9363_s4 + $0x1d8] sm:$0xff] }
  0x48   : > { %5165 = vmatpush3.bf16.xpose.msk.msra.mxu0 %vm5867_vm1, %v5163_v37  ;;  %v733_v37 = vld [vmem:[%s9363_s4 + $0xf0] sm:$0xff] }
  0x49   : > { %5168 = vmatprep.subr.msk.bf16.mxu0 %vm5867_vm1, %v5166_v38  ;;  %850 = vperm.xlu1 %5658, %v720_v16   ;;  %v734_v38 = vld [vmem:[%s9363_s4 + $0xf8] sm:$0xff] }
  0x4d   : > { %860 = vperm.xlu1 %5658, %v722_v18  }
  0x50   : > { %5171 = vmatpush3.bf16.xpose.msk.msra.mxu0 %vm5867_vm1, %v5169_v43  ;;  %v739_v43 = vld [vmem:[%s9363_s4 + $0x120] sm:$0xff] }
  0x51   : > { %5174 = vmatprep.subr.msk.bf16.mxu0 %vm5867_vm1, %v5172_v44  ;;  %1935 = vperm.xlu1 %5658, %v1909_v20   ;;  %v740_v44 = vld [vmem:[%s9363_s4 + $0x128] sm:$0xff] }
  0x55   : > { %1945 = vperm.xlu1 %5658, %v1911_v22  }
  0x58   : > { %5177 = vmatpush3.bf16.xpose.msk.msra.mxu0 %vm5867_vm1, %v5175_v49  ;;  %v745_v49 = vld [vmem:[%s9363_s4 + $0x150] sm:$0xff] }
  0x59   : > { %5180 = vmatprep.subr.msk.bf16.mxu0 %vm5867_vm1, %v5178_v50  ;;  %1955 = vperm.xlu1 %5658, %v1913_v24   ;;  %v746_v50 = vld [vmem:[%s9363_s4 + $0x158] sm:$0xff] }
  0x5d   : > { %1965 = vperm.xlu1 %5658, %v1915_v26  }
  0x60   : > { %5183 = vmatpush3.bf16.xpose.msk.msra.mxu0 %vm5867_vm1, %v5181_v55  ;;  %v751_v55 = vld [vmem:[%s9363_s4 + $0x180] sm:$0xff] }
  0x61   : > { %5186 = vmatprep.subr.msk.bf16.mxu0 %vm5867_vm1, %v5184_v56  ;;  %870 = vperm.xlu1 %5658, %v724_v28   ;;  %v752_v56 = vld [vmem:[%s9363_s4 + $0x188] sm:$0xff] }
  0x65   : > { %880 = vperm.xlu1 %5658, %v726_v30  }
  0x68   : > { %5189 = vmatpush3.bf16.xpose.msk.msra.mxu0 %vm5867_vm1, %v5187_v59  ;;  %v755_v59 = vld [vmem:[%s9363_s4 + $0x1a0] sm:$0xff] }
  0x69   : > { %890 = vperm.xlu1 %5658, %v728_v32  }
  0x6d   : > { %900 = vperm.xlu1 %5658, %v730_v34  }
  0x6f   : > { %5135 = vmatmul.mubr.msk.f32.vlgmr.msra.gmra.mrb[0].mxu0 %vm433_vm0, %v5853_v8  ;;  %v713_v8 = vld [vmem:[%s9363_s4 + $0x50] sm:$0xff] }
  0x70   : > { %5136 = vmatprep.mubr.msk.f32.mxu0 %vm433_vm0, %v390_v60  ;;  %815 = vperm.xlu0 %5657, %v713_v8   ;;  %v429_v8 = vld [vmem:[%s343_s21 + $0x20] sm:$0xff] }
  0x71   : > { %910 = vperm.xlu1 %5658, %v732_v36  }
  0x73   : > { %5137 = vmatmul.mubr.msk.f32.gmra.mrb[2].mxu0 %vm433_vm0, %v390_v60  ;;  %v756_v60 = vld [vmem:[%s9363_s4 + $0x1a8] sm:$0xff] }
  0x74   : > { %5138 = vmatprep.mubr.msk.f32.mxu0 %vm433_vm0, %v391_v61  ;;  %825 = vperm.xlu0 %5657, %v715_v10   ;;  %v4770_v10 = vld [vmem:[%s9367_s8] sm:$0xff] }
  0x75   : > { %920 = vperm.xlu1 %5658, %v734_v38  }
  0x77   : > { %5139 = vmatmul.mubr.msk.f32.gmra.mrb[4].mxu0 %vm433_vm0, %v391_v61  ;;  %v757_v61 = vld [vmem:[%s9363_s4 + $0x1b0] sm:$0xff] }
  0x78   : > { %5140 = vmatprep.mubr.msk.f32.mxu0 %vm433_vm0, %v392_v62  ;;  %835 = vperm.xlu0 %5657, %v717_v13   ;;  %v430_v13 = vld [vmem:[%s343_s21 + $0x28] sm:$0xff] }
  0x79   : > { %930 = vperm.xlu1 %5658, %v736_v40  }
  0x7b   : > { %5141 = vmatmul.mubr.msk.f32.gmra.mrb[6].mxu0 %vm433_vm0, %v392_v62  ;;  %v758_v62 = vld [vmem:[%s9363_s4 + $0x1b8] sm:$0xff] }
  0x7c   : > { %2057 = vmatprep.mubr.f32.mxu0 %v9380_v11  ;;  %845 = vperm.xlu0 %5657, %v719_v15   ;;  %v427_v15 = vld [vmem:[%s343_s21 + $0x10] sm:$0xff] }
  0x7d   : > { %940 = vperm.xlu1 %5658, %v738_v42  }
  0x80   : > { %855 = vperm.xlu0 %5657, %v721_v17   ;;  %v428_v17 = vld [vmem:[%s343_s21 + $0x18] sm:$0xff] }
  0x81   : > { %950 = vperm.xlu1 %5658, %v740_v44   ;;  %v644_v44 = vld [vmem:[%s9362_s3 + $0x8] sm:$0xff] }
  0x84   : > { %1930 = vperm.xlu0 %5657, %v1908_v19  }
  0x85   : > { %960 = vperm.xlu1 %5658, %v742_v46   ;;  %v646_v46 = vld [vmem:[%s9362_s3 + $0x18] sm:$0xff] }
  0x88   : > { %1940 = vperm.xlu0 %5657, %v1910_v21   ;;  %v431_v21 = vld [vmem:[%s343_s21 + $0x30] sm:$0xff] }
  0x89   : > { %970 = vperm.xlu1 %5658, %v744_v48   ;;  %v648_v48 = vld [vmem:[%s9362_s3 + $0x28] sm:$0xff] }
  0x8c   : > { %1950 = vperm.xlu0 %5657, %v1912_v23  }
  0x8d   : > { %980 = vperm.xlu1 %5658, %v746_v50   ;;  %v650_v50 = vld [vmem:[%s9362_s3 + $0x38] sm:$0xff] }
  0x90   : > { %1960 = vperm.xlu0 %5657, %v1914_v25   ;;  %v432_v25 = vld [vmem:[%s343_s21 + $0x38] sm:$0xff]  ;;  %s5101_s21 = sshll.u32 %s5813_s13, 8  ;;  %s4781_s13 = scalar_lea.sflag [#allocation4], %s6141_s23 }
  0x91   : > { %990 = vperm.xlu1 %5658, %v748_v52   ;;  %v652_v52 = vld [vmem:[%s9362_s3 + $0x48] sm:$0xff]  ;;  %s9315_s24 = scalar_lea.hbm %s9368_s9, %s5101_s21 }
  0x94   : > { %865 = vperm.xlu0 %5657, %v723_v27  }
  0x95   : > { %1000 = vperm.xlu1 %5658, %v750_v54   ;;  %v654_v54 = vld [vmem:[%s9362_s3 + $0x58] sm:$0xff] }
  0x98   : > { %875 = vperm.xlu0 %5657, %v725_v29  }
  0x99   : > { %1010 = vperm.xlu1 %5658, %v752_v56   ;;  %v656_v56 = vld [vmem:[%s9362_s3 + $0x68] sm:$0xff] }
  0x9c   : > { %885 = vperm.xlu0 %5657, %v727_v31  }
  0x9d   : > { %1020 = vperm.xlu1 %5658, %v754_v58   ;;  %v658_v58 = vld [vmem:[%s9362_s3 + $0x78] sm:$0xff] }
  0xa0   : > { %895 = vperm.xlu0 %5657, %v729_v33  }
  0xa1   : > { %1030 = vperm.xlu1 %5658, %v756_v60   ;;  %v660_v60 = vld [vmem:[%s9362_s3 + $0x88] sm:$0xff] }
  0xa4   : > { %905 = vperm.xlu0 %5657, %v731_v35  }
  0xa5   : > { %1040 = vperm.xlu1 %5658, %v758_v62   ;;  %v662_v62 = vld [vmem:[%s9362_s3 + $0x98] sm:$0xff] }
  0xa8   : > { %915 = vperm.xlu0 %5657, %v733_v37  }
  0xa9   : > { %1050 = vperm.xlu1 %5658, %v760_v2   ;;  %v666_v2 = vld [vmem:[%s9362_s3 + $0xb8] sm:$0xff] }
  0xac   : > { %925 = vperm.xlu0 %5657, %v735_v39  }
  0xad   : > { %1060 = vperm.xlu1 %5658, %v762_v9   ;;  %v673_v9 = vld [vmem:[%s9362_s3 + $0xf0] sm:$0xff] }
  0xb0   : > { %935 = vperm.xlu0 %5657, %v737_v41  }
  0xb4   : > { %945 = vperm.xlu0 %5657, %v739_v43   ;;  %v643_v43 = vld [vmem:[%s9362_s3] sm:$0xff] }
  0xb8   : > { %955 = vperm.xlu0 %5657, %v741_v45   ;;  %v645_v45 = vld [vmem:[%s9362_s3 + $0x10] sm:$0xff] }
  0xbc   : > { %965 = vperm.xlu0 %5657, %v743_v47   ;;  %v647_v47 = vld [vmem:[%s9362_s3 + $0x20] sm:$0xff] }
  0xc0   : > { %975 = vperm.xlu0 %5657, %v745_v49   ;;  %v649_v49 = vld [vmem:[%s9362_s3 + $0x30] sm:$0xff] }
  0xc4   : > { %985 = vperm.xlu0 %5657, %v747_v51   ;;  %v651_v51 = vld [vmem:[%s9362_s3 + $0x40] sm:$0xff] }
  0xc8   : > { %995 = vperm.xlu0 %5657, %v749_v53   ;;  %v653_v53 = vld [vmem:[%s9362_s3 + $0x50] sm:$0xff] }
  0xcc   : > { %1005 = vperm.xlu0 %5657, %v751_v55   ;;  %v655_v55 = vld [vmem:[%s9362_s3 + $0x60] sm:$0xff] }
  0xd0   : > { %1015 = vperm.xlu0 %5657, %v753_v57   ;;  %v657_v57 = vld [vmem:[%s9362_s3 + $0x70] sm:$0xff] }
  0xd4   : > { %1025 = vperm.xlu0 %5657, %v755_v59   ;;  %v659_v59 = vld [vmem:[%s9362_s3 + $0x80] sm:$0xff] }
  0xd8   : > { %1035 = vperm.xlu0 %5657, %v757_v61   ;;  %v661_v61 = vld [vmem:[%s9362_s3 + $0x90] sm:$0xff] }
  0xdc   : > { %1045 = vperm.xlu0 %5657, %v759_v63   ;;  %v663_v63 = vld [vmem:[%s9362_s3 + $0xa0] sm:$0xff] }
  0xe0   : > { %1055 = vperm.xlu0 %5657, %v761_v3   ;;  %v667_v3 = vld [vmem:[%s9362_s3 + $0xc0] sm:$0xff] }
  0xe4   : > { %4773 = vperm.xlu0 %5657, %v4770_v10   ;;  %v674_v10 = vld [vmem:[%s9362_s3 + $0xf8] sm:$0xff] }
 0x142   : > { %v608_v0 = vpop.f32.mrb[0].mxu0 }
 0x143   : > { %v610_v1 = vpop.f32.mrb[1].mxu0  ;;  %v609_v12 = vadd.f32 %v608_v0, %v425_v4  ;;  %v664_v0 = vld [vmem:[%s9362_s3 + $0xa8] sm:$0xff] }
 0x144   : > { %v611_v14 = vadd.f32 %v610_v1, %v426_v6  ;;  %v665_v1 = vld [vmem:[%s9362_s3 + $0xb0] sm:$0xff]  ;;  %v668_v4 = vld [vmem:[%s9362_s3 + $0xc8] sm:$0xff]  ;;  %v670_v6 = vld [vmem:[%s9362_s3 + $0xd8] sm:$0xff] }
 0x145   : > { %v631_v22 = vmul.f32 %v609_v12, %v609_v12  ;;  %v675_v12 = vld [vmem:[%s9362_s3 + $0x100] sm:$0xff] }
 0x146   : > { %v614_v5 = vpop.f32.mrb[2].mxu0  ;;  %v632_v26 = vmul.f32 %v611_v14, %v611_v14  ;;  %v677_v14 = vld [vmem:[%s9362_s3 + $0x110] sm:$0xff] }
 0x147   : > { %v616_v7 = vpop.f32.mrb[3].mxu0  ;;  %v615_v23 = vadd.f32 %v614_v5, %v427_v15  ;;  %v669_v5 = vld [vmem:[%s9362_s3 + $0xd0] sm:$0xff]  ;;  %v678_v15 = vld [vmem:[%s9362_s3 + $0x118] sm:$0xff] }
 0x148   : > { %v617_v27 = vadd.f32 %v616_v7, %v428_v17  ;;  %v671_v7 = vld [vmem:[%s9362_s3 + $0xe0] sm:$0xff]  ;;  %v680_v17 = vld [vmem:[%s9362_s3 + $0x128] sm:$0xff] }
 0x149   : > { %v633_v35 = vmul.f32 %v615_v23, %v615_v23  ;;  %v686_v23 = vld [vmem:[%s9362_s3 + $0x158] sm:$0xff] }
 0x14a   : > { %v620_v16 = vpop.f32.mrb[4].mxu0  ;;  %v634_v37 = vmul.f32 %v617_v27, %v617_v27  ;;  %v690_v27 = vld [vmem:[%s9362_s3 + $0x178] sm:$0xff] }
 0x14b   : > { %v621_v18 = vadd.f32 %v620_v16, %v429_v8  ;;  %v622_v19 = vpop.f32.mrb[5].mxu0  ;;  %v672_v8 = vld [vmem:[%s9362_s3 + $0xe8] sm:$0xff]  ;;  %v679_v16 = vld [vmem:[%s9362_s3 + $0x120] sm:$0xff] }
 0x14c   : > { %v623_v20 = vadd.f32 %v622_v19, %v430_v13  ;;  %v676_v13 = vld [vmem:[%s9362_s3 + $0x108] sm:$0xff]  ;;  %v682_v19 = vld [vmem:[%s9362_s3 + $0x138] sm:$0xff] }
 0x14d   : > { %v635_v24 = vmul.f32 %v621_v18, %v621_v18  ;;  %v681_v18 = vld [vmem:[%s9362_s3 + $0x130] sm:$0xff] }
 0x14e   : > { %v636_v28 = vmul.f32 %v623_v20, %v623_v20  ;;  %v626_v29 = vpop.f32.mrb[6].mxu0  ;;  %v683_v20 = vld [vmem:[%s9362_s3 + $0x140] sm:$0xff] }
 0x14f   : > { %v639_v30 = vadd.f32 %v635_v24, %v631_v22  ;;  %v627_v31 = vadd.f32 %v626_v29, %v431_v21  ;;  %v628_v32 = vpop.f32.mrb[7].mxu0  ;;  %v684_v21 = vld [vmem:[%s9362_s3 + $0x148] sm:$0xff]  ;;  %v685_v22 = vld [vmem:[%s9362_s3 + $0x150] sm:$0xff]  ;;  %v687_v24 = vld [vmem:[%s9362_s3 + $0x160] sm:$0xff] }
 0x150   : > { %v629_v33 = vadd.f32 %v628_v32, %v432_v25  ;;  %v640_v34 = vadd.f32 %v636_v28, %v632_v26  ;;  %v688_v25 = vld [vmem:[%s9362_s3 + $0x168] sm:$0xff]  ;;  %v689_v26 = vld [vmem:[%s9362_s3 + $0x170] sm:$0xff]  ;;  %v691_v28 = vld [vmem:[%s9362_s3 + $0x180] sm:$0xff] }
 0x151   : > { %v637_v36 = vmul.f32 %v627_v31, %v627_v31  ;;  %v692_v29 = vld [vmem:[%s9362_s3 + $0x188] sm:$0xff]  ;;  %v694_v31 = vld [vmem:[%s9362_s3 + $0x198] sm:$0xff]  ;;  %v695_v32 = vld [vmem:[%s9362_s3 + $0x1a0] sm:$0xff] }
 0x152   : > { %v638_v38 = vmul.f32 %v629_v33, %v629_v33  ;;  %v766_v33 = vpop.permute.xlu0 %765 }
 0x153   : > { %v641_v39 = vadd.f32 %v637_v36, %v633_v35  ;;  %v786_v35 = vpop.permute.xlu1 %785 }
 0x154   : > { %v642_v40 = vadd.f32 %v638_v38, %v634_v37 }
 0x155   : > { %v5192_v41 = vpack.c.bf16 %v641_v39, %v639_v30  ;;  %v693_v30 = vld [vmem:[%s9362_s3 + $0x190] sm:$0xff] }
 0x156   : > { %v5190_v42 = vpack.c.bf16 %v642_v40, %v640_v34  ;;  %v696_v34 = vld [vmem:[%s9362_s3 + $0x1a8] sm:$0xff]  ;;  %v771_v38 = vpop.permute.xlu0 %770  ;;  %v697_v39 = vld [vmem:[%s9362_s3 + $0x1b0] sm:$0xff] }
 0x158   : > { %5191 = vmatprep.subr.bf16.mxu1 %v5190_v42  ;;  %v791_v42 = vpop.permute.xlu1 %790 }
 0x159   : > { %5193 = vmatpush1.bf16.msra.mxu1 %v5192_v41 }
 0x15c   : > { %4919 = vmatmul.mubr.msk.f32.vlgmr.msra.gmra.mrb[0].mxu1 %vm433_vm0, %v643_v43  ;;  %v698_v43 = vld [vmem:[%s9362_s3 + $0x1b8] sm:$0xff] }
 0x15d   : > { %1313 = vmatprep.mubr.f32.mxu1 %v9380_v11 }
 0x160   : > { %4920 = vmatmul.mubr.msk.f32.gmra.mrb[2].mxu1 %vm433_vm0, %v644_v44  ;;  %v776_v44 = vpop.permute.xlu0 %775 }
 0x161   : > { %1319 = vmatprep.mubr.f32.mxu1 %v9380_v11 }
 0x164   : > { %4921 = vmatmul.mubr.msk.f32.gmra.mrb[4].mxu1 %vm433_vm0, %v645_v45 }
 0x165   : > { %1325 = vmatprep.mubr.f32.mxu1 %v9380_v11 }
 0x168   : > { %4922 = vmatmul.mubr.msk.f32.gmra.mrb[6].mxu1 %vm433_vm0, %v646_v46 }
 0x169   : > { %1331 = vmatprep.mubr.f32.mxu1 %v9380_v11 }
 0x16c   : > { %4923 = vmatmul.mubr.msk.f32.gmra.mrb[8].mxu1 %vm433_vm0, %v647_v47  ;;  %v699_v47 = vld [vmem:[%s9362_s3 + $0x1c0] sm:$0xff] }
 0x16d   : > { %1337 = vmatprep.mubr.f32.mxu1 %v9380_v11 }
 0x170   : > { %4924 = vmatmul.mubr.msk.f32.gmra.mrb[10].mxu1 %vm433_vm0, %v648_v48  ;;  %v781_v48 = vpop.permute.xlu1 %780 }
 0x171   : > { %1343 = vmatprep.mubr.f32.mxu1 %v9380_v11 }
 0x174   : > { %4925 = vmatmul.mubr.msk.f32.gmra.mrb[12].mxu1 %vm433_vm0, %v649_v49 }
 0x175   : > { %1349 = vmatprep.mubr.f32.mxu1 %v9380_v11 }
 0x178   : > { %4926 = vmatmul.mubr.msk.f32.gmra.mrb[14].mxu1 %vm433_vm0, %v650_v50 }
 0x179   : > { %1355 = vmatprep.mubr.f32.mxu1 %v9380_v11 }
 0x17c   : > { %4927 = vmatmul.mubr.msk.f32.gmra.mrb[16].mxu1 %vm433_vm0, %v651_v51  ;;  %v796_v51 = vpop.permute.xlu0 %795 }
 0x17d   : > { %1361 = vmatprep.mubr.f32.mxu1 %v9380_v11 }
 0x180   : > { %4928 = vmatmul.mubr.msk.f32.gmra.mrb[18].mxu1 %vm433_vm0, %v652_v52  ;;  %v700_v52 = vld [vmem:[%s9362_s3 + $0x1c8] sm:$0xff] }
 0x181   : > { %1367 = vmatprep.mubr.f32.mxu1 %v9380_v11 }
 0x184   : > { %4929 = vmatmul.mubr.msk.f32.gmra.mrb[20].mxu1 %vm433_vm0, %v653_v53 }
 0x185   : > { %1373 = vmatprep.mubr.f32.mxu1 %v9380_v11 }
 0x188   : > { %4930 = vmatmul.mubr.msk.f32.gmra.mrb[22].mxu1 %vm433_vm0, %v654_v54 }
 0x189   : > { %1379 = vmatprep.mubr.f32.mxu1 %v9380_v11 }
 0x18c   : > { %4931 = vmatmul.mubr.msk.f32.gmra.mrb[24].mxu1 %vm433_vm0, %v655_v55 }
 0x18d   : > { %1385 = vmatprep.mubr.f32.mxu1 %v9380_v11 }
 0x190   : > { %4932 = vmatmul.mubr.msk.f32.gmra.mrb[26].mxu1 %vm433_vm0, %v656_v56 }
 0x191   : > { %1391 = vmatprep.mubr.f32.mxu1 %v9380_v11 }
 0x194   : > { %4933 = vmatmul.mubr.msk.f32.gmra.mrb[28].mxu1 %vm433_vm0, %v657_v57 }
 0x195   : > { %1397 = vmatprep.mubr.f32.mxu1 %v9380_v11 }
 0x198   : > { %4934 = vmatmul.mubr.msk.f32.gmra.mrb[30].mxu1 %vm433_vm0, %v658_v58  ;;  %v801_v58 = vpop.permute.xlu1 %800 }
 0x199   : > { %1403 = vmatprep.mubr.f32.mxu1 %v9380_v11 }
 0x19c   : > { %4935 = vmatmul.mubr.msk.f32.gmra.mrb[32].mxu1 %vm433_vm0, %v659_v59 }
 0x19d   : > { %1409 = vmatprep.mubr.f32.mxu1 %v9380_v11 }
 0x1a0   : > { %4936 = vmatmul.mubr.msk.f32.gmra.mrb[34].mxu1 %vm433_vm0, %v660_v60  ;;  %v701_v60 = vld [vmem:[%s9362_s3 + $0x1d0] sm:$0xff] }
 0x1a1   : > { %1415 = vmatprep.mubr.f32.mxu1 %v9380_v11 }
 0x1a4   : > { %4937 = vmatmul.mubr.msk.f32.gmra.mrb[36].mxu1 %vm433_vm0, %v661_v61 }
 0x1a5   : > { %1421 = vmatprep.mubr.f32.mxu1 %v9380_v11 }
 0x1a8   : > { %4938 = vmatmul.mubr.msk.f32.gmra.mrb[38].mxu1 %vm433_vm0, %v662_v62 }
 0x1a9   : > { %1427 = vmatprep.mubr.f32.mxu1 %v9380_v11 }
 0x1ac   : > { %4939 = vmatmul.mubr.msk.f32.gmra.mrb[40].mxu1 %vm433_vm0, %v663_v63 }
 0x1ad   : > { %1433 = vmatprep.mubr.f32.mxu1 %v9380_v11 }
 0x1b0   : > { %4940 = vmatmul.mubr.msk.f32.gmra.mrb[42].mxu1 %vm433_vm0, %v664_v0  ;;  %v806_v0 = vpop.permute.xlu0 %805 }
 0x1b1   : > { %1439 = vmatprep.mubr.f32.mxu1 %v9380_v11 }
 0x1b4   : > { %4941 = vmatmul.mubr.msk.f32.gmra.mrb[44].mxu1 %vm433_vm0, %v665_v1 }
 0x1b5   : > { %1445 = vmatprep.mubr.f32.mxu1 %v9380_v11 }
 0x1b8   : > { %4942 = vmatmul.mubr.msk.f32.gmra.mrb[46].mxu1 %vm433_vm0, %v666_v2 }
 0x1b9   : > { %1451 = vmatprep.mubr.f32.mxu1 %v9380_v11 }
 0x1bc   : > { %4943 = vmatmul.mubr.msk.f32.gmra.mrb[48].mxu1 %vm433_vm0, %v667_v3 }
 0x1bd   : > { %1457 = vmatprep.mubr.f32.mxu1 %v9380_v11 }
 0x1c0   : > { %4944 = vmatmul.mubr.msk.f32.gmra.mrb[50].mxu1 %vm433_vm0, %v668_v4 }
 0x1c1   : > { %1463 = vmatprep.mubr.f32.mxu1 %v9380_v11 }
 0x1c4   : > { %4945 = vmatmul.mubr.msk.f32.gmra.mrb[52].mxu1 %vm433_vm0, %v669_v5 }
 0x1c5   : > { %1469 = vmatprep.mubr.f32.mxu1 %v9380_v11 }
 0x1c8   : > { %4946 = vmatmul.mubr.msk.f32.gmra.mrb[54].mxu1 %vm433_vm0, %v670_v6 }
 0x1c9   : > { %1475 = vmatprep.mubr.f32.mxu1 %v9380_v11 }
 0x1cc   : > { %4947 = vmatmul.mubr.msk.f32.gmra.mrb[56].mxu1 %vm433_vm0, %v671_v7 }
 0x1cd   : > { %1481 = vmatprep.mubr.f32.mxu1 %v9380_v11 }
 0x1d0   : > { %4948 = vmatmul.mubr.msk.f32.gmra.mrb[58].mxu1 %vm433_vm0, %v672_v8 }
 0x1d1   : > { %1487 = vmatprep.mubr.f32.mxu1 %v9380_v11 }
 0x1d4   : > { %4949 = vmatmul.mubr.msk.f32.gmra.mrb[60].mxu1 %vm433_vm0, %v673_v9 }
 0x1d5   : > { %1493 = vmatprep.mubr.f32.mxu1 %v9380_v11 }
 0x1d8   : > { %4950 = vmatmul.mubr.msk.f32.gmra.mrb[62].mxu1 %vm433_vm0, %v674_v10  ;;  %v702_v10 = vld [vmem:[%s9362_s3 + $0x1d8] sm:$0xff] }
 0x1d9   : > { %1499 = vmatprep.mubr.f32.mxu1 %v9380_v11 }
 0x1dc   : > { %4951 = vmatmul.mubr.msk.f32.gmra.mrb[64].mxu1 %vm433_vm0, %v675_v12 }
 0x1dd   : > { %1505 = vmatprep.mubr.f32.mxu1 %v9380_v11 }
 0x1e0   : > { %4952 = vmatmul.mubr.msk.f32.gmra.mrb[66].mxu1 %vm433_vm0, %v676_v13 }
 0x1e1   : > { %1511 = vmatprep.mubr.f32.mxu1 %v9380_v11 }
 0x1e4   : > { %4953 = vmatmul.mubr.msk.f32.gmra.mrb[68].mxu1 %vm433_vm0, %v677_v14 }
 0x1e5   : > { %1517 = vmatprep.mubr.f32.mxu1 %v9380_v11 }
 0x1e8   : > { %4954 = vmatmul.mubr.msk.f32.gmra.mrb[70].mxu1 %vm433_vm0, %v678_v15  ;;  %v811_v15 = vpop.permute.xlu1 %810 }
 0x1e9   : > { %1523 = vmatprep.mubr.f32.mxu1 %v9380_v11 }
 0x1ec   : > { %4955 = vmatmul.mubr.msk.f32.gmra.mrb[72].mxu1 %vm433_vm0, %v679_v16 }
 0x1ed   : > { %1529 = vmatprep.mubr.f32.mxu1 %v9380_v11 }
 0x1f0   : > { %4956 = vmatmul.mubr.msk.f32.gmra.mrb[74].mxu1 %vm433_vm0, %v680_v17 }
 0x1f1   : > { %1535 = vmatprep.mubr.f32.mxu1 %v9380_v11 }
 0x1f4   : > { %4957 = vmatmul.mubr.msk.f32.gmra.mrb[76].mxu1 %vm433_vm0, %v681_v18 }
 0x1f5   : > { %1541 = vmatprep.mubr.f32.mxu1 %v9380_v11 }
 0x1f8   : > { %4958 = vmatmul.mubr.msk.f32.gmra.mrb[78].mxu1 %vm433_vm0, %v682_v19 }
 0x1f9   : > { %1547 = vmatprep.mubr.f32.mxu1 %v9380_v11 }
 0x1fc   : > { %4959 = vmatmul.mubr.msk.f32.gmra.mrb[80].mxu1 %vm433_vm0, %v683_v20 }
 0x1fd   : > { %1553 = vmatprep.mubr.f32.mxu1 %v9380_v11 }
 0x200   : > { %4960 = vmatmul.mubr.msk.f32.gmra.mrb[82].mxu1 %vm433_vm0, %v684_v21 }
 0x201   : > { %1559 = vmatprep.mubr.f32.mxu1 %v9380_v11 }
 0x204   : > { %4961 = vmatmul.mubr.msk.f32.gmra.mrb[84].mxu1 %vm433_vm0, %v685_v22 }
 0x205   : > { %1565 = vmatprep.mubr.f32.mxu1 %v9380_v11 }
 0x208   : > { %4962 = vmatmul.mubr.msk.f32.gmra.mrb[86].mxu1 %vm433_vm0, %v686_v23  ;;  %v816_v23 = vpop.permute.xlu0 %815 }
 0x209   : > { %1571 = vmatprep.mubr.f32.mxu1 %v9380_v11 }
 0x20c   : > { %4963 = vmatmul.mubr.msk.f32.gmra.mrb[88].mxu1 %vm433_vm0, %v687_v24 }
 0x20d   : > { %1577 = vmatprep.mubr.f32.mxu1 %v9380_v11 }
 0x210   : > { %4964 = vmatmul.mubr.msk.f32.gmra.mrb[90].mxu1 %vm433_vm0, %v688_v25 }
 0x211   : > { %1583 = vmatprep.mubr.f32.mxu1 %v9380_v11 }
 0x214   : > { %4965 = vmatmul.mubr.msk.f32.gmra.mrb[92].mxu1 %vm433_vm0, %v689_v26 }
 0x215   : > { %1589 = vmatprep.mubr.f32.mxu1 %v9380_v11 }
 0x218   : > { %4966 = vmatmul.mubr.msk.f32.gmra.mrb[94].mxu1 %vm433_vm0, %v690_v27 }
 0x219   : > { %1595 = vmatprep.mubr.f32.mxu1 %v9380_v11 }
 0x21c   : > { %4967 = vmatmul.mubr.msk.f32.gmra.mrb[96].mxu1 %vm433_vm0, %v691_v28 }
 0x21d   : > { %1601 = vmatprep.mubr.f32.mxu1 %v9380_v11 }
 0x220   : > { %4968 = vmatmul.mubr.msk.f32.gmra.mrb[98].mxu1 %vm433_vm0, %v692_v29 }
 0x221   : > { %1607 = vmatprep.mubr.f32.mxu1 %v9380_v11 }
 0x224   : > { %4969 = vmatmul.mubr.msk.f32.gmra.mrb[100].mxu1 %vm433_vm0, %v693_v30 }
 0x225   : > { %1613 = vmatprep.mubr.f32.mxu1 %v9380_v11 }
 0x228   : > { %4970 = vmatmul.mubr.msk.f32.gmra.mrb[102].mxu1 %vm433_vm0, %v694_v31 }
 0x229   : > { %1619 = vmatprep.mubr.f32.mxu1 %v9380_v11 }
 0x22c   : > { %4971 = vmatmul.mubr.msk.f32.gmra.mrb[104].mxu1 %vm433_vm0, %v695_v32 }
 0x22d   : > { %1625 = vmatprep.mubr.f32.mxu1 %v9380_v11 }
 0x22f   : > { %v1309_v36 = vpop.f32.mrb[0].mxu1 }
 0x230   : > { %v1311_v37 = vpop.f32.mrb[1].mxu1  ;;  %4972 = vmatmul.mubr.msk.f32.gmra.mrb[106].mxu1 %vm433_vm0, %v696_v34  ;;  %v1310_v53 = vadd.f32 %v1309_v36, %v766_v33 }
 0x231   : > { %1631 = vmatprep.mubr.f32.mxu1 %v9380_v11  ;;  %v1312_v54 = vadd.f32 %v1311_v37, %v766_v33 }
 0x232   : > { %v1668_v61 = vmax.f32 %v1310_v53, 0.0 }
 0x233   : > { %v1315_v40 = vpop.f32.mrb[2].mxu1  ;;  %v1669_v1 = vmax.f32 %v1312_v54, 0.0 }
 0x234   : > { %v1317_v41 = vpop.f32.mrb[3].mxu1  ;;  %4973 = vmatmul.mubr.msk.f32.gmra.mrb[108].mxu1 %vm433_vm0, %v697_v39  ;;  %v1316_v62 = vadd.f32 %v1315_v40, %v771_v38 }
 0x235   : > { %1637 = vmatprep.mubr.f32.mxu1 %v9380_v11  ;;  %v1318_v2 = vadd.f32 %v1317_v41, %v771_v38  ;;  %v821_v38 = vpop.permute.xlu1 %820 }
 0x236   : > { %v1670_v12 = vmax.f32 %v1316_v62, 0.0 }
 0x237   : > { %v1321_v45 = vpop.f32.mrb[4].mxu1  ;;  %v1671_v16 = vmax.f32 %v1318_v2, 0.0 }
 0x238   : > { %v1323_v46 = vpop.f32.mrb[5].mxu1  ;;  %4974 = vmatmul.mubr.msk.f32.gmra.mrb[110].mxu1 %vm433_vm0, %v698_v43  ;;  %v1322_v13 = vadd.f32 %v1321_v45, %v776_v44  ;;  %v826_v43 = vpop.permute.xlu0 %825 }
 0x239   : > { %1643 = vmatprep.mubr.f32.mxu1 %v9380_v11  ;;  %v1324_v17 = vadd.f32 %v1323_v46, %v776_v44  ;;  %v831_v54 = vpop.permute.xlu1 %830 }
 0x23a   : > { %v1672_v26 = vmax.f32 %v1322_v13, 0.0 }
 0x23b   : > { %v1327_v49 = vpop.f32.mrb[6].mxu1  ;;  %v1673_v30 = vmax.f32 %v1324_v17, 0.0 }
 0x23c   : > { %v1329_v50 = vpop.f32.mrb[7].mxu1  ;;  %4975 = vmatmul.mubr.msk.f32.gmra.mrb[112].mxu1 %vm433_vm0, %v699_v47  ;;  %v1328_v27 = vadd.f32 %v1327_v49, %v781_v48 }
 0x23d   : > { %1649 = vmatprep.mubr.f32.mxu1 %v9380_v11  ;;  %v1330_v31 = vadd.f32 %v1329_v50, %v781_v48 }
 0x23e   : > { %v1674_v41 = vmax.f32 %v1328_v27, 0.0 }
 0x23f   : > { %v1333_v55 = vpop.f32.mrb[8].mxu1  ;;  %v1675_v44 = vmax.f32 %v1330_v31, 0.0 }
 0x240   : > { %v6450_v56 = vadd.f32 %v1333_v55, %v786_v35  ;;  %v1335_v57 = vpop.f32.mrb[9].mxu1  ;;  %4976 = vmatmul.mubr.msk.f32.gmra.mrb[114].mxu1 %vm433_vm0, %v700_v52 }
 0x241   : > { %v6453_v59 = vadd.f32 %v1335_v57, %v786_v35  ;;  %1655 = vmatprep.mubr.f32.mxu1 %v9380_v11 }
 0x242   : > { %v1676_v63 = vmax.f32 %v6450_v56, 0.0 }
 0x243   : > { %v1677_v3 = vmax.f32 %v6453_v59, 0.0  ;;  %v1339_v4 = vpop.f32.mrb[10].mxu1 }
 0x244   : > { %v1788_v5 = vmax.f32 %v1668_v61, %v1676_v63  ;;  %v6463_v6 = vadd.f32 %v1339_v4, %v791_v42  ;;  %v1341_v7 = vpop.f32.mrb[11].mxu1  ;;  %4977 = vmatmul.mubr.msk.f32.gmra.mrb[116].mxu1 %vm433_vm0, %v701_v60 }
 0x245   : > { %v1789_v8 = vmax.f32 %v1669_v1, %v1677_v3  ;;  %v6468_v9 = vadd.f32 %v1341_v7, %v791_v42  ;;  %1661 = vmatprep.mubr.f32.mxu1 %v9380_v11  ;;  %v836_v1 = vpop.permute.xlu0 %835 }
 0x246   : > { %v1678_v14 = vmax.f32 %v6463_v6, 0.0 }
 0x247   : > { %v1679_v18 = vmax.f32 %v6468_v9, 0.0  ;;  %v1345_v19 = vpop.f32.mrb[12].mxu1 }
 0x248   : > { %v1790_v20 = vmax.f32 %v1670_v12, %v1678_v14  ;;  %v6476_v21 = vadd.f32 %v1345_v19, %v796_v51  ;;  %v1347_v22 = vpop.f32.mrb[13].mxu1  ;;  %4978 = vmatmul.mubr.msk.f32.gmra.mrb[118].mxu1 %vm433_vm0, %v702_v10  ;;  %v6490_v10 = vpop.permute.xlu1 %840 }
 0x249   : > { %v1791_v24 = vmax.f32 %v1671_v16, %v1679_v18  ;;  %v6479_v25 = vadd.f32 %v1347_v22, %v796_v51  ;;  %2845 = vmatprep.mubr.f32.mxu1 %v9380_v11  ;;  %v6495_v59 = vpop.permute.xlu0 %845 }
 0x24a   : > { %v5196_v28 = vpack.c.bf16 %v1790_v20, %v1788_v5  ;;  %v1680_v29 = vmax.f32 %v6476_v21, 0.0 }
 0x24b   : > { %v1681_v32 = vmax.f32 %v6479_v25, 0.0  ;;  %v1351_v33 = vpop.f32.mrb[14].mxu1  ;;  %v5194_v34 = vpack.c.bf16 %v1791_v24, %v1789_v8 }
 0x24c   : > { %v1792_v35 = vmax.f32 %v1672_v26, %v1680_v29  ;;  %v1352_v36 = vadd.f32 %v1351_v33, %v801_v58  ;;  %v1353_v37 = vpop.f32.mrb[15].mxu1  ;;  %v6503_v22 = vpop.permute.xlu1 %850 }
 0x24d   : > { %v1793_v39 = vmax.f32 %v1673_v30, %v1681_v32  ;;  %v1354_v40 = vadd.f32 %v1353_v37, %v801_v58  ;;  %5195 = vmatprep.subr.bf16.mxu0 %v5194_v34 }
 0x24e   : > { %v1682_v42 = vmax.f32 %v1352_v36, 0.0  ;;  %5197 = vmatpush1.bf16.msra.mxu0 %v5196_v28  ;;  %v6508_v28 = vpop.permute.xlu0 %855 }
 0x24f   : > { %v1683_v45 = vmax.f32 %v1354_v40, 0.0  ;;  %v1357_v46 = vpop.f32.mrb[16].mxu1 }
 0x250   : > { %v1794_v47 = vmax.f32 %v1674_v41, %v1682_v42  ;;  %v1358_v48 = vadd.f32 %v1357_v46, %v806_v0  ;;  %v1359_v49 = vpop.f32.mrb[17].mxu1 }
 0x251   : > { %v1795_v50 = vmax.f32 %v1675_v44, %v1683_v45  ;;  %v1360_v51 = vadd.f32 %v1359_v49, %v806_v0 }
 0x252   : > { %v5200_v52 = vpack.c.bf16 %v1794_v47, %v1792_v35  ;;  %v1684_v53 = vmax.f32 %v1358_v48, 0.0  ;;  %v6530_v44 = vpop.permute.xlu0 %1930 }
 0x253   : > { %v1685_v55 = vmax.f32 %v1360_v51, 0.0  ;;  %v1363_v57 = vpop.f32.mrb[18].mxu1  ;;  %v5198_v60 = vpack.c.bf16 %v1795_v50, %v1793_v39  ;;  %v6518_v39 = vpop.permute.xlu1 %860 }
 0x254   : > { %v1796_v58 = vmax.f32 %v1676_v63, %v1684_v53  ;;  %v1364_v61 = vadd.f32 %v1363_v57, %v811_v15  ;;  %v1365_v62 = vpop.f32.mrb[19].mxu1 }
 0x255   : > { %v1797_v2 = vmax.f32 %v1677_v3, %v1685_v55  ;;  %v1366_v4 = vadd.f32 %v1365_v62, %v811_v15  ;;  %5199 = vmatprep.subr.bf16.mxu0 %v5198_v60 }
 0x256   : > { %v1686_v5 = vmax.f32 %v1364_v61, 0.0  ;;  %5201 = vmatpush1.bf16.msra.mxu0 %v5200_v52 }
 0x257   : > { %v1687_v0 = vmax.f32 %v1366_v4, 0.0  ;;  %v1369_v6 = vpop.f32.mrb[20].mxu1 }
 0x258   : > { %v1798_v7 = vmax.f32 %v1678_v14, %v1686_v5  ;;  %v6488_v8 = vadd.f32 %v1369_v6, %v816_v23  ;;  %v1371_v9 = vpop.f32.mrb[21].mxu1  ;;  %v6574_v6 = vld [vmem:[%s9364_s5 + $0x10] sm:$0xff] }
 0x259   : > { %v1799_v56 = vmax.f32 %v1679_v18, %v1687_v0  ;;  %v6492_v63 = vadd.f32 %v1371_v9, %v816_v23 }
 0x25a   : > { %v5204_v12 = vpack.c.bf16 %v1798_v7, %v1796_v58  ;;  %v1688_v13 = vmax.f32 %v6488_v8, 0.0 }
 0x25b   : > { %v1689_v3 = vmax.f32 %v6492_v63, 0.0  ;;  %v1375_v15 = vpop.f32.mrb[22].mxu1  ;;  %v5202_v16 = vpack.c.bf16 %v1799_v56, %v1797_v2  ;;  %v6560_v2 = vpop.permute.xlu0 %1940 }
 0x25c   : > { %v1800_v17 = vmax.f32 %v1680_v29, %v1688_v13  ;;  %v6498_v19 = vadd.f32 %v1375_v15, %v821_v38  ;;  %v1377_v14 = vpop.f32.mrb[23].mxu1 }
 0x25d   : > { %v1801_v20 = vmax.f32 %v1681_v32, %v1689_v3  ;;  %v6500_v21 = vadd.f32 %v1377_v14, %v821_v38  ;;  %5203 = vmatprep.subr.bf16.mxu0 %v5202_v16 }
 0x25e   : > { %v1690_v18 = vmax.f32 %v6498_v19, 0.0  ;;  %5205 = vmatpush1.bf16.msra.mxu0 %v5204_v12 }
 0x25f   : > { %v1691_v23 = vmax.f32 %v6500_v21, 0.0  ;;  %v1381_v24 = vpop.f32.mrb[24].mxu1 }
 0x260   : > { %v1802_v25 = vmax.f32 %v1682_v42, %v1690_v18  ;;  %v6506_v26 = vadd.f32 %v1381_v24, %v826_v43  ;;  %v1383_v27 = vpop.f32.mrb[25].mxu1 }
 0x261   : > { %v1803_v29 = vmax.f32 %v1683_v45, %v1691_v23  ;;  %v6510_v30 = vadd.f32 %v1383_v27, %v826_v43  ;;  %v6528_v43 = vld [vmem:[%s9364_s5] sm:$0xff] }
 0x262   : > { %v5208_v31 = vpack.c.bf16 %v1802_v25, %v1800_v17  ;;  %v1692_v32 = vmax.f32 %v6506_v26, 0.0  ;;  %v6601_v17 = vpop.permute.xlu0 %1950  ;;  %v6627_v26 = vld [vmem:[%s9364_s5 + $0x20] sm:$0xff] }
 0x263   : > { %v1693_v33 = vmax.f32 %v6510_v30, 0.0  ;;  %v1387_v34 = vpop.f32.mrb[26].mxu1  ;;  %v5206_v35 = vpack.c.bf16 %v1803_v29, %v1801_v20 }
 0x264   : > { %v1804_v36 = vmax.f32 %v1684_v53, %v1692_v32  ;;  %v6516_v37 = vadd.f32 %v1387_v34, %v831_v54  ;;  %v1389_v38 = vpop.f32.mrb[27].mxu1 }
 0x265   : > { %v1805_v40 = vmax.f32 %v1685_v55, %v1693_v33  ;;  %v6522_v41 = vadd.f32 %v1389_v38, %v831_v54  ;;  %5207 = vmatprep.subr.bf16.mxu0 %v5206_v35  ;;  %v6550_v54 = vld [vmem:[%s9364_s5 + $0x8] sm:$0xff]  ;;  %v6552_v55 = vpop.permute.xlu1 %1935 }
 0x266   : > { %v1694_v42 = vmax.f32 %v6516_v37, 0.0  ;;  %5209 = vmatpush1.bf16.msra.mxu0 %v5208_v31  ;;  %9622 = vst [vmem:[#allocation6_spill] sm:$0xff] %v6552_v55  ;;  %v6653_v38 = vld [vmem:[%s9364_s5 + $0x28] sm:$0xff] }
 0x267   : > { %v1695_v45 = vmax.f32 %v6522_v41, 0.0  ;;  %v1393_v46 = vpop.f32.mrb[28].mxu1  ;;  %5211 = vmatprep.subr.bf16.mxu0 %v5202_v16  ;;  %v6599_v16 = vld [vmem:[%s9364_s5 + $0x18] sm:$0xff] }
 0x268   : > { %v1806_v47 = vmax.f32 %v1686_v5, %v1694_v42  ;;  %v6535_v48 = vadd.f32 %v1393_v46, %v836_v1  ;;  %v1395_v49 = vpop.f32.mrb[29].mxu1 }
 0x269   : > { %v1807_v50 = vmax.f32 %v1687_v0, %v1695_v45  ;;  %v6539_v51 = vadd.f32 %v1395_v49, %v836_v1  ;;  %4979 = vmatmul.mubr.msk.f32.vlgmr.msra.gmra.mrb[8].mxu0 %vm1968_vm2, %v6528_v43  ;;  %v6582_v63 = vpop.permute.xlu1 %1945 }
 0x26a   : > { %v6543_v52 = vpack.c.bf16 %v1806_v47, %v1804_v36  ;;  %v1696_v53 = vmax.f32 %v6535_v48, 0.0  ;;  %5213 = vmatpush1.bf16.msra.mxu0 %v5204_v12  ;;  %2063 = vmatprep.mubr.f32.mxu0 %v9380_v11  ;;  %v6677_v48 = vld [vmem:[%s9364_s5 + $0x30] sm:$0xff] }
 0x26b   : > { %v1697_v57 = vmax.f32 %v6539_v51, 0.0  ;;  %v1399_v60 = vpop.f32.mrb[30].mxu1  ;;  %5215 = vmatprep.subr.bf16.mxu0 %v5206_v35  ;;  %v5218_v58 = vpack.c.bf16 %v1807_v50, %v1805_v40 }
 0x26c   : > { %v1808_v61 = vmax.f32 %v1688_v13, %v1696_v53  ;;  %v6558_v62 = vadd.f32 %v1399_v60, %v6490_v10  ;;  %v1401_v1 = vpop.f32.mrb[31].mxu1 }
 0x26d   : > { %v1809_v4 = vmax.f32 %v1689_v3, %v1697_v57  ;;  %v6565_v5 = vadd.f32 %v1401_v1, %v6490_v10  ;;  %4980 = vmatmul.mubr.msk.f32.gmra.mrb[10].mxu0 %vm1968_vm2, %v6550_v54  ;;  %v6629_v27 = vpop.permute.xlu1 %1955 }
 0x26e   : > { %v1698_v0 = vmax.f32 %v6558_v62, 0.0  ;;  %5217 = vmatpush1.bf16.msra.mxu0 %v5208_v31  ;;  %2069 = vmatprep.mubr.f32.mxu0 %v9380_v11  ;;  %v6697_v62 = vld [vmem:[%s9364_s5 + $0x38] sm:$0xff] }
 0x26f   : > { %v1699_v7 = vmax.f32 %v6565_v5, 0.0  ;;  %v1405_v8 = vpop.f32.mrb[32].mxu1  ;;  %5219 = vmatprep.subr.bf16.mxu0 %v5218_v58 }
 0x270   : > { %v1810_v9 = vmax.f32 %v1690_v18, %v1698_v0  ;;  %v6580_v10 = vadd.f32 %v1405_v8, %v6495_v59  ;;  %v1407_v56 = vpop.f32.mrb[33].mxu1 }
 0x271   : > { %v1811_v12 = vmax.f32 %v1691_v23, %v1699_v7  ;;  %v6587_v13 = vadd.f32 %v1407_v56, %v6495_v59  ;;  %4981 = vmatmul.mubr.msk.f32.gmra.mrb[12].mxu0 %vm1968_vm2, %v6574_v6  ;;  %v6663_v47 = vpop.permute.xlu1 %1965 }
 0x272   : > { %v6591_v3 = vpack.c.bf16 %v1810_v9, %v1808_v61  ;;  %v1700_v15 = vmax.f32 %v6580_v10, 0.0  ;;  %5221 = vmatpush1.bf16.msra.mxu0 %v6543_v52  ;;  %2075 = vmatprep.mubr.f32.mxu0 %v9380_v11 }
 0x273   : > { %v1701_v59 = vmax.f32 %v6587_v13, 0.0  ;;  %v1411_v19 = vpop.f32.mrb[34].mxu1  ;;  %v6604_v14 = vpack.c.bf16 %v1811_v12, %v1809_v4 }
 0x274   : > { %v1812_v20 = vmax.f32 %v1692_v32, %v1700_v15  ;;  %v6611_v21 = vadd.f32 %v1411_v19, %v6503_v22  ;;  %v1413_v18 = vpop.f32.mrb[35].mxu1 }
 0x275   : > { %v1813_v23 = vmax.f32 %v1693_v33, %v1701_v59  ;;  %v6616_v24 = vadd.f32 %v1413_v18, %v6503_v22  ;;  %4982 = vmatmul.mubr.msk.f32.gmra.mrb[14].mxu0 %vm1968_vm2, %v6599_v16  ;;  %5223 = vmatprep.subr.bf16.mxu0 %v6604_v14  ;;  %v6637_v33 = vpop.permute.xlu0 %1960 }
 0x276   : > { %v1702_v25 = vmax.f32 %v6611_v21, 0.0  ;;  %5225 = vmatpush1.bf16.msra.mxu0 %v6591_v3  ;;  %2081 = vmatprep.mubr.f32.mxu0 %v9380_v11 }
 0x277   : > { %v1703_v22 = vmax.f32 %v6616_v24, 0.0  ;;  %v1417_v29 = vpop.f32.mrb[36].mxu1  ;;  %5227 = vmatprep.subr.bf16.mxu0 %v5218_v58 }
 0x278   : > { %v1814_v30 = vmax.f32 %v1694_v42, %v1702_v25  ;;  %v6635_v31 = vadd.f32 %v1417_v29, %v6508_v28  ;;  %v1419_v32 = vpop.f32.mrb[37].mxu1 }
 0x279   : > { %v1815_v34 = vmax.f32 %v1695_v45, %v1703_v22  ;;  %v6642_v35 = vadd.f32 %v1419_v32, %v6508_v28  ;;  %4983 = vmatmul.mubr.msk.f32.gmra.mrb[16].mxu0 %vm1968_vm2, %v6627_v26 }
 0x27a   : > { %v6646_v36 = vpack.c.bf16 %v1814_v30, %v1812_v20  ;;  %v1704_v37 = vmax.f32 %v6635_v31, 0.0  ;;  %2087 = vmatprep.mubr.f32.mxu0 %v9380_v11 }
 0x27b   : > { %v1705_v40 = vmax.f32 %v6642_v35, 0.0  ;;  %v1423_v41 = vpop.f32.mrb[38].mxu1  ;;  %v6656_v42 = vpack.c.bf16 %v1815_v34, %v1813_v23 }
 0x27c   : > { %v1816_v28 = vmax.f32 %v1696_v53, %v1704_v37  ;;  %v6661_v45 = vadd.f32 %v1423_v41, %v6518_v39  ;;  %v1425_v46 = vpop.f32.mrb[39].mxu1  ;;  %v866_v53 = vpop.permute.xlu0 %865 }
 0x27d   : > { %v1817_v49 = vmax.f32 %v1697_v57, %v1705_v40  ;;  %v6668_v50 = vadd.f32 %v1425_v46, %v6518_v39  ;;  %4984 = vmatmul.mubr.msk.f32.gmra.mrb[18].mxu0 %vm1968_vm2, %v6653_v38 }
 0x27e   : > { %v1706_v60 = vmax.f32 %v6661_v45, 0.0  ;;  %2093 = vmatprep.mubr.f32.mxu0 %v9380_v11 }
 0x27f   : > { %v1707_v58 = vmax.f32 %v6668_v50, 0.0  ;;  %v1429_v51 = vpop.f32.mrb[40].mxu1 }
 0x280   : > { %v1818_v39 = vmax.f32 %v1698_v0, %v1706_v60  ;;  %v6682_v57 = vadd.f32 %v1429_v51, %v866_v53  ;;  %v1431_v61 = vpop.f32.mrb[41].mxu1  ;;  %v871_v0 = vpop.permute.xlu1 %870 }
 0x281   : > { %v1819_v1 = vmax.f32 %v1699_v7, %v1707_v58  ;;  %v6686_v4 = vadd.f32 %v1431_v61, %v866_v53  ;;  %4985 = vmatmul.mubr.msk.f32.gmra.mrb[20].mxu0 %vm1968_vm2, %v6677_v48  ;;  %v876_v23 = vpop.permute.xlu0 %875 }
 0x282   : > { %v6690_v8 = vpack.c.bf16 %v1818_v39, %v1816_v28  ;;  %v1708_v9 = vmax.f32 %v6682_v57, 0.0  ;;  %2099 = vmatprep.mubr.f32.mxu0 %v9380_v11 }
 0x283   : > { %v1709_v5 = vmax.f32 %v6686_v4, 0.0  ;;  %v1435_v7 = vpop.f32.mrb[42].mxu1  ;;  %v6700_v56 = vpack.c.bf16 %v1819_v1, %v1817_v49 }
 0x284   : > { %v1820_v12 = vmax.f32 %v1700_v15, %v1708_v9  ;;  %v6706_v13 = vadd.f32 %v1435_v7, %v871_v0  ;;  %v1437_v19 = vpop.f32.mrb[43].mxu1 }
 0x285   : > { %v1821_v20 = vmax.f32 %v1701_v59, %v1709_v5  ;;  %v6708_v21 = vadd.f32 %v1437_v19, %v871_v0  ;;  %4986 = vmatmul.mubr.msk.f32.gmra.mrb[22].mxu0 %vm1968_vm2, %v6697_v62 }
 0x286   : > { %v1710_v18 = vmax.f32 %v6706_v13, 0.0  ;;  %2186 = vmatprep.mubr.f32.mxu0 %v9380_v11 }
 0x287   : > { %v1711_v24 = vmax.f32 %v6708_v21, 0.0  ;;  %v1441_v29 = vpop.f32.mrb[44].mxu1 }
 0x288   : > { %v1822_v10 = vmax.f32 %v1702_v25, %v1710_v18  ;;  %v6717_v15 = vadd.f32 %v1441_v29, %v876_v23  ;;  %v1443_v30 = vpop.f32.mrb[45].mxu1  ;;  %v881_v25 = vpop.permute.xlu1 %880 }
 0x289   : > { %v1823_v59 = vmax.f32 %v1703_v22, %v1711_v24  ;;  %v6721_v31 = vadd.f32 %v1443_v30, %v876_v23  ;;  %4987 = vmatmul.mubr.msk.f32.vlgmr.msra.gmra.mrb[24].mxu0 %vm1968_vm2, %v6528_v43 }
 0x28a   : > { %v6725_v32 = vpack.c.bf16 %v1822_v10, %v1820_v12  ;;  %v1712_v34 = vmax.f32 %v6717_v15, 0.0  ;;  %5229 = vmatpush1.bf16.msra.mxu0 %v6543_v52  ;;  %2192 = vmatprep.mubr.f32.mxu0 %v9380_v11 }
 0x28b   : > { %v1713_v35 = vmax.f32 %v6721_v31, 0.0  ;;  %5231 = vmatprep.subr.bf16.mxu0 %v6604_v14  ;;  %v1447_v41 = vpop.f32.mrb[46].mxu1  ;;  %v6732_v22 = vpack.c.bf16 %v1823_v59, %v1821_v20 }
 0x28c   : > { %v1824_v28 = vmax.f32 %v1704_v37, %v1712_v34  ;;  %v6736_v45 = vadd.f32 %v1447_v41, %v881_v25  ;;  %v1449_v46 = vpop.f32.mrb[47].mxu1  ;;  %v886_v37 = vpop.permute.xlu0 %885 }
 0x28d   : > { %v1825_v49 = vmax.f32 %v1705_v40, %v1713_v35  ;;  %v6740_v52 = vadd.f32 %v1449_v46, %v881_v25  ;;  %4988 = vmatmul.mubr.msk.f32.gmra.mrb[26].mxu0 %vm1968_vm2, %v6550_v54  ;;  %5307 = vmatprep.subr.bf16.mxu1 %v6732_v22  ;;  %v891_v0 = vpop.permute.xlu1 %890 }
 0x28e   : > { %v1714_v14 = vmax.f32 %v6736_v45, 0.0  ;;  %5233 = vmatpush1.bf16.msra.mxu0 %v6591_v3  ;;  %5309 = vmatpush1.bf16.msra.mxu1 %v6725_v32 }
 0x28f   : > { %v1715_v50 = vmax.f32 %v6740_v52, 0.0  ;;  %5235 = vmatprep.subr.bf16.mxu0 %v6656_v42  ;;  %v1453_v53 = vpop.f32.mrb[48].mxu1  ;;  %2198 = vmatprep.mubr.f32.mxu0 %v9380_v11 }
 0x290   : > { %v1826_v40 = vmax.f32 %v1706_v60, %v1714_v14  ;;  %v6753_v51 = vadd.f32 %v1453_v53, %v886_v37  ;;  %v1455_v39 = vpop.f32.mrb[49].mxu1  ;;  %v896_v30 = vpop.permute.xlu0 %895 }
 0x291   : > { %v1827_v61 = vmax.f32 %v1707_v58, %v1715_v50  ;;  %v6755_v1 = vadd.f32 %v1455_v39, %v886_v37  ;;  %4989 = vmatmul.mubr.msk.f32.gmra.mrb[28].mxu0 %vm1968_vm2, %v6574_v6  ;;  %v901_v52 = vpop.permute.xlu1 %900 }
 0x292   : > { %v6759_v3 = vpack.c.bf16 %v1826_v40, %v1824_v28  ;;  %v1716_v4 = vmax.f32 %v6753_v51, 0.0  ;;  %5237 = vmatpush1.bf16.msra.mxu0 %v6646_v36  ;;  %2204 = vmatprep.mubr.f32.mxu0 %v9380_v11 }
 0x293   : > { %v1717_v60 = vmax.f32 %v6755_v1, 0.0  ;;  %5239 = vmatprep.subr.bf16.mxu0 %v6700_v56  ;;  %v1459_v7 = vpop.f32.mrb[50].mxu1  ;;  %v6766_v58 = vpack.c.bf16 %v1827_v61, %v1825_v49 }
 0x294   : > { %9623 = vst [vmem:[#allocation7_spill] sm:$0xff] %v6759_v3  ;;  %v1828_v12 = vmax.f32 %v1708_v9, %v1716_v4  ;;  %v6770_v19 = vadd.f32 %v1459_v7, %v891_v0  ;;  %v1461_v20 = vpop.f32.mrb[51].mxu1  ;;  %v906_v15 = vpop.permute.xlu0 %905 }
 0x295   : > { %9624 = vst [vmem:[#allocation8_spill] sm:$0xff] %v6766_v58  ;;  %v1829_v23 = vmax.f32 %v1709_v5, %v1717_v60  ;;  %v6772_v29 = vadd.f32 %v1461_v20, %v891_v0  ;;  %4990 = vmatmul.mubr.msk.f32.gmra.mrb[30].mxu0 %vm1968_vm2, %v6599_v16  ;;  %5311 = vmatprep.subr.bf16.mxu1 %v6766_v58  ;;  %v911_v20 = vpop.permute.xlu1 %910 }
 0x296   : > { %v1718_v10 = vmax.f32 %v6770_v19, 0.0  ;;  %5241 = vmatpush1.bf16.msra.mxu0 %v6690_v8  ;;  %5313 = vmatpush1.bf16.msra.mxu1 %v6759_v3 }
 0x297   : > { %v1719_v57 = vmax.f32 %v6772_v29, 0.0  ;;  %v1465_v9 = vpop.f32.mrb[52].mxu1  ;;  %2210 = vmatprep.mubr.f32.mxu0 %v9380_v11 }
 0x298   : > { %v1830_v5 = vmax.f32 %v1710_v18, %v1718_v10  ;;  %v6784_v59 = vadd.f32 %v1465_v9, %v896_v30  ;;  %v1467_v25 = vpop.f32.mrb[53].mxu1 }
 0x299   : > { %v1831_v41 = vmax.f32 %v1711_v24, %v1719_v57  ;;  %v6788_v28 = vadd.f32 %v1467_v25, %v896_v30  ;;  %4991 = vmatmul.mubr.msk.f32.gmra.mrb[32].mxu0 %vm1968_vm2, %v6627_v26 }
 0x29a   : > { %v6792_v46 = vpack.c.bf16 %v1830_v5, %v1828_v12  ;;  %v1720_v49 = vmax.f32 %v6784_v59, 0.0  ;;  %2216 = vmatprep.mubr.f32.mxu0 %v9380_v11 }
 0x29b   : > { %v1721_v13 = vmax.f32 %v6788_v28, 0.0  ;;  %v1471_v18 = vpop.f32.mrb[54].mxu1  ;;  %v6797_v37 = vpack.c.bf16 %v1831_v41, %v1829_v23 }
 0x29c   : > { %9625 = vst [vmem:[#allocation9_spill] sm:$0xff] %v6792_v46  ;;  %v1832_v21 = vmax.f32 %v1712_v34, %v1720_v49  ;;  %v6801_v24 = vadd.f32 %v1471_v18, %v901_v52  ;;  %v1473_v53 = vpop.f32.mrb[55].mxu1 }
 0x29d   : > { %9626 = vst [vmem:[#allocation10_spill] sm:$0xff] %v6797_v37  ;;  %v1833_v40 = vmax.f32 %v1713_v35, %v1721_v13  ;;  %v6805_v51 = vadd.f32 %v1473_v53, %v901_v52  ;;  %4992 = vmatmul.mubr.msk.f32.gmra.mrb[34].mxu0 %vm1968_vm2, %v6653_v38  ;;  %5315 = vmatprep.subr.bf16.mxu1 %v6797_v37 }
 0x29e   : > { %v1722_v39 = vmax.f32 %v6801_v24, 0.0  ;;  %5317 = vmatpush1.bf16.msra.mxu1 %v6792_v46  ;;  %2222 = vmatprep.mubr.f32.mxu0 %v9380_v11 }
 0x29f   : > { %v1723_v34 = vmax.f32 %v6805_v51, 0.0  ;;  %v1477_v61 = vpop.f32.mrb[56].mxu1 }
 0x2a0   : > { %v1834_v31 = vmax.f32 %v1714_v14, %v1722_v39  ;;  %v6816_v35 = vadd.f32 %v1477_v61, %v906_v15  ;;  %v1479_v1 = vpop.f32.mrb[57].mxu1 }
 0x2a1   : > { %v1835_v0 = vmax.f32 %v1715_v50, %v1723_v34  ;;  %v6818_v7 = vadd.f32 %v1479_v1, %v906_v15  ;;  %4993 = vmatmul.mubr.msk.f32.gmra.mrb[36].mxu0 %vm1968_vm2, %v6677_v48 }
 0x2a2   : > { %v6822_v12 = vpack.c.bf16 %v1834_v31, %v1832_v21  ;;  %v1724_v19 = vmax.f32 %v6816_v35, 0.0  ;;  %2228 = vmatprep.mubr.f32.mxu0 %v9380_v11 }
 0x2a3   : > { %v1725_v23 = vmax.f32 %v6818_v7, 0.0  ;;  %v1483_v45 = vpop.f32.mrb[58].mxu1  ;;  %v6827_v14 = vpack.c.bf16 %v1835_v0, %v1833_v40 }
 0x2a4   : > { %9627 = vst [vmem:[#allocation11_spill] sm:$0xff] %v6822_v12  ;;  %v1836_v50 = vmax.f32 %v1716_v4, %v1724_v19  ;;  %v6831_v29 = vadd.f32 %v1483_v45, %v911_v20  ;;  %v1485_v30 = vpop.f32.mrb[59].mxu1  ;;  %v916_v4 = vpop.permute.xlu0 %915 }
 0x2a5   : > { %9628 = vst [vmem:[#allocation12_spill] sm:$0xff] %v6827_v14  ;;  %v1837_v9 = vmax.f32 %v1717_v60, %v1725_v23  ;;  %v6835_v5 = vadd.f32 %v1485_v30, %v911_v20  ;;  %4994 = vmatmul.mubr.msk.f32.gmra.mrb[38].mxu0 %vm1968_vm2, %v6697_v62  ;;  %5319 = vmatprep.subr.bf16.mxu1 %v6827_v14 }
 0x2a6   : > { %v1726_v59 = vmax.f32 %v6831_v29, 0.0  ;;  %5321 = vmatpush1.bf16.msra.mxu1 %v6822_v12  ;;  %2331 = vmatprep.mubr.f32.mxu0 %v9380_v11 }
 0x2a7   : > { %v1727_v25 = vmax.f32 %v6835_v5, 0.0  ;;  %v1489_v41 = vpop.f32.mrb[60].mxu1 }
 0x2a8   : > { %v1838_v60 = vmax.f32 %v1718_v10, %v1726_v59  ;;  %v6846_v28 = vadd.f32 %v1489_v41, %v916_v4  ;;  %v1491_v52 = vpop.f32.mrb[61].mxu1  ;;  %v921_v10 = vpop.permute.xlu1 %920 }
 0x2a9   : > { %v1839_v18 = vmax.f32 %v1719_v57, %v1727_v25  ;;  %v6850_v21 = vadd.f32 %v1491_v52, %v916_v4  ;;  %4995 = vmatmul.mubr.msk.f32.vlgmr.msra.gmra.mrb[40].mxu0 %vm1968_vm2, %v6528_v43  ;;  %5014 = vmatmul.mubr.msk.f32.vlgmr.msra.gmra.mrb[120].mxu1 %vm1968_vm2, %v6528_v43 }
 0x2aa   : > { %v6856_v24 = vpack.c.bf16 %v1838_v60, %v1836_v50  ;;  %v1728_v53 = vmax.f32 %v6846_v28, 0.0  ;;  %2337 = vmatprep.mubr.f32.mxu0 %v9380_v11  ;;  %2851 = vmatprep.mubr.f32.mxu1 %v9380_v11 }
 0x2ab   : > { %v1729_v40 = vmax.f32 %v6850_v21, 0.0  ;;  %v1495_v57 = vpop.f32.mrb[62].mxu1  ;;  %v6862_v51 = vpack.c.bf16 %v1839_v18, %v1837_v9 }
 0x2ac   : > { %9629 = vst [vmem:[#allocation13_spill] sm:$0xff] %v6856_v24  ;;  %v1840_v15 = vmax.f32 %v1720_v49, %v1728_v53  ;;  %v6866_v61 = vadd.f32 %v1495_v57, %v921_v10  ;;  %v1497_v31 = vpop.f32.mrb[63].mxu1  ;;  %v926_v49 = vpop.permute.xlu0 %925 }
 0x2ad   : > { %9630 = vst [vmem:[#allocation14_spill] sm:$0xff] %v6862_v51  ;;  %v1841_v1 = vmax.f32 %v1721_v13, %v1729_v40  ;;  %v6870_v0 = vadd.f32 %v1497_v31, %v921_v10  ;;  %4996 = vmatmul.mubr.msk.f32.gmra.mrb[42].mxu0 %vm1968_vm2, %v6550_v54  ;;  %5015 = vmatmul.mubr.msk.f32.gmra.mrb[122].mxu1 %vm1968_vm2, %v6550_v54 }
 0x2ae   : > { %v1730_v20 = vmax.f32 %v6866_v61, 0.0  ;;  %5371 = vmatprep.subr.bf16.mxu1 %v6862_v51  ;;  %2343 = vmatprep.mubr.f32.mxu0 %v9380_v11 }
 0x2af   : > { %v1731_v45 = vmax.f32 %v6870_v0, 0.0  ;;  %5373 = vmatpush1.bf16.msra.mxu1 %v6856_v24  ;;  %v1501_v13 = vpop.f32.mrb[64].mxu1  ;;  %2857 = vmatprep.mubr.f32.mxu1 %v9380_v11 }
 0x2b0   : > { %v1842_v50 = vmax.f32 %v1722_v39, %v1730_v20  ;;  %v6884_v30 = vadd.f32 %v1501_v13, %v926_v49  ;;  %v1503_v9 = vpop.f32.mrb[65].mxu1  ;;  %v931_v39 = vpop.permute.xlu1 %930 }
 0x2b1   : > { %v1843_v4 = vmax.f32 %v1723_v34, %v1731_v45  ;;  %v6888_v41 = vadd.f32 %v1503_v9, %v926_v49  ;;  %4997 = vmatmul.mubr.msk.f32.gmra.mrb[44].mxu0 %vm1968_vm2, %v6574_v6  ;;  %5016 = vmatmul.mubr.msk.f32.gmra.mrb[124].mxu1 %vm1968_vm2, %v6574_v6  ;;  %v936_v35 = vpop.permute.xlu0 %935 }
 0x2b2   : > { %v6894_v60 = vpack.c.bf16 %v1842_v50, %v1840_v15  ;;  %v1732_v52 = vmax.f32 %v6884_v30, 0.0  ;;  %2349 = vmatprep.mubr.f32.mxu0 %v9380_v11  ;;  %2863 = vmatprep.mubr.f32.mxu1 %v9380_v11 }
 0x2b3   : > { %v1733_v18 = vmax.f32 %v6888_v41, 0.0  ;;  %v1507_v34 = vpop.f32.mrb[66].mxu1  ;;  %v6900_v10 = vpack.c.bf16 %v1843_v4, %v1841_v1 }
 0x2b4   : > { %9631 = vst [vmem:[#allocation15_spill] sm:$0xff] %v6894_v60  ;;  %v1844_v57 = vmax.f32 %v1724_v19, %v1732_v52  ;;  %v6906_v31 = vadd.f32 %v1507_v34, %v931_v39  ;;  %v1509_v15 = vpop.f32.mrb[67].mxu1 }
 0x2b5   : > { %9632 = vst [vmem:[#allocation16_spill] sm:$0xff] %v6900_v10  ;;  %v1845_v49 = vmax.f32 %v1725_v23, %v1733_v18  ;;  %v6912_v13 = vadd.f32 %v1509_v15, %v931_v39  ;;  %4998 = vmatmul.mubr.msk.f32.gmra.mrb[46].mxu0 %vm1968_vm2, %v6599_v16  ;;  %5017 = vmatmul.mubr.msk.f32.gmra.mrb[126].mxu1 %vm1968_vm2, %v6599_v16  ;;  %v946_v28 = vpop.permute.xlu0 %945 }
 0x2b6   : > { %v1734_v1 = vmax.f32 %v6906_v31, 0.0  ;;  %5375 = vmatprep.subr.bf16.mxu1 %v6900_v10  ;;  %2355 = vmatprep.mubr.f32.mxu0 %v9380_v11 }
 0x2b7   : > { %v1735_v19 = vmax.f32 %v6912_v13, 0.0  ;;  %5377 = vmatpush1.bf16.msra.mxu1 %v6894_v60  ;;  %v1513_v7 = vpop.f32.mrb[68].mxu1  ;;  %2869 = vmatprep.mubr.f32.mxu1 %v9380_v11 }
 0x2b8   : > { %v1846_v23 = vmax.f32 %v1726_v59, %v1734_v1  ;;  %v6928_v50 = vadd.f32 %v1513_v7, %v936_v35  ;;  %v1515_v9 = vpop.f32.mrb[69].mxu1  ;;  %v941_v59 = vpop.permute.xlu1 %940 }
 0x2b9   : > { %v1847_v4 = vmax.f32 %v1727_v25, %v1735_v19  ;;  %v6934_v39 = vadd.f32 %v1515_v9, %v936_v35  ;;  %4999 = vmatmul.mubr.msk.f32.gmra.mrb[48].mxu0 %vm1968_vm2, %v6627_v26  ;;  %5018 = vmatmul.mubr.msk.f32.gmra.mrb[128].mxu1 %vm1968_vm2, %v6627_v26  ;;  %v956_v30 = vpop.permute.xlu0 %955 }
 0x2ba   : > { %v6940_v34 = vpack.c.bf16 %v1846_v23, %v1844_v57  ;;  %v1736_v29 = vmax.f32 %v6928_v50, 0.0  ;;  %2361 = vmatprep.mubr.f32.mxu0 %v9380_v11  ;;  %2875 = vmatprep.mubr.f32.mxu1 %v9380_v11 }
 0x2bb   : > { %v9369_v5 = vmax.f32 %v6934_v39, 0.0  ;;  %v1519_v25 = vpop.f32.mrb[70].mxu1  ;;  %v5378_v15 = vpack.c.bf16 %v1847_v4, %v1845_v49 }
 0x2bc   : > { %v1848_v35 = vmax.f32 %v1728_v53, %v1736_v29  ;;  %v6950_v7 = vadd.f32 %v1519_v25, %v941_v59  ;;  %v1521_v57 = vpop.f32.mrb[71].mxu1 }
 0x2bd   : > { %v1849_v23 = vmax.f32 %v1729_v40, %v9369_v5  ;;  %v6956_v9 = vadd.f32 %v1521_v57, %v941_v59  ;;  %5000 = vmatmul.mubr.msk.f32.gmra.mrb[50].mxu0 %vm1968_vm2, %v6653_v38  ;;  %5019 = vmatmul.mubr.msk.f32.gmra.mrb[130].mxu1 %vm1968_vm2, %v6653_v38 }
 0x2be   : > { %v1738_v49 = vmax.f32 %v6950_v7, 0.0  ;;  %5379 = vmatprep.subr.bf16.mxu1 %v5378_v15  ;;  %2367 = vmatprep.mubr.f32.mxu0 %v9380_v11 }
 0x2bf   : > { %v9370_v53 = vmax.f32 %v6956_v9, 0.0  ;;  %5381 = vmatpush1.bf16.msra.mxu1 %v6940_v34  ;;  %v1525_v21 = vpop.f32.mrb[72].mxu1  ;;  %2881 = vmatprep.mubr.f32.mxu1 %v9380_v11 }
 0x2c0   : > { %v1850_v40 = vmax.f32 %v1730_v20, %v1738_v49  ;;  %v6971_v4 = vadd.f32 %v1525_v21, %v946_v28  ;;  %v1527_v59 = vpop.f32.mrb[73].mxu1  ;;  %v951_v20 = vpop.permute.xlu1 %950 }
 0x2c1   : > { %v1851_v25 = vmax.f32 %v1731_v45, %v9370_v53  ;;  %v6977_v57 = vadd.f32 %v1527_v59, %v946_v28  ;;  %5001 = vmatmul.mubr.msk.f32.gmra.mrb[52].mxu0 %vm1968_vm2, %v6677_v48  ;;  %5020 = vmatmul.mubr.msk.f32.gmra.mrb[132].mxu1 %vm1968_vm2, %v6677_v48 }
 0x2c2   : > { %v5384_v5 = vpack.c.bf16 %v1850_v40, %v1848_v35  ;;  %v9372_v61 = vmax.f32 %v6971_v4, 0.0  ;;  %2373 = vmatprep.mubr.f32.mxu0 %v9380_v11  ;;  %2887 = vmatprep.mubr.f32.mxu1 %v9380_v11 }
 0x2c3   : > { %v9371_v21 = vmax.f32 %v6977_v57, 0.0  ;;  %v1531_v0 = vpop.f32.mrb[74].mxu1  ;;  %v5382_v45 = vpack.c.bf16 %v1851_v25, %v1849_v23 }
 0x2c4   : > { %v1852_v28 = vmax.f32 %v1732_v52, %v9372_v61  ;;  %v6991_v59 = vadd.f32 %v1531_v0, %v951_v20  ;;  %v1533_v53 = vpop.f32.mrb[75].mxu1  ;;  %v961_v31 = vpop.permute.xlu1 %960 }
 0x2c5   : > { %v1853_v35 = vmax.f32 %v1733_v18, %v9371_v21  ;;  %v6997_v40 = vadd.f32 %v1533_v53, %v951_v20  ;;  %5002 = vmatmul.mubr.msk.f32.gmra.mrb[54].mxu0 %vm1968_vm2, %v6697_v62  ;;  %5021 = vmatmul.mubr.msk.f32.gmra.mrb[134].mxu1 %vm1968_vm2, %v6697_v62 }
 0x2c6   : > { %v1742_v23 = vmax.f32 %v6991_v59, 0.0  ;;  %5383 = vmatprep.subr.bf16.mxu1 %v5382_v45  ;;  %3287 = vmatprep.mubr.f32.mxu1 %v9380_v11 }
 0x2c7   : > { %v1743_v52 = vmax.f32 %v6997_v40, 0.0  ;;  %5385 = vmatpush1.bf16.msra.mxu1 %v5384_v5  ;;  %v1537_v25 = vpop.f32.mrb[76].mxu1  ;;  %2479 = vmatprep.mubr.f32.mxu0 %v9380_v11 }
 0x2c8   : > { %v1854_v41 = vmax.f32 %v1734_v1, %v1742_v23  ;;  %v7011_v18 = vadd.f32 %v1537_v25, %v956_v30  ;;  %5403 = vmatprep.subr.bf16.mxu1 %v5378_v15  ;;  %v1539_v53 = vpop.f32.mrb[77].mxu1 }
 0x2c9   : > { %v1855_v20 = vmax.f32 %v1735_v19, %v1743_v52  ;;  %v7017_v0 = vadd.f32 %v1539_v53, %v956_v30  ;;  %v9633_v30 = vmax.f32 %v6934_v39, 0.0 }
 0x2ca   : > { %v7019_v21 = vpack.c.bf16 %v1854_v41, %v1852_v28  ;;  %v1744_v61 = vmax.f32 %v7011_v18, 0.0  ;;  %5032 = vmatmul.mubr.msk.f32.vlgmr.msra.gmra.mrb[136].mxu1 %vm1968_vm2, %v6528_v43 }
 0x2cb   : > { %v9373_v1 = vmax.f32 %v7017_v0, 0.0  ;;  %5405 = vmatpush1.bf16.msra.mxu1 %v6940_v34  ;;  %v1543_v15 = vpop.f32.mrb[78].mxu1  ;;  %3293 = vmatprep.mubr.f32.mxu1 %v9380_v11  ;;  %v5410_v25 = vpack.c.bf16 %v1855_v20, %v1853_v35  ;;  %v966_v35 = vpop.permute.xlu0 %965 }
 0x2cc   : > { %v1856_v13 = vmax.f32 %v1736_v29, %v1744_v61  ;;  %v7031_v19 = vadd.f32 %v1543_v15, %v961_v31  ;;  %5407 = vmatprep.subr.bf16.mxu1 %v5382_v45  ;;  %v1545_v28 = vpop.f32.mrb[79].mxu1 }
 0x2cd   : > { %v1857_v41 = vmax.f32 %v9633_v30, %v9373_v1  ;;  %v7037_v53 = vadd.f32 %v1545_v28, %v961_v31  ;;  %v9634_v31 = vmax.f32 %v6956_v9, 0.0  ;;  %v9635_v9 = vmax.f32 %v6971_v4, 0.0 }
 0x2ce   : > { %v1746_v34 = vmax.f32 %v7031_v19, 0.0  ;;  %5033 = vmatmul.mubr.msk.f32.gmra.mrb[138].mxu1 %vm1968_vm2, %v6550_v54 }
 0x2cf   : > { %v1747_v50 = vmax.f32 %v7037_v53, 0.0  ;;  %5409 = vmatpush1.bf16.msra.mxu1 %v5384_v5  ;;  %v1549_v29 = vpop.f32.mrb[80].mxu1  ;;  %3299 = vmatprep.mubr.f32.mxu1 %v9380_v11  ;;  %v971_v5 = vpop.permute.xlu1 %970 }
 0x2d0   : > { %v1858_v45 = vmax.f32 %v1738_v49, %v1746_v34  ;;  %v7046_v20 = vadd.f32 %v1549_v29, %v966_v35  ;;  %5411 = vmatprep.subr.bf16.mxu1 %v5410_v25  ;;  %v1551_v39 = vpop.f32.mrb[81].mxu1 }
 0x2d1   : > { %v1859_v15 = vmax.f32 %v9634_v31, %v1747_v50  ;;  %v7050_v19 = vadd.f32 %v1551_v39, %v966_v35 }
 0x2d2   : > { %v7052_v28 = vpack.c.bf16 %v1858_v45, %v1856_v13  ;;  %v1748_v30 = vmax.f32 %v7046_v20, 0.0  ;;  %5034 = vmatmul.mubr.msk.f32.gmra.mrb[140].mxu1 %vm1968_vm2, %v6574_v6  ;;  %v9636_v45 = vmax.f32 %v6977_v57, 0.0 }
 0x2d3   : > { %v1749_v7 = vmax.f32 %v7050_v19, 0.0  ;;  %5413 = vmatpush1.bf16.msra.mxu1 %v7019_v21  ;;  %v1555_v49 = vpop.f32.mrb[82].mxu1  ;;  %3305 = vmatprep.mubr.f32.mxu1 %v9380_v11  ;;  %v7060_v53 = vpack.c.bf16 %v1859_v15, %v1857_v41  ;;  %v976_v19 = vpop.permute.xlu0 %975 }
 0x2d4   : > { %v1860_v35 = vmax.f32 %v9635_v9, %v1748_v30  ;;  %v1556_v13 = vadd.f32 %v1555_v49, %v971_v5  ;;  %v1557_v29 = vpop.f32.mrb[83].mxu1 }
 0x2d5   : > { %v1861_v20 = vmax.f32 %v9636_v45, %v1749_v7  ;;  %v1558_v39 = vadd.f32 %v1557_v29, %v971_v5  ;;  %5415 = vmatprep.subr.bf16.mxu1 %v7060_v53  ;;  %v981_v29 = vpop.permute.xlu1 %980 }
 0x2d6   : > { %v1750_v31 = vmax.f32 %v1556_v13, 0.0  ;;  %5035 = vmatmul.mubr.msk.f32.gmra.mrb[142].mxu1 %vm1968_vm2, %v6599_v16 }
 0x2d7   : > { %v1751_v1 = vmax.f32 %v1558_v39, 0.0  ;;  %5417 = vmatpush1.bf16.msra.mxu1 %v7052_v28  ;;  %v1561_v41 = vpop.f32.mrb[84].mxu1  ;;  %3311 = vmatprep.mubr.f32.mxu1 %v9380_v11 }
 0x2d8   : > { %v1862_v4 = vmax.f32 %v1742_v23, %v1750_v31  ;;  %v7073_v15 = vadd.f32 %v1561_v41, %v976_v19  ;;  %5435 = vmatprep.subr.bf16.mxu1 %v5410_v25  ;;  %v1563_v57 = vpop.f32.mrb[85].mxu1 }
 0x2d9   : > { %v1863_v5 = vmax.f32 %v1743_v52, %v1751_v1  ;;  %v7077_v49 = vadd.f32 %v1563_v57, %v976_v19 }
 0x2da   : > { %v7079_v9 = vpack.c.bf16 %v1862_v4, %v1860_v35  ;;  %v1752_v13 = vmax.f32 %v7073_v15, 0.0  ;;  %5036 = vmatmul.mubr.msk.f32.gmra.mrb[144].mxu1 %vm1968_vm2, %v6627_v26  ;;  %v9639_v35 = vmax.f32 %v7017_v0, 0.0  ;;  %v986_v4 = vpop.permute.xlu0 %985 }
 0x2db   : > { %v1753_v59 = vmax.f32 %v7077_v49, 0.0  ;;  %v1567_v23 = vpop.f32.mrb[86].mxu1  ;;  %3317 = vmatprep.mubr.f32.mxu1 %v9380_v11  ;;  %v7086_v25 = vpack.c.bf16 %v1863_v5, %v1861_v20 }
 0x2dc   : > { %9637 = vst [vmem:[#allocation17_spill] sm:$0xff] %v7079_v9  ;;  %v1864_v40 = vmax.f32 %v1744_v61, %v1752_v13  ;;  %v1568_v52 = vadd.f32 %v1567_v23, %v981_v29  ;;  %v1569_v45 = vpop.f32.mrb[87].mxu1  ;;  %v991_v23 = vpop.permute.xlu1 %990 }
 0x2dd   : > { %9638 = vst [vmem:[#allocation18_spill] sm:$0xff] %v7086_v25  ;;  %v1865_v39 = vmax.f32 %v9639_v35, %v1753_v59  ;;  %v7092_v19 = vadd.f32 %v1569_v45, %v981_v29 }
 0x2de   : > { %v1754_v41 = vmax.f32 %v1568_v52, 0.0  ;;  %5037 = vmatmul.mubr.msk.f32.gmra.mrb[146].mxu1 %vm1968_vm2, %v6653_v38 }
 0x2df   : > { %v1755_v15 = vmax.f32 %v7092_v19, 0.0  ;;  %v1573_v57 = vpop.f32.mrb[88].mxu1  ;;  %3323 = vmatprep.mubr.f32.mxu1 %v9380_v11 }
 0x2e0   : > { %v1866_v20 = vmax.f32 %v1746_v34, %v1754_v41  ;;  %v7098_v18 = vadd.f32 %v1573_v57, %v986_v4  ;;  %v1575_v61 = vpop.f32.mrb[89].mxu1 }
 0x2e1   : > { %v1867_v5 = vmax.f32 %v1747_v50, %v1755_v15  ;;  %v7100_v49 = vadd.f32 %v1575_v61, %v986_v4 }
 0x2e2   : > { %v7102_v0 = vpack.c.bf16 %v1866_v20, %v1864_v40  ;;  %v1756_v29 = vmax.f32 %v7098_v18, 0.0  ;;  %5038 = vmatmul.mubr.msk.f32.gmra.mrb[148].mxu1 %vm1968_vm2, %v6677_v48  ;;  %v996_v20 = vpop.permute.xlu0 %995 }
 0x2e3   : > { %v1757_v52 = vmax.f32 %v7100_v49, 0.0  ;;  %v1579_v45 = vpop.f32.mrb[90].mxu1  ;;  %3329 = vmatprep.mubr.f32.mxu1 %v9380_v11  ;;  %v7109_v34 = vpack.c.bf16 %v1867_v5, %v1865_v39 }
 0x2e4   : > { %9640 = vst [vmem:[#allocation19_spill] sm:$0xff] %v7102_v0  ;;  %v1868_v35 = vmax.f32 %v1748_v30, %v1756_v29  ;;  %v7111_v19 = vadd.f32 %v1579_v45, %v991_v23  ;;  %v1581_v50 = vpop.f32.mrb[91].mxu1 }
 0x2e5   : > { %9641 = vst [vmem:[#allocation20_spill] sm:$0xff] %v7109_v34  ;;  %v1869_v4 = vmax.f32 %v1749_v7, %v1757_v52  ;;  %v7113_v40 = vadd.f32 %v1581_v50, %v991_v23 }
 0x2e6   : > { %v1758_v57 = vmax.f32 %v7111_v19, 0.0  ;;  %5039 = vmatmul.mubr.msk.f32.gmra.mrb[150].mxu1 %vm1968_vm2, %v6697_v62  ;;  %v1001_v19 = vpop.permute.xlu1 %1000 }
 0x2e7   : > { %v1759_v18 = vmax.f32 %v7113_v40, 0.0  ;;  %v1585_v61 = vpop.f32.mrb[92].mxu1  ;;  %3508 = vmatprep.mubr.f32.mxu1 %v9380_v11 }
 0x2e8   : > { %v1870_v39 = vmax.f32 %v1750_v31, %v1758_v57  ;;  %v7120_v5 = vadd.f32 %v1585_v61, %v996_v20  ;;  %v1587_v30 = vpop.f32.mrb[93].mxu1 }
 0x2e9   : > { %v1871_v49 = vmax.f32 %v1751_v1, %v1759_v18  ;;  %v7122_v45 = vadd.f32 %v1587_v30, %v996_v20 }
 0x2ea   : > { %v7124_v7 = vpack.c.bf16 %v1870_v39, %v1868_v35  ;;  %v1760_v23 = vmax.f32 %v7120_v5, 0.0  ;;  %5041 = vmatmul.mubr.msk.f32.vlgmr.msra.gmra.mrb[152].mxu1 %vm1968_vm2, %v6528_v43 }
 0x2eb   : > { %v1761_v50 = vmax.f32 %v7122_v45, 0.0  ;;  %5437 = vmatpush1.bf16.msra.mxu1 %v7019_v21  ;;  %v1591_v40 = vpop.f32.mrb[94].mxu1  ;;  %3514 = vmatprep.mubr.f32.mxu1 %v9380_v11  ;;  %v7132_v31 = vpack.c.bf16 %v1871_v49, %v1869_v4  ;;  %v1006_v4 = vpop.permute.xlu0 %1005 }
 0x2ec   : > { %9642 = vst [vmem:[#allocation21_spill] sm:$0xff] %v7124_v7  ;;  %v1872_v1 = vmax.f32 %v1752_v13, %v1760_v23  ;;  %5439 = vmatprep.subr.bf16.mxu1 %v7060_v53  ;;  %v7137_v35 = vadd.f32 %v1591_v40, %v1001_v19  ;;  %v1593_v20 = vpop.f32.mrb[95].mxu1 }
 0x2ed   : > { %9643 = vst [vmem:[#allocation22_spill] sm:$0xff] %v7132_v31  ;;  %v1873_v43 = vmax.f32 %v1753_v59, %v1761_v50  ;;  %v7141_v61 = vadd.f32 %v1593_v20, %v1001_v19 }
 0x2ee   : > { %v1762_v21 = vmax.f32 %v7137_v35, 0.0  ;;  %5042 = vmatmul.mubr.msk.f32.gmra.mrb[154].mxu1 %vm1968_vm2, %v6550_v54 }
 0x2ef   : > { %v1763_v39 = vmax.f32 %v7141_v61, 0.0  ;;  %5441 = vmatpush1.bf16.msra.mxu1 %v7052_v28  ;;  %v1597_v13 = vpop.f32.mrb[96].mxu1  ;;  %3520 = vmatprep.mubr.f32.mxu1 %v9380_v11  ;;  %v1011_v28 = vpop.permute.xlu1 %1010 }
 0x2f0   : > { %v1874_v53 = vmax.f32 %v1754_v41, %v1762_v21  ;;  %5443 = vmatprep.subr.bf16.mxu1 %v7086_v25  ;;  %v7150_v30 = vadd.f32 %v1597_v13, %v1006_v4  ;;  %v1599_v59 = vpop.f32.mrb[97].mxu1 }
 0x2f1   : > { %v1875_v49 = vmax.f32 %v1755_v15, %v1763_v39  ;;  %v7152_v19 = vadd.f32 %v1599_v59, %v1006_v4 }
 0x2f2   : > { %v7154_v40 = vpack.c.bf16 %v1874_v53, %v1872_v1  ;;  %v1764_v54 = vmax.f32 %v7150_v30, 0.0  ;;  %5043 = vmatmul.mubr.msk.f32.gmra.mrb[156].mxu1 %vm1968_vm2, %v6574_v6  ;;  %v1016_v6 = vpop.permute.xlu0 %1015 }
 0x2f3   : > { %v1765_v35 = vmax.f32 %v7152_v19, 0.0  ;;  %5445 = vmatpush1.bf16.msra.mxu1 %v7079_v9  ;;  %v1603_v41 = vpop.f32.mrb[98].mxu1  ;;  %3526 = vmatprep.mubr.f32.mxu1 %v9380_v11  ;;  %v7162_v20 = vpack.c.bf16 %v1875_v49, %v1873_v43 }
 0x2f4   : > { %9644 = vst [vmem:[#allocation23_spill] sm:$0xff] %v7154_v40  ;;  %v1876_v15 = vmax.f32 %v1756_v29, %v1764_v54  ;;  %5447 = vmatprep.subr.bf16.mxu1 %v7109_v34  ;;  %v1604_v1 = vadd.f32 %v1603_v41, %v1011_v28  ;;  %v1605_v61 = vpop.f32.mrb[99].mxu1  ;;  %v1021_v41 = vpop.permute.xlu1 %1020 }
 0x2f5   : > { %9645 = vst [vmem:[#allocation24_spill] sm:$0xff] %v7162_v20  ;;  %v1877_v4 = vmax.f32 %v1757_v52, %v1765_v35  ;;  %v1606_v13 = vadd.f32 %v1605_v61, %v1011_v28 }
 0x2f6   : > { %v1766_v53 = vmax.f32 %v1604_v1, 0.0  ;;  %5044 = vmatmul.mubr.msk.f32.gmra.mrb[158].mxu1 %vm1968_vm2, %v6599_v16 }
 0x2f7   : > { %v1767_v30 = vmax.f32 %v1606_v13, 0.0  ;;  %5449 = vmatpush1.bf16.msra.mxu1 %v7102_v0  ;;  %v1609_v59 = vpop.f32.mrb[100].mxu1  ;;  %3532 = vmatprep.mubr.f32.mxu1 %v9380_v11 }
 0x2f8   : > { %v1878_v43 = vmax.f32 %v1758_v57, %v1766_v53  ;;  %5499 = vmatprep.subr.bf16.mxu1 %v7132_v31  ;;  %v7170_v29 = vadd.f32 %v1609_v59, %v1016_v6  ;;  %v1611_v49 = vpop.f32.mrb[101].mxu1 }
 0x2f9   : > { %v1879_v19 = vmax.f32 %v1759_v18, %v1767_v30  ;;  %v7172_v52 = vadd.f32 %v1611_v49, %v1016_v6 }
 0x2fa   : > { %v7174_v28 = vpack.c.bf16 %v1878_v43, %v1876_v15  ;;  %v1768_v16 = vmax.f32 %v7170_v29, 0.0  ;;  %5045 = vmatmul.mubr.msk.f32.gmra.mrb[160].mxu1 %vm1968_vm2, %v6627_v26  ;;  %v1026_v43 = vpop.permute.xlu0 %1025 }
 0x2fb   : > { %v1769_v1 = vmax.f32 %v7172_v52, 0.0  ;;  %v1615_v61 = vpop.f32.mrb[102].mxu1  ;;  %3538 = vmatprep.mubr.f32.mxu1 %v9380_v11  ;;  %v7181_v57 = vpack.c.bf16 %v1879_v19, %v1877_v4 }
 0x2fc   : > { %v1880_v18 = vmax.f32 %v1760_v23, %v1768_v16  ;;  %v7185_v13 = vadd.f32 %v1615_v61, %v1021_v41  ;;  %v1617_v15 = vpop.f32.mrb[103].mxu1 }
 0x2fd   : > { %v1881_v6 = vmax.f32 %v1761_v50, %v1769_v1  ;;  %v7189_v59 = vadd.f32 %v1617_v15, %v1021_v41 }
 0x2fe   : > { %v1770_v26 = vmax.f32 %v7185_v13, 0.0  ;;  %5046 = vmatmul.mubr.msk.f32.gmra.mrb[162].mxu1 %vm1968_vm2, %v6653_v38  ;;  %v1031_v38 = vpop.permute.xlu1 %1030 }
 0x2ff   : > { %v1771_v4 = vmax.f32 %v7189_v59, 0.0  ;;  %v1621_v29 = vpop.f32.mrb[104].mxu1  ;;  %3544 = vmatprep.mubr.f32.mxu1 %v9380_v11 }
 0x300   : > { %v1882_v5 = vmax.f32 %v1762_v21, %v1770_v26  ;;  %v7196_v23 = vadd.f32 %v1621_v29, %v1026_v43  ;;  %v1623_v49 = vpop.f32.mrb[105].mxu1 }
 0x301   : > { %v1883_v19 = vmax.f32 %v1763_v39, %v1771_v4  ;;  %v7198_v45 = vadd.f32 %v1623_v49, %v1026_v43  ;;  %v1036_v43 = vpop.permute.xlu0 %1035 }
 0x302   : > { %v7200_v50 = vpack.c.bf16 %v1882_v5, %v1880_v18  ;;  %v9379_v52 = vmax.f32 %v7196_v23, 0.0  ;;  %5047 = vmatmul.mubr.msk.f32.gmra.mrb[164].mxu1 %vm1968_vm2, %v6677_v48 }
 0x303   : > { %v9378_v41 = vmax.f32 %v7198_v45, 0.0  ;;  %v1627_v61 = vpop.f32.mrb[106].mxu1  ;;  %3550 = vmatprep.mubr.f32.mxu1 %v9380_v11  ;;  %v7207_v21 = vpack.c.bf16 %v1883_v19, %v1881_v6 }
 0x304   : > { %v1884_v39 = vmax.f32 %v1764_v54, %v9379_v52  ;;  %v7211_v13 = vadd.f32 %v1627_v61, %v1031_v38  ;;  %v1629_v18 = vpop.f32.mrb[107].mxu1  ;;  %v7236_v61 = vld [vmem:[%s9364_s5] sm:$0xff] }
 0x305   : > { %v1885_v15 = vmax.f32 %v1765_v35, %v9378_v41  ;;  %v7215_v59 = vadd.f32 %v1629_v18, %v1031_v38  ;;  %9646 = vst [vmem:[#allocation25_spill] sm:$0xff] %v7236_v61 }
 0x306   : > { %v9375_v48 = vmax.f32 %v7211_v13, 0.0  ;;  %5048 = vmatmul.mubr.msk.f32.gmra.mrb[166].mxu1 %vm1968_vm2, %v6697_v62 }
 0x307   : > { %v9374_v6 = vmax.f32 %v7215_v59, 0.0  ;;  %v1633_v29 = vpop.f32.mrb[108].mxu1  ;;  %3729 = vmatprep.mubr.f32.mxu1 %v9380_v11 }
 0x308   : > { %v1886_v54 = vmax.f32 %v1766_v53, %v9375_v48  ;;  %v7224_v5 = vadd.f32 %v1633_v29, %v1036_v43  ;;  %v1635_v49 = vpop.f32.mrb[109].mxu1  ;;  %v1041_v53 = vpop.permute.xlu1 %1040 }
 0x309   : > { %v1887_v35 = vmax.f32 %v1767_v30, %v9374_v6  ;;  %v7228_v19 = vadd.f32 %v1635_v49, %v1036_v43 }
 0x30a   : > { %v7230_v38 = vpack.c.bf16 %v1886_v54, %v1884_v39  ;;  %v9377_v62 = vmax.f32 %v7224_v5, 0.0  ;;  %5050 = vmatmul.mubr.msk.f32.vlgmr.msra.gmra.mrb[168].mxu1 %vm1968_vm2, %v7236_v61 }
 0x30b   : > { %v9376_v18 = vmax.f32 %v7228_v19, 0.0  ;;  %5501 = vmatpush1.bf16.msra.mxu1 %v7124_v7  ;;  %v1639_v30 = vpop.f32.mrb[110].mxu1  ;;  %3735 = vmatprep.mubr.f32.mxu1 %v9380_v11  ;;  %v7243_v39 = vpack.c.bf16 %v1887_v35, %v1885_v15  ;;  %v7258_v15 = vld [vmem:[%s9364_s5 + $0x8] sm:$0xff]  ;;  %v7293_v7 = vld [vmem:[%s9364_s5 + $0x18] sm:$0xff] }
 0x30c   : > { %v1888_v43 = vmax.f32 %v1768_v16, %v9377_v62  ;;  %5503 = vmatprep.subr.bf16.mxu1 %v7162_v20  ;;  %v7248_v29 = vadd.f32 %v1639_v30, %v1041_v53  ;;  %v1641_v54 = vpop.f32.mrb[111].mxu1  ;;  %9647 = vst [vmem:[#allocation26_spill] sm:$0xff] %v7258_v15  ;;  %v1046_v16 = vpop.permute.xlu0 %1045  ;;  %9652 = vst [vmem:[#allocation28_spill] sm:$0xff] %v7293_v7 }
 0x30d   : > { %v1889_v49 = vmax.f32 %v1769_v1, %v9376_v18  ;;  %v7252_v6 = vadd.f32 %v1641_v54, %v1041_v53 }
 0x30e   : > { %v9383_v48 = vmax.f32 %v7248_v29, 0.0  ;;  %5051 = vmatmul.mubr.msk.f32.gmra.mrb[170].mxu1 %vm1968_vm2, %v7258_v15 }
 0x30f   : > { %v1779_v35 = vmax.f32 %v7252_v6, 0.0  ;;  %5505 = vmatpush1.bf16.msra.mxu1 %v7154_v40  ;;  %v1645_v30 = vpop.f32.mrb[112].mxu1  ;;  %3741 = vmatprep.mubr.f32.mxu1 %v9380_v11  ;;  %v7273_v6 = vld [vmem:[%s9364_s5 + $0x10] sm:$0xff]  ;;  %v1051_v11 = vpop.permute.xlu1 %1050 }
 0x310   : > { %v1890_v1 = vmax.f32 %v1770_v26, %v9383_v48  ;;  %5507 = vmatprep.subr.bf16.mxu1 %v7181_v57  ;;  %v1646_v53 = vadd.f32 %v1645_v30, %v1046_v16  ;;  %v1647_v54 = vpop.f32.mrb[113].mxu1  ;;  %9648 = vst [vmem:[#allocation27_spill] sm:$0xff] %v7273_v6  ;;  %v9649_v30 = vmov 0.0  }
 0x311   : > { %v1891_v18 = vmax.f32 %v1771_v4, %v1779_v35  ;;  %v1648_v62 = vadd.f32 %v1647_v54, %v1046_v16  ;;  %v9651_v54 = vmax.f32 %v7198_v45, 0.0 }
 0x312   : > { %v7268_v41 = vpack.c.bf16 %v1890_v1, %v1888_v43  ;;  %v1780_v52 = vmax.f32 %v1646_v53, 0.0  ;;  %5052 = vmatmul.mubr.msk.f32.gmra.mrb[172].mxu1 %vm1968_vm2, %v7273_v6  ;;  %v9650_v43 = vmax.f32 %v7196_v23, 0.0  ;;  %v1056_v23 = vpop.permute.xlu0 %1055 }
 0x313   : > { %v1781_v40 = vmax.f32 %v1648_v62, 0.0  ;;  %5509 = vmatpush1.bf16.msra.mxu1 %v7174_v28  ;;  %v1651_v26 = vpop.f32.mrb[114].mxu1  ;;  %3747 = vmatprep.mubr.f32.mxu1 %v9649_v30  ;;  %v7279_v4 = vpack.c.bf16 %v1891_v18, %v1889_v49 }
 0x314   : > { %v7283_v16 = vmax.f32 %v9650_v43, %v1780_v52  ;;  %5511 = vmatprep.subr.bf16.mxu1 %v7207_v21  ;;  %v1652_v1 = vadd.f32 %v1651_v26, %v1051_v11  ;;  %v1653_v53 = vpop.f32.mrb[115].mxu1  ;;  %v9654_v26 = vmax.f32 %v7215_v59, 0.0 }
 0x315   : > { %v7288_v48 = vmax.f32 %v9651_v54, %v1781_v40  ;;  %v1654_v62 = vadd.f32 %v1653_v53, %v1051_v11  ;;  %v9653_v40 = vmax.f32 %v7211_v13, 0.0 }
 0x316   : > { %v1782_v20 = vmax.f32 %v1652_v1, 0.0  ;;  %5053 = vmatmul.mubr.msk.f32.gmra.mrb[174].mxu1 %vm1968_vm2, %v7293_v7 }
 0x317   : > { %v1783_v52 = vmax.f32 %v1654_v62, 0.0  ;;  %5513 = vmatpush1.bf16.msra.mxu1 %v7200_v50  ;;  %v1657_v18 = vpop.f32.mrb[116].mxu1  ;;  %3753 = vmatprep.mubr.f32.mxu1 %v9649_v30  ;;  %v7313_v62 = vld [vmem:[%s9364_s5 + $0x20] sm:$0xff] }
 0x318   : > { %v7301_v45 = vmax.f32 %v9653_v40, %v1782_v20  ;;  %5531 = vmatprep.subr.bf16.mxu1 %v7181_v57  ;;  %v1658_v11 = vadd.f32 %v1657_v18, %v1056_v23  ;;  %v1659_v49 = vpop.f32.mrb[117].mxu1  ;;  %9655 = vst [vmem:[#allocation29_spill] sm:$0xff] %v7313_v62  ;;  %v1061_v20 = vpop.permute.xlu1 %1060 }
 0x319   : > { %v7306_v43 = vmax.f32 %v9654_v26, %v1783_v52  ;;  %v1660_v1 = vadd.f32 %v1659_v49, %v1056_v23  ;;  %v9656_v23 = vmax.f32 %v7224_v5, 0.0  ;;  %v9659_v5 = vmax.f32 %v7248_v29, 0.0  ;;  %v7351_v29 = vld [vmem:[%s9364_s5 + $0x38] sm:$0xff] }
 0x31a   : > { %v1784_v54 = vmax.f32 %v1658_v11, 0.0  ;;  %5054 = vmatmul.mubr.msk.f32.gmra.mrb[176].mxu1 %vm1968_vm2, %v7313_v62  ;;  %v9657_v11 = vmax.f32 %v7228_v19, 0.0 }
 0x31b   : > { %v1785_v57 = vmax.f32 %v1660_v1, 0.0  ;;  %v1663_v13 = vpop.f32.mrb[118].mxu1  ;;  %3759 = vmatprep.mubr.f32.mxu1 %v9649_v30  ;;  %v5570_v59 = vpack.c.bf16 %v7306_v43, %v7288_v48  ;;  %v7331_v1 = vld [vmem:[%s9364_s5 + $0x28] sm:$0xff] }
 0x31c   : > { %v7322_v52 = vmax.f32 %v9656_v23, %v1784_v54  ;;  %v1664_v18 = vadd.f32 %v1663_v13, %v1061_v20  ;;  %v1665_v40 = vpop.f32.mrb[119].mxu1  ;;  %9658 = vst [vmem:[#allocation30_spill] sm:$0xff] %v7331_v1 }
 0x31d   : > { %v7326_v49 = vmax.f32 %v9657_v11, %v1785_v57  ;;  %v1666_v26 = vadd.f32 %v1665_v40, %v1061_v20  ;;  %v7342_v20 = vld [vmem:[%s9364_s5 + $0x30] sm:$0xff] }
 0x31e   : > { %v1786_v53 = vmax.f32 %v1664_v18, 0.0  ;;  %5055 = vmatmul.mubr.msk.f32.gmra.mrb[178].mxu1 %vm1968_vm2, %v7331_v1  ;;  %9660 = vst [vmem:[#allocation31_spill] sm:$0xff] %v7342_v20 }
 0x31f   : > { %v1787_v48 = vmax.f32 %v1666_v26, 0.0  ;;  %3765 = vmatprep.mubr.f32.mxu1 %v9649_v30 }
 0x320   : > { %v1898_v43 = vmax.f32 %v9659_v5, %v1786_v53 }
 0x321   : > { %v1899_v54 = vmax.f32 %v1779_v35, %v1787_v48 }
 0x322   : > { %v5576_v19 = vpack.c.bf16 %v1898_v43, %v7322_v52  ;;  %5056 = vmatmul.mubr.msk.f32.gmra.mrb[180].mxu1 %vm1968_vm2, %v7342_v20 }
 0x323   : > { %3771 = vmatprep.mubr.f32.mxu1 %v9649_v30  ;;  %v5574_v57 = vpack.c.bf16 %v1899_v54, %v7326_v49 }
 0x326   : > { %5057 = vmatmul.mubr.msk.f32.gmra.mrb[182].mxu1 %vm1968_vm2, %v7351_v29 }
 0x327   : > { %4171 = vmatprep.mubr.f32.mxu1 %v9649_v30 }
 0x32a   : > { %5068 = vmatmul.mubr.msk.f32.vlgmr.msra.gmra.mrb[184].mxu1 %vm1968_vm2, %v7236_v61 }
 0x32b   : > { %5533 = vmatpush1.bf16.msra.mxu1 %v7174_v28  ;;  %4177 = vmatprep.mubr.f32.mxu1 %v9649_v30 }
 0x32c   : > { %5535 = vmatprep.subr.bf16.mxu1 %v7207_v21 }
 0x32e   : > { %5069 = vmatmul.mubr.msk.f32.gmra.mrb[186].mxu1 %vm1968_vm2, %v7258_v15 }
 0x32f   : > { %5537 = vmatpush1.bf16.msra.mxu1 %v7200_v50  ;;  %4183 = vmatprep.mubr.f32.mxu1 %v9649_v30 }
 0x330   : > { %5539 = vmatprep.subr.bf16.mxu1 %v7243_v39 }
 0x332   : > { %5070 = vmatmul.mubr.msk.f32.gmra.mrb[188].mxu1 %vm1968_vm2, %v7273_v6 }
 0x333   : > { %5541 = vmatpush1.bf16.msra.mxu1 %v7230_v38  ;;  %4189 = vmatprep.mubr.f32.mxu1 %v9649_v30 }
 0x334   : > { %5543 = vmatprep.subr.bf16.mxu1 %v7279_v4 }
 0x336   : > { %5071 = vmatmul.mubr.msk.f32.gmra.mrb[190].mxu1 %vm1968_vm2, %v7293_v7 }
 0x337   : > { %5545 = vmatpush1.bf16.msra.mxu1 %v7268_v41  ;;  %4195 = vmatprep.mubr.f32.mxu1 %v9649_v30 }
 0x338   : > { %5563 = vmatprep.subr.bf16.mxu1 %v7243_v39 }
 0x33a   : > { %5072 = vmatmul.mubr.msk.f32.gmra.mrb[192].mxu1 %vm1968_vm2, %v7313_v62 }
 0x33b   : > { %4201 = vmatprep.mubr.f32.mxu1 %v9649_v30 }
 0x33c   : > { %v2059_v28 = vpop.f32.mrb[8].mxu0 }
 0x33d   : > { %v2061_v50 = vpop.f32.mrb[9].mxu0 }
 0x33e   : > { %5073 = vmatmul.mubr.msk.f32.gmra.mrb[194].mxu1 %vm1968_vm2, %v7331_v1 }
 0x33f   : > { %4207 = vmatprep.mubr.f32.mxu1 %v9649_v30 }
 0x340   : > { %v2065_v21 = vpop.f32.mrb[10].mxu0 }
 0x341   : > { %v2067_v35 = vpop.f32.mrb[11].mxu0 }
 0x342   : > { %5074 = vmatmul.mubr.msk.f32.gmra.mrb[196].mxu1 %vm1968_vm2, %v7342_v20 }
 0x343   : > { %4213 = vmatprep.mubr.f32.mxu1 %v9649_v30 }
 0x344   : > { %v2071_v39 = vpop.f32.mrb[12].mxu0 }
 0x345   : > { %v2073_v53 = vpop.f32.mrb[13].mxu0 }
 0x346   : > { %5075 = vmatmul.mubr.msk.f32.gmra.mrb[198].mxu1 %vm1968_vm2, %v7351_v29 }
 0x347   : > { %4392 = vmatprep.mubr.f32.mxu1 %v9649_v30 }
 0x348   : > { %v7388_v13 = vpop.f32.mrb[14].mxu0 }
 0x349   : > { %v7390_v23 = vpop.f32.mrb[15].mxu0 }
 0x34a   : > { %5077 = vmatmul.mubr.msk.f32.vlgmr.msra.gmra.mrb[200].mxu1 %vm1968_vm2, %v7236_v61 }
 0x34b   : > { %5565 = vmatpush1.bf16.msra.mxu1 %v7230_v38  ;;  %4398 = vmatprep.mubr.f32.mxu1 %v9649_v30  ;;  %v9661_v38 = vpack.c.bf16 %v7301_v45, %v7283_v16  ;;  %v2060_v16 = vadd.f32 %v2059_v28, %v6530_v44  ;;  %v2062_v45 = vadd.f32 %v2061_v50, %v6530_v44 }
 0x34c   : > { %5567 = vmatprep.subr.bf16.mxu1 %v7279_v4  ;;  %v7397_v52 = vpop.f32.mrb[16].mxu0  ;;  %v2068_v50 = vadd.f32 %v2067_v35, %v6552_v55 }
 0x34d   : > { %v7399_v18 = vpop.f32.mrb[17].mxu0  ;;  %v2106_v54 = vmax.f32 %v2060_v16, 0.0  ;;  %v2107_v28 = vmax.f32 %v2062_v45, 0.0  ;;  %v2072_v45 = vadd.f32 %v2071_v39, %v6560_v2 }
 0x34e   : > { %5078 = vmatmul.mubr.msk.f32.gmra.mrb[202].mxu1 %vm1968_vm2, %v7258_v15 }
 0x34f   : > { %5569 = vmatpush1.bf16.msra.mxu1 %v7268_v41  ;;  %4404 = vmatprep.mubr.f32.mxu1 %v9649_v30 }
 0x350   : > { %5571 = vmatprep.subr.bf16.mxu1 %v5570_v59  ;;  %v7405_v40 = vpop.f32.mrb[18].mxu0 }
 0x351   : > { %v7407_v11 = vpop.f32.mrb[19].mxu0  ;;  %v2090_v24 = vadd.f32 %v7405_v40, %v6629_v27 }
 0x352   : > { %5079 = vmatmul.mubr.msk.f32.gmra.mrb[204].mxu1 %vm1968_vm2, %v7273_v6 }
 0x353   : > { %5573 = vmatpush1.bf16.msra.mxu1 %v9661_v38  ;;  %4410 = vmatprep.mubr.f32.mxu1 %v9649_v30  ;;  %v2116_v12 = vmax.f32 %v2090_v24, 0.0 }
 0x354   : > { %5575 = vmatprep.subr.bf16.mxu1 %v5574_v57  ;;  %v7415_v4 = vpop.f32.mrb[20].mxu0 }
 0x355   : > { %v7417_v41 = vpop.f32.mrb[21].mxu0 }
 0x356   : > { %5080 = vmatmul.mubr.msk.f32.gmra.mrb[206].mxu1 %vm1968_vm2, %v7293_v7 }
 0x357   : > { %5577 = vmatpush1.bf16.msra.mxu1 %v5576_v19  ;;  %4416 = vmatprep.mubr.f32.mxu1 %v9649_v30  ;;  %v2066_v19 = vadd.f32 %v2065_v21, %v6552_v55 }
 0x358   : > { %v7422_v59 = vpop.f32.mrb[22].mxu0 }
 0x359   : > { %v7424_v49 = vpop.f32.mrb[23].mxu0  ;;  %v2108_v35 = vmax.f32 %v2066_v19, 0.0  ;;  %v2102_v46 = vadd.f32 %v7422_v59, %v6663_v47 }
 0x35a   : > { %5081 = vmatmul.mubr.msk.f32.gmra.mrb[208].mxu1 %vm1968_vm2, %v7313_v62 }
 0x35b   : > { %4422 = vmatprep.mubr.f32.mxu1 %v9649_v30 }
 0x35c   : > { %v2188_v26 = vpop.f32.mrb[24].mxu0 }
 0x35d   : > { %v7432_v48 = vadd.f32 %v2188_v26, %v6530_v44  ;;  %v2190_v5 = vpop.f32.mrb[25].mxu0 }
 0x35e   : > { %v7435_v43 = vadd.f32 %v2190_v5, %v6530_v44  ;;  %5082 = vmatmul.mubr.msk.f32.gmra.mrb[210].mxu1 %vm1968_vm2, %v7331_v1 }
 0x35f   : > { %v9388_v57 = vmax.f32 %v7432_v48, 0.0  ;;  %4428 = vmatprep.mubr.f32.mxu1 %v9649_v30 }
 0x360   : > { %v9390_v38 = vmax.f32 %v7435_v43, 0.0  ;;  %v2194_v26 = vpop.f32.mrb[26].mxu0 }
 0x361   : > { %v7446_v5 = vmax.f32 %v2106_v54, %v9388_v57  ;;  %v7449_v31 = vadd.f32 %v2194_v26, %v6552_v55  ;;  %v2196_v16 = vpop.f32.mrb[27].mxu0  ;;  %v2109_v26 = vmax.f32 %v2068_v50, 0.0  ;;  %v2074_v57 = vadd.f32 %v2073_v53, %v6560_v2 }
 0x362   : > { %v7453_v21 = vmax.f32 %v2107_v28, %v9390_v38  ;;  %v7456_v0 = vadd.f32 %v2196_v16, %v6552_v55  ;;  %5083 = vmatmul.mubr.msk.f32.gmra.mrb[212].mxu1 %vm1968_vm2, %v7342_v20  ;;  %v2110_v53 = vmax.f32 %v2072_v45, 0.0  ;;  %v2078_v50 = vadd.f32 %v7388_v13, %v6582_v63 }
 0x363   : > { %v9392_v54 = vmax.f32 %v7449_v31, 0.0  ;;  %4434 = vmatprep.mubr.f32.mxu1 %v9649_v30  ;;  %v2084_v45 = vadd.f32 %v7397_v52, %v6601_v17 }
 0x364   : > { %v9393_v34 = vmax.f32 %v7456_v0, 0.0  ;;  %v2200_v28 = vpop.f32.mrb[28].mxu0  ;;  %v2112_v60 = vmax.f32 %v2078_v50, 0.0 }
 0x365   : > { %v7467_v16 = vmax.f32 %v2108_v35, %v9392_v54  ;;  %v7470_v38 = vadd.f32 %v2200_v28, %v6560_v2  ;;  %v2202_v19 = vpop.f32.mrb[29].mxu0  ;;  %v2111_v54 = vmax.f32 %v2074_v57, 0.0 }
 0x366   : > { %v7474_v39 = vmax.f32 %v2109_v26, %v9393_v34  ;;  %v7477_v9 = vadd.f32 %v2202_v19, %v6560_v2  ;;  %5084 = vmatmul.mubr.msk.f32.gmra.mrb[214].mxu1 %vm1968_vm2, %v7351_v29  ;;  %v2080_v26 = vadd.f32 %v7390_v23, %v6582_v63 }
 0x367   : > { %v9396_v28 = vmax.f32 %v7470_v38, 0.0  ;;  %4613 = vmatprep.mubr.f32.mxu1 %v9649_v30 }
 0x368   : > { %v9397_v19 = vmax.f32 %v7477_v9, 0.0  ;;  %v2206_v34 = vpop.f32.mrb[30].mxu0 }
 0x369   : > { %v7494_v13 = vmax.f32 %v2110_v53, %v9396_v28  ;;  %v7497_v35 = vadd.f32 %v2206_v34, %v6582_v63  ;;  %v2208_v25 = vpop.f32.mrb[31].mxu0  ;;  %v2113_v34 = vmax.f32 %v2080_v26, 0.0  ;;  %v2086_v28 = vadd.f32 %v7399_v18, %v6601_v17 }
 0x36a   : > { %v7501_v57 = vmax.f32 %v2111_v54, %v9397_v19  ;;  %v7504_v23 = vadd.f32 %v2208_v25, %v6582_v63  ;;  %5086 = vmatmul.mubr.msk.f32.vlgmr.msra.gmra.mrb[216].mxu1 %vm1968_vm2, %v7236_v61  ;;  %v2114_v18 = vmax.f32 %v2084_v45, 0.0  ;;  %v2096_v45 = vadd.f32 %v7415_v4, %v6637_v33 }
 0x36b   : > { %v9400_v53 = vmax.f32 %v7497_v35, 0.0  ;;  %4619 = vmatprep.mubr.f32.mxu1 %v9649_v30 }
 0x36c   : > { %v9401_v54 = vmax.f32 %v7504_v23, 0.0  ;;  %v2212_v19 = vpop.f32.mrb[32].mxu0 }
 0x36d   : > { %v7517_v25 = vmax.f32 %v2112_v60, %v9400_v53  ;;  %v7520_v50 = vadd.f32 %v2212_v19, %v6601_v17  ;;  %v2214_v10 = vpop.f32.mrb[33].mxu0  ;;  %v2115_v53 = vmax.f32 %v2086_v28, 0.0 }
 0x36e   : > { %v7524_v52 = vmax.f32 %v2113_v34, %v9401_v54  ;;  %v7527_v26 = vadd.f32 %v2214_v10, %v6601_v17  ;;  %5087 = vmatmul.mubr.msk.f32.gmra.mrb[218].mxu1 %vm1968_vm2, %v7258_v15  ;;  %v2092_v34 = vadd.f32 %v7407_v11, %v6629_v27 }
 0x36f   : > { %v9404_v19 = vmax.f32 %v7520_v50, 0.0  ;;  %4625 = vmatprep.mubr.f32.mxu1 %v9649_v30 }
 0x370   : > { %v9405_v10 = vmax.f32 %v7527_v26, 0.0  ;;  %v2218_v54 = vpop.f32.mrb[34].mxu0 }
 0x371   : > { %v7544_v40 = vmax.f32 %v2114_v18, %v9404_v19  ;;  %v7547_v60 = vadd.f32 %v2218_v54, %v6629_v27  ;;  %v2220_v51 = vpop.f32.mrb[35].mxu0  ;;  %v2117_v54 = vmax.f32 %v2092_v34, 0.0  ;;  %v2098_v19 = vadd.f32 %v7417_v41, %v6637_v33 }
 0x372   : > { %v7551_v28 = vmax.f32 %v2115_v53, %v9405_v10  ;;  %v7554_v11 = vadd.f32 %v2220_v51, %v6629_v27  ;;  %5088 = vmatmul.mubr.msk.f32.gmra.mrb[220].mxu1 %vm1968_vm2, %v7273_v6  ;;  %v2118_v41 = vmax.f32 %v2096_v45, 0.0 }
 0x373   : > { %v9408_v18 = vmax.f32 %v7547_v60, 0.0  ;;  %4631 = vmatprep.mubr.f32.mxu1 %v9649_v30 }
 0x374   : > { %v9409_v53 = vmax.f32 %v7554_v11, 0.0  ;;  %v2224_v10 = vpop.f32.mrb[36].mxu0 }
 0x375   : > { %v7567_v51 = vmax.f32 %v2116_v12, %v9408_v18  ;;  %v7570_v24 = vadd.f32 %v2224_v10, %v6637_v33  ;;  %v2226_v14 = vpop.f32.mrb[37].mxu0  ;;  %v2119_v18 = vmax.f32 %v2098_v19, 0.0 }
 0x376   : > { %v7574_v4 = vmax.f32 %v2117_v54, %v9409_v53  ;;  %v7577_v34 = vadd.f32 %v2226_v14, %v6637_v33  ;;  %5089 = vmatmul.mubr.msk.f32.gmra.mrb[222].mxu1 %vm1968_vm2, %v7293_v7  ;;  %v2104_v54 = vadd.f32 %v7424_v49, %v6663_v47  ;;  %v2120_v7 = vmax.f32 %v2102_v46, 0.0 }
 0x377   : > { %v9412_v10 = vmax.f32 %v7570_v24, 0.0  ;;  %4637 = vmatprep.mubr.f32.mxu1 %v9649_v30 }
 0x378   : > { %v9414_v14 = vmax.f32 %v7577_v34, 0.0  ;;  %v2230_v53 = vpop.f32.mrb[38].mxu0 }
 0x379   : > { %v7594_v59 = vmax.f32 %v2118_v41, %v9412_v10  ;;  %v7597_v12 = vadd.f32 %v2230_v53, %v6663_v47  ;;  %v2232_v37 = vpop.f32.mrb[39].mxu0  ;;  %v2121_v41 = vmax.f32 %v2104_v54, 0.0 }
 0x37a   : > { %v7601_v19 = vmax.f32 %v2119_v18, %v9414_v14  ;;  %v7604_v49 = vadd.f32 %v2232_v37, %v6663_v47  ;;  %5090 = vmatmul.mubr.msk.f32.gmra.mrb[224].mxu1 %vm1968_vm2, %v7313_v62 }
 0x37b   : > { %v9416_v45 = vmax.f32 %v7597_v12, 0.0  ;;  %4643 = vmatprep.mubr.f32.mxu1 %v9649_v30 }
 0x37c   : > { %v9417_v53 = vmax.f32 %v7604_v49, 0.0  ;;  %v2333_v10 = vpop.f32.mrb[40].mxu0  ;;  %v7611_v6 = vpop.f32.mrb[120].mxu1 }
 0x37d   : > { %9662 = vst [vmem:[#allocation32_spill] sm:$0xff] %v7611_v6  ;;  %v7615_v18 = vmax.f32 %v2120_v7, %v9416_v45  ;;  %v7618_v37 = vadd.f32 %v2333_v10, %v6530_v44  ;;  %v2335_v14 = vpop.f32.mrb[41].mxu0  ;;  %v7620_v62 = vpop.f32.mrb[121].mxu1 }
 0x37e   : > { %9664 = vst [vmem:[#allocation34_spill] sm:$0xff] %v7620_v62  ;;  %v7624_v46 = vmax.f32 %v2121_v41, %v9417_v53  ;;  %v7627_v54 = vadd.f32 %v2335_v14, %v6530_v44  ;;  %5091 = vmatmul.mubr.msk.f32.gmra.mrb[226].mxu1 %vm1968_vm2, %v7331_v1 }
 0x37f   : > { %9663 = vst [vmem:[#allocation33_spill] sm:$0xff] %v7618_v37  ;;  %4649 = vmatprep.mubr.f32.mxu1 %v9649_v30  ;;  %v9669_v15 = vmax.f32 %v7618_v37, 0.0 }
 0x380   : > { %v2339_v10 = vpop.f32.mrb[42].mxu0  ;;  %v7634_v45 = vpop.f32.mrb[122].mxu1  ;;  %v9673_v62 = vmax.f32 %v7627_v54, 0.0 }
 0x381   : > { %9665 = vst [vmem:[#allocation35_spill] sm:$0xff] %v7634_v45  ;;  %v7640_v53 = vadd.f32 %v2339_v10, %v6552_v55  ;;  %v2341_v14 = vpop.f32.mrb[43].mxu0  ;;  %v7642_v6 = vpop.f32.mrb[123].mxu1 }
 0x382   : > { %9667 = vst [vmem:[#allocation37_spill] sm:$0xff] %v7642_v6  ;;  %v7646_v7 = vadd.f32 %v2341_v14, %v6552_v55  ;;  %5092 = vmatmul.mubr.msk.f32.gmra.mrb[228].mxu1 %vm1968_vm2, %v7342_v20  ;;  %v9670_v6 = vmax.f32 %v7432_v48, 0.0  ;;  %v9671_v14 = vmax.f32 %v7449_v31, 0.0 }
 0x383   : > { %9666 = vst [vmem:[#allocation36_spill] sm:$0xff] %v7640_v53  ;;  %v9427_v45 = vmax.f32 %v7640_v53, 0.0  ;;  %4655 = vmatprep.mubr.f32.mxu1 %v9649_v30 }
 0x384   : > { %v2345_v41 = vpop.f32.mrb[44].mxu0  ;;  %v7653_v10 = vpop.f32.mrb[124].mxu1  ;;  %v2396_v1 = vmax.f32 %v9670_v6, %v9669_v15  ;;  %v9675_v37 = vmax.f32 %v7646_v7, 0.0  ;;  %v9676_v15 = vmax.f32 %v7456_v0, 0.0 }
 0x385   : > { %9668 = vst [vmem:[#allocation38_spill] sm:$0xff] %v7653_v10  ;;  %v2398_v61 = vmax.f32 %v9671_v14, %v9427_v45  ;;  %v7664_v20 = vadd.f32 %v2345_v41, %v6560_v2  ;;  %v2347_v3 = vpop.f32.mrb[45].mxu0  ;;  %v7666_v58 = vpop.f32.mrb[125].mxu1  ;;  %v9674_v10 = vmax.f32 %v7435_v43, 0.0 }
 0x386   : > { %v2399_v6 = vmax.f32 %v9676_v15, %v9675_v37  ;;  %v7677_v48 = vadd.f32 %v2347_v3, %v6560_v2  ;;  %5093 = vmatmul.mubr.msk.f32.gmra.mrb[230].mxu1 %vm1968_vm2, %v7351_v29  ;;  %v9680_v15 = vmax.f32 %v7470_v38, 0.0  ;;  %v9687_v38 = vmax.f32 %v7504_v23, 0.0 }
 0x387   : > { %9672 = vst [vmem:[#allocation39_spill] sm:$0xff] %v7664_v20  ;;  %v2397_v55 = vmax.f32 %v9674_v10, %v9673_v62  ;;  %v5244_v31 = vpack.c.bf16 %v2398_v61, %v2396_v1  ;;  %v9430_v53 = vmax.f32 %v7664_v20, 0.0 }
 0x388   : > { %v2351_v41 = vpop.f32.mrb[46].mxu0  ;;  %v7681_v14 = vpop.f32.mrb[126].mxu1  ;;  %v9684_v1 = vmax.f32 %v7677_v48, 0.0 }
 0x389   : > { %v5242_v45 = vpack.c.bf16 %v2399_v6, %v2397_v55  ;;  %v7685_v62 = vadd.f32 %v2351_v41, %v6582_v63  ;;  %v2353_v43 = vpop.f32.mrb[47].mxu0  ;;  %v7687_v10 = vpop.f32.mrb[127].mxu1  ;;  %v2400_v6 = vmax.f32 %v9680_v15, %v9430_v53  ;;  %v9681_v41 = vmax.f32 %v7497_v35, 0.0 }
 0x38a   : > { %9678 = vst [vmem:[#allocation41_spill] sm:$0xff] %v7687_v10  ;;  %v7691_v3 = vadd.f32 %v2353_v43, %v6582_v63 }
 0x38b   : > { %9677 = vst [vmem:[#allocation40_spill] sm:$0xff] %v7685_v62  ;;  %5243 = vmatprep.subr.bf16.mxu0 %v5242_v45  ;;  %v9431_v61 = vmax.f32 %v7685_v62, 0.0 }
 0x38c   : > { %5245 = vmatpush1.bf16.msra.mxu0 %v5244_v31  ;;  %v2357_v55 = vpop.f32.mrb[48].mxu0  ;;  %v7695_v37 = vpop.f32.mrb[128].mxu1  ;;  %v9686_v20 = vmax.f32 %v7691_v3, 0.0 }
 0x38d   : > { %9679 = vst [vmem:[#allocation42_spill] sm:$0xff] %v7695_v37  ;;  %v2402_v43 = vmax.f32 %v9681_v41, %v9431_v61  ;;  %v7706_v45 = vadd.f32 %v2357_v55, %v6601_v17  ;;  %v2359_v0 = vpop.f32.mrb[49].mxu0  ;;  %v7708_v31 = vpop.f32.mrb[129].mxu1  ;;  %v9685_v37 = vmax.f32 %v7477_v9, 0.0 }
 0x38e   : > { %9683 = vst [vmem:[#allocation44_spill] sm:$0xff] %v7708_v31  ;;  %v2403_v15 = vmax.f32 %v9687_v38, %v9686_v20  ;;  %v7719_v53 = vadd.f32 %v2359_v0, %v6601_v17  ;;  %v9694_v0 = vmax.f32 %v7527_v26, 0.0 }
 0x38f   : > { %9682 = vst [vmem:[#allocation43_spill] sm:$0xff] %v7706_v45  ;;  %v2401_v10 = vmax.f32 %v9685_v37, %v9684_v1  ;;  %v5248_v35 = vpack.c.bf16 %v2402_v43, %v2400_v6  ;;  %v9434_v31 = vmax.f32 %v7706_v45, 0.0  ;;  %v9690_v43 = vmax.f32 %v7520_v50, 0.0 }
 0x390   : > { %v2363_v41 = vpop.f32.mrb[50].mxu0  ;;  %v7721_v55 = vpop.f32.mrb[130].mxu1  ;;  %v9437_v37 = vmax.f32 %v7719_v53, 0.0  ;;  %v9696_v50 = vmax.f32 %v7554_v11, 0.0 }
 0x391   : > { %v5246_v61 = vpack.c.bf16 %v2403_v15, %v2401_v10  ;;  %v7725_v62 = vadd.f32 %v2363_v41, %v6629_v27  ;;  %v2365_v9 = vpop.f32.mrb[51].mxu0  ;;  %v7727_v1 = vpop.f32.mrb[131].mxu1  ;;  %v2404_v38 = vmax.f32 %v9690_v43, %v9434_v31  ;;  %v9691_v15 = vmax.f32 %v7547_v60, 0.0 }
 0x392   : > { %v7731_v20 = vadd.f32 %v2365_v9, %v6629_v27 }
 0x393   : > { %9688 = vst [vmem:[#allocation45_spill] sm:$0xff] %v7725_v62  ;;  %5247 = vmatprep.subr.bf16.mxu0 %v5246_v61  ;;  %v9435_v23 = vmax.f32 %v7725_v62, 0.0 }
 0x394   : > { %5249 = vmatpush1.bf16.msra.mxu0 %v5248_v35  ;;  %v2369_v10 = vpop.f32.mrb[52].mxu0  ;;  %v7735_v6 = vpop.f32.mrb[132].mxu1  ;;  %v9695_v45 = vmax.f32 %v7731_v20, 0.0 }
 0x395   : > { %9689 = vst [vmem:[#allocation46_spill] sm:$0xff] %v7735_v6  ;;  %v2406_v41 = vmax.f32 %v9691_v15, %v9435_v23  ;;  %v7746_v61 = vadd.f32 %v2369_v10, %v6637_v33  ;;  %v2371_v9 = vpop.f32.mrb[53].mxu0  ;;  %v7748_v35 = vpop.f32.mrb[133].mxu1  ;;  %v2405_v6 = vmax.f32 %v9694_v0, %v9437_v37 }
 0x396   : > { %9693 = vst [vmem:[#allocation48_spill] sm:$0xff] %v7748_v35  ;;  %v2407_v43 = vmax.f32 %v9696_v50, %v9695_v45  ;;  %v7759_v31 = vadd.f32 %v2371_v9, %v6637_v33  ;;  %v9699_v9 = vmax.f32 %v7597_v12, 0.0  ;;  %v1917_v12 = vld [vmem:[%s9366_s7 + $0x8] sm:$0xff] }
 0x397   : > { %9692 = vst [vmem:[#allocation47_spill] sm:$0xff] %v7746_v61  ;;  %v5252_v60 = vpack.c.bf16 %v2406_v41, %v2404_v38  ;;  %v9439_v35 = vmax.f32 %v7746_v61, 0.0 }
 0x398   : > { %v2375_v15 = vpop.f32.mrb[54].mxu0  ;;  %v7761_v10 = vpop.f32.mrb[134].mxu1  ;;  %v5250_v23 = vpack.c.bf16 %v2407_v43, %v2405_v6  ;;  %v9445_v37 = vmax.f32 %v7759_v31, 0.0  ;;  %v9698_v6 = vmax.f32 %v7570_v24, 0.0 }
 0x399   : > { %v7765_v62 = vadd.f32 %v2375_v15, %v6663_v47  ;;  %v2377_v26 = vpop.f32.mrb[55].mxu0  ;;  %v7767_v0 = vpop.f32.mrb[135].mxu1 }
 0x39a   : > { %9697 = vst [vmem:[#allocation49_spill] sm:$0xff] %v7767_v0  ;;  %v7771_v11 = vadd.f32 %v2377_v26, %v6663_v47  ;;  %5251 = vmatprep.subr.bf16.mxu0 %v5250_v23  ;;  %v2408_v41 = vmax.f32 %v9698_v6, %v9439_v35  ;;  %v9700_v23 = vmax.f32 %v7577_v34, 0.0  ;;  %v9702_v34 = vpack.c.bf16 %v7474_v39, %v7453_v21 }
 0x39b   : > { %v9446_v45 = vmax.f32 %v7765_v62, 0.0  ;;  %5253 = vmatpush1.bf16.msra.mxu0 %v5252_v60  ;;  %v9701_v60 = vmax.f32 %v7604_v49, 0.0  ;;  %v9703_v49 = vpack.c.bf16 %v7467_v16, %v7446_v5  ;;  %v9705_v21 = vpack.c.bf16 %v7517_v25, %v7494_v13 }
 0x39c   : > { %v9444_v38 = vmax.f32 %v7771_v11, 0.0  ;;  %v2409_v15 = vmax.f32 %v9700_v23, %v9445_v37  ;;  %v9706_v39 = vpack.c.bf16 %v7574_v4, %v7551_v28  ;;  %v9707_v16 = vpack.c.bf16 %v7567_v51, %v7544_v40  ;;  %v1916_v28 = vld [vmem:[%s9366_s7] sm:$0xff] }
 0x39d   : > { %v2410_v50 = vmax.f32 %v9699_v9, %v9446_v45  ;;  %v3289_v43 = vpop.f32.mrb[136].mxu1  ;;  %v9709_v25 = vpack.c.bf16 %v7615_v18, %v7594_v59 }
 0x39e   : > { %v2411_v26 = vmax.f32 %v9701_v60, %v9444_v38  ;;  %v3291_v61 = vpop.f32.mrb[137].mxu1  ;;  %v9710_v60 = vld [vmem:[#allocation6_spill] sm:$0xff] }
 0x39f   : > { %v5256_v0 = vpack.c.bf16 %v2410_v50, %v2408_v41 }
 0x3a0   : > { %v5254_v24 = vpack.c.bf16 %v2411_v26, %v2409_v15  ;;  %v9711_v26 = vld [vmem:[#allocation8_spill] sm:$0xff] }
 0x3a1   : > { %v3295_v6 = vpop.f32.mrb[138].mxu1 }
 0x3a2   : > { %v3297_v35 = vpop.f32.mrb[139].mxu1  ;;  %5255 = vmatprep.subr.bf16.mxu0 %v5254_v24 }
 0x3a3   : > { %5257 = vmatpush1.bf16.msra.mxu0 %v5256_v0  ;;  %v9704_v0 = vpack.c.bf16 %v7524_v52, %v7501_v57  ;;  %v9708_v57 = vpack.c.bf16 %v7624_v46, %v7601_v19  ;;  %v7850_v19 = vadd.f32 %v3291_v61, %v6530_v44  ;;  %v7867_v24 = vadd.f32 %v3297_v35, %v9710_v60 }
 0x3a4   : > { %5259 = vmatprep.subr.bf16.mxu0 %v9702_v34 }
 0x3a5   : > { %v3301_v9 = vpop.f32.mrb[140].mxu1  ;;  %v9441_v61 = vmax.f32 %v7850_v19, 0.0 }
 0x3a6   : > { %v3303_v23 = vpop.f32.mrb[141].mxu1  ;;  %5003 = vmatmul.mubr.msk.f32.vlgmr.msra.gmra.mrb[56].mxu0 %vm1968_vm2, %v1917_v12 }
 0x3a7   : > { %5261 = vmatpush1.bf16.msra.mxu0 %v9703_v49  ;;  %2553 = vmatprep.mubr.f32.mxu0 %v9649_v30 }
 0x3a8   : > { %5263 = vmatprep.subr.bf16.mxu0 %v9704_v0 }
 0x3a9   : > { %v3307_v41 = vpop.f32.mrb[142].mxu1 }
 0x3aa   : > { %v3309_v50 = vpop.f32.mrb[143].mxu1 }
 0x3ab   : > { %5265 = vmatpush1.bf16.msra.mxu0 %v9705_v21  ;;  %v9714_v21 = vld [vmem:[#allocation7_spill] sm:$0xff] }
 0x3ac   : > { %5267 = vmatprep.subr.bf16.mxu0 %v9706_v39 }
 0x3ad   : > { %v7811_v15 = vpop.f32.mrb[144].mxu1 }
 0x3ae   : > { %v7813_v5 = vpop.f32.mrb[145].mxu1 }
 0x3af   : > { %5269 = vmatpush1.bf16.msra.mxu0 %v9707_v16  ;;  %v7891_v16 = vadd.f32 %v3301_v9, %v6560_v2 }
 0x3b0   : > { %5271 = vmatprep.subr.bf16.mxu0 %v9708_v57 }
 0x3b1   : > { %v7821_v52 = vpop.f32.mrb[146].mxu1 }
 0x3b2   : > { %v7823_v13 = vpop.f32.mrb[147].mxu1 }
 0x3b3   : > { %5273 = vmatpush1.bf16.msra.mxu0 %v9709_v25  ;;  %v9443_v25 = vmax.f32 %v7867_v24, 0.0 }
 0x3b4   : > { %5275 = vmatprep.subr.bf16.mxu0 %v6656_v42  ;;  %v7846_v42 = vadd.f32 %v3289_v43, %v6530_v44  ;;  %v7861_v43 = vadd.f32 %v3295_v6, %v9710_v60 }
 0x3b5   : > { %v7832_v40 = vpop.f32.mrb[148].mxu1 }
 0x3b6   : > { %v7834_v51 = vpop.f32.mrb[149].mxu1  ;;  %5004 = vmatmul.mubr.msk.f32.vlgmr.msra.gmra.mrb[56].mxu0 %vm1968_vm2, %v1916_v28  ;;  %v9440_v39 = vmax.f32 %v7861_v43, 0.0  ;;  %v7896_v28 = vadd.f32 %v3303_v23, %v6560_v2 }
 0x3b7   : > { %5277 = vmatpush1.bf16.msra.mxu0 %v6646_v36  ;;  %2624 = vmatprep.mubr.f32.mxu0 %v9649_v30 }
 0x3b8   : > { %5279 = vmatprep.subr.bf16.mxu0 %v6700_v56 }
 0x3b9   : > { %v7840_v4 = vpop.f32.mrb[150].mxu1 }
 0x3ba   : > { %v7842_v59 = vpop.f32.mrb[151].mxu1 }
 0x3bb   : > { %5281 = vmatpush1.bf16.msra.mxu0 %v6690_v8  ;;  %v9442_v8 = vmax.f32 %v7846_v42, 0.0 }
 0x3bc   : > { %5283 = vmatprep.subr.bf16.mxu0 %v6732_v22 }
 0x3bd   : > { %v3510_v18 = vpop.f32.mrb[152].mxu1 }
 0x3be   : > { %v7853_v36 = vadd.f32 %v3510_v18, %v6530_v44  ;;  %v3512_v46 = vpop.f32.mrb[153].mxu1 }
 0x3bf   : > { %v7856_v56 = vadd.f32 %v3512_v46, %v6530_v44  ;;  %5285 = vmatpush1.bf16.msra.mxu0 %v6725_v32 }
 0x3c0   : > { %v9454_v22 = vmax.f32 %v7853_v36, 0.0  ;;  %5287 = vmatprep.subr.bf16.mxu0 %v9711_v26 }
 0x3c1   : > { %v9450_v12 = vmax.f32 %v7856_v56, 0.0  ;;  %v3516_v34 = vpop.f32.mrb[154].mxu1 }
 0x3c2   : > { %v7874_v32 = vmax.f32 %v9442_v8, %v9454_v22  ;;  %v7877_v6 = vadd.f32 %v3516_v34, %v9710_v60  ;;  %v3518_v49 = vpop.f32.mrb[155].mxu1  ;;  %v9451_v8 = vmax.f32 %v7896_v28, 0.0  ;;  %v9725_v22 = vld [vmem:[#allocation27_spill] sm:$0xff] }
 0x3c3   : > { %v7883_v0 = vmax.f32 %v9441_v61, %v9450_v12  ;;  %v7886_v35 = vadd.f32 %v3518_v49, %v9710_v60  ;;  %5289 = vmatpush1.bf16.msra.mxu0 %v9714_v21  ;;  %v9716_v49 = vld [vmem:[#allocation25_spill] sm:$0xff]  ;;  %v7964_v12 = vadd.f32 %v7813_v5, %v6601_v17 }
 0x3c4   : > { %9712 = vst [vmem:[#allocation6_spill] sm:$0xff] %v7874_v32  ;;  %v9453_v57 = vmax.f32 %v7877_v6, 0.0 }
 0x3c5   : > { %9713 = vst [vmem:[#allocation8_spill] sm:$0xff] %v7883_v0  ;;  %v9447_v18 = vmax.f32 %v7886_v35, 0.0  ;;  %v3522_v46 = vpop.f32.mrb[156].mxu1  ;;  %9723 = vst [vmem:[#allocation53_spill] sm:$0xff] %v7964_v12 }
 0x3c6   : > { %v7903_v26 = vmax.f32 %v9440_v39, %v9453_v57  ;;  %v7906_v34 = vadd.f32 %v3522_v46, %v6560_v2  ;;  %v3524_v9 = vpop.f32.mrb[157].mxu1  ;;  %5005 = vmatmul.mubr.msk.f32.vlgmr.msra.gmra.mrb[58].mxu0 %vm1968_vm2, %v9716_v49  ;;  %v9448_v39 = vmax.f32 %v7891_v16, 0.0  ;;  %v7922_v46 = vadd.f32 %v3307_v41, %v6582_v63 }
 0x3c7   : > { %v7914_v23 = vmax.f32 %v9443_v25, %v9447_v18  ;;  %v7917_v21 = vadd.f32 %v3524_v9, %v6560_v2  ;;  %2630 = vmatprep.mubr.f32.mxu0 %v9649_v30  ;;  %v7929_v25 = vadd.f32 %v3309_v50, %v6582_v63  ;;  %v9720_v18 = vld [vmem:[#allocation26_spill] sm:$0xff] }
 0x3c8   : > { %9715 = vst [vmem:[#allocation7_spill] sm:$0xff] %v7903_v26  ;;  %v9449_v49 = vmax.f32 %v7906_v34, 0.0 }
 0x3c9   : > { %9717 = vst [vmem:[#allocation25_spill] sm:$0xff] %v7914_v23  ;;  %9718 = vst [vmem:[#allocation50_spill] sm:$0xff] %v7929_v25  ;;  %v9452_v9 = vmax.f32 %v7917_v21, 0.0  ;;  %v3528_v38 = vpop.f32.mrb[158].mxu1  ;;  %v9737_v23 = vld [vmem:[#allocation29_spill] sm:$0xff] }
 0x3ca   : > { %v7938_v41 = vmax.f32 %v9448_v39, %v9449_v49  ;;  %v7941_v61 = vadd.f32 %v3528_v38, %v6582_v63  ;;  %v3530_v45 = vpop.f32.mrb[159].mxu1  ;;  %5006 = vmatmul.mubr.msk.f32.gmra.mrb[60].mxu0 %vm1968_vm2, %v9720_v18  ;;  %v9456_v39 = vmax.f32 %v7922_v46, 0.0  ;;  %v7958_v38 = vadd.f32 %v7811_v15, %v6601_v17 }
 0x3cb   : > { %v7949_v50 = vmax.f32 %v9451_v8, %v9452_v9  ;;  %v7952_v37 = vadd.f32 %v3530_v45, %v6582_v63  ;;  %2636 = vmatprep.mubr.f32.mxu0 %v9649_v30  ;;  %v9459_v18 = vmax.f32 %v7929_v25, 0.0 }
 0x3cc   : > { %9719 = vst [vmem:[#allocation51_spill] sm:$0xff] %v7938_v41  ;;  %9722 = vst [vmem:[#allocation52_spill] sm:$0xff] %v7958_v38  ;;  %v9457_v49 = vmax.f32 %v7941_v61, 0.0  ;;  %v9731_v41 = vld [vmem:[#allocation28_spill] sm:$0xff] }
 0x3cd   : > { %9721 = vst [vmem:[#allocation26_spill] sm:$0xff] %v7949_v50  ;;  %v9460_v8 = vmax.f32 %v7952_v37, 0.0  ;;  %v3534_v45 = vpop.f32.mrb[160].mxu1  ;;  %v8034_v50 = vadd.f32 %v7834_v51, %v6637_v33 }
 0x3ce   : > { %v7971_v9 = vmax.f32 %v9456_v39, %v9457_v49  ;;  %v7974_v15 = vadd.f32 %v3534_v45, %v6601_v17  ;;  %v3536_v57 = vpop.f32.mrb[161].mxu1  ;;  %5007 = vmatmul.mubr.msk.f32.gmra.mrb[62].mxu0 %vm1968_vm2, %v9725_v22  ;;  %v7991_v45 = vadd.f32 %v7821_v52, %v6629_v27  ;;  %v9729_v52 = vmax.f32 %v7958_v38, 0.0 }
 0x3cf   : > { %v7982_v5 = vmax.f32 %v9459_v18, %v9460_v8  ;;  %v7985_v32 = vadd.f32 %v3536_v57, %v6601_v17  ;;  %2642 = vmatprep.mubr.f32.mxu0 %v9649_v30  ;;  %v7999_v18 = vadd.f32 %v7823_v13, %v6629_v27  ;;  %v9732_v13 = vmax.f32 %v7964_v12, 0.0  ;;  %9735 = vst [vmem:[#allocation59_spill] sm:$0xff] %v8034_v50 }
 0x3d0   : > { %9724 = vst [vmem:[#allocation54_spill] sm:$0xff] %v7971_v9  ;;  %9727 = vst [vmem:[#allocation55_spill] sm:$0xff] %v7991_v45  ;;  %v9464_v49 = vmax.f32 %v7974_v15, 0.0 }
 0x3d1   : > { %9726 = vst [vmem:[#allocation27_spill] sm:$0xff] %v7982_v5  ;;  %9728 = vst [vmem:[#allocation56_spill] sm:$0xff] %v7999_v18  ;;  %v9466_v57 = vmax.f32 %v7985_v32, 0.0  ;;  %v3540_v8 = vpop.f32.mrb[162].mxu1 }
 0x3d2   : > { %v8008_v0 = vmax.f32 %v9729_v52, %v9464_v49  ;;  %v8011_v22 = vadd.f32 %v3540_v8, %v6629_v27  ;;  %v3542_v26 = vpop.f32.mrb[163].mxu1  ;;  %5008 = vmatmul.mubr.msk.f32.gmra.mrb[64].mxu0 %vm1968_vm2, %v9731_v41  ;;  %v9470_v52 = vmax.f32 %v7991_v45, 0.0  ;;  %v8028_v8 = vadd.f32 %v7832_v40, %v6637_v33 }
 0x3d3   : > { %v8019_v9 = vmax.f32 %v9732_v13, %v9466_v57  ;;  %v8022_v39 = vadd.f32 %v3542_v26, %v6629_v27  ;;  %2648 = vmatprep.mubr.f32.mxu0 %v9649_v30  ;;  %v9473_v41 = vmax.f32 %v7999_v18, 0.0 }
 0x3d4   : > { %9730 = vst [vmem:[#allocation57_spill] sm:$0xff] %v8008_v0  ;;  %9734 = vst [vmem:[#allocation58_spill] sm:$0xff] %v8028_v8  ;;  %v9471_v49 = vmax.f32 %v8011_v22, 0.0  ;;  %v9743_v0 = vld [vmem:[#allocation30_spill] sm:$0xff] }
 0x3d5   : > { %9733 = vst [vmem:[#allocation28_spill] sm:$0xff] %v8019_v9  ;;  %v9474_v13 = vmax.f32 %v8022_v39, 0.0  ;;  %v3546_v26 = vpop.f32.mrb[164].mxu1 }
 0x3d6   : > { %v8041_v57 = vmax.f32 %v9470_v52, %v9471_v49  ;;  %v8044_v40 = vadd.f32 %v3546_v26, %v6637_v33  ;;  %v3548_v5 = vpop.f32.mrb[165].mxu1  ;;  %5009 = vmatmul.mubr.msk.f32.gmra.mrb[66].mxu0 %vm1968_vm2, %v9737_v23  ;;  %v8061_v26 = vadd.f32 %v7840_v4, %v6663_v47  ;;  %v9741_v4 = vmax.f32 %v8028_v8, 0.0 }
 0x3d7   : > { %v8052_v51 = vmax.f32 %v9473_v41, %v9474_v13  ;;  %v8055_v12 = vadd.f32 %v3548_v5, %v6637_v33  ;;  %2654 = vmatprep.mubr.f32.mxu0 %v9649_v30  ;;  %v8069_v41 = vadd.f32 %v7842_v59, %v6663_v47  ;;  %v9744_v59 = vmax.f32 %v8034_v50, 0.0 }
 0x3d8   : > { %9736 = vst [vmem:[#allocation60_spill] sm:$0xff] %v8041_v57  ;;  %9739 = vst [vmem:[#allocation61_spill] sm:$0xff] %v8061_v26  ;;  %v9478_v49 = vmax.f32 %v8044_v40, 0.0 }
 0x3d9   : > { %9738 = vst [vmem:[#allocation29_spill] sm:$0xff] %v8052_v51  ;;  %9740 = vst [vmem:[#allocation62_spill] sm:$0xff] %v8069_v41  ;;  %v9480_v5 = vmax.f32 %v8055_v12, 0.0  ;;  %v3552_v13 = vpop.f32.mrb[166].mxu1  ;;  %v9748_v51 = vld [vmem:[#allocation31_spill] sm:$0xff] }
 0x3da   : > { %v8078_v45 = vmax.f32 %v9741_v4, %v9478_v49  ;;  %v8081_v23 = vadd.f32 %v3552_v13, %v6663_v47  ;;  %v3554_v18 = vpop.f32.mrb[167].mxu1  ;;  %5010 = vmatmul.mubr.msk.f32.gmra.mrb[68].mxu0 %vm1968_vm2, %v9743_v0  ;;  %v9484_v4 = vmax.f32 %v8061_v26, 0.0  ;;  %v9488_v49 = vmax.f32 %v8069_v41, 0.0 }
 0x3db   : > { %v8089_v57 = vmax.f32 %v9744_v59, %v9480_v5  ;;  %v8092_v52 = vadd.f32 %v3554_v18, %v6663_v47  ;;  %2660 = vmatprep.mubr.f32.mxu0 %v9649_v30 }
 0x3dc   : > { %9742 = vst [vmem:[#allocation63_spill] sm:$0xff] %v8078_v45  ;;  %v9485_v13 = vmax.f32 %v8081_v23, 0.0 }
 0x3dd   : > { %9745 = vst [vmem:[#allocation30_spill] sm:$0xff] %v8089_v57  ;;  %v9489_v9 = vmax.f32 %v8092_v52, 0.0  ;;  %v3731_v0 = vpop.f32.mrb[168].mxu1 }
 0x3de   : > { %v8103_v59 = vmax.f32 %v9484_v4, %v9485_v13  ;;  %v8106_v18 = vadd.f32 %v3731_v0, %v6530_v44  ;;  %v3733_v5 = vpop.f32.mrb[169].mxu1  ;;  %5011 = vmatmul.mubr.msk.f32.gmra.mrb[70].mxu0 %vm1968_vm2, %v9748_v51  ;;  %v9759_v13 = vmax.f32 %v7856_v56, 0.0 }
 0x3df   : > { %v8114_v50 = vmax.f32 %v9488_v49, %v9489_v9  ;;  %v8117_v8 = vadd.f32 %v3733_v5, %v6530_v44  ;;  %2666 = vmatprep.mubr.f32.mxu0 %v9649_v30 }
 0x3e0   : > { %9746 = vst [vmem:[#allocation64_spill] sm:$0xff] %v8103_v59  ;;  %9747 = vst [vmem:[#allocation65_spill] sm:$0xff] %v8106_v18  ;;  %v9494_v51 = vmax.f32 %v8106_v18, 0.0 }
 0x3e1   : > { %9749 = vst [vmem:[#allocation31_spill] sm:$0xff] %v8114_v50  ;;  %9750 = vst [vmem:[#allocation66_spill] sm:$0xff] %v8117_v8  ;;  %v3737_v0 = vpop.f32.mrb[170].mxu1  ;;  %v9758_v57 = vmax.f32 %v8117_v8, 0.0 }
 0x3e2   : > { %v8126_v26 = vadd.f32 %v3737_v0, %v9710_v60  ;;  %v3739_v41 = vpop.f32.mrb[171].mxu1  ;;  %5012 = vmatmul.mubr.msk.f32.gmra.mrb[72].mxu0 %vm1968_vm2, %v7351_v29  ;;  %v9753_v0 = vmax.f32 %v7853_v36, 0.0  ;;  %v9755_v29 = vmax.f32 %v7877_v6, 0.0 }
 0x3e3   : > { %v8132_v49 = vadd.f32 %v3739_v41, %v9710_v60  ;;  %2772 = vmatprep.mubr.f32.mxu0 %v9649_v30  ;;  %v8156_v50 = vmax.f32 %v9759_v13, %v9758_v57 }
 0x3e4   : > { %9751 = vst [vmem:[#allocation67_spill] sm:$0xff] %v8126_v26  ;;  %v9495_v4 = vmax.f32 %v8126_v26, 0.0  ;;  %v8141_v45 = vmax.f32 %v9753_v0, %v9494_v51  ;;  %v9762_v0 = vmax.f32 %v7886_v35, 0.0 }
 0x3e5   : > { %9752 = vst [vmem:[#allocation68_spill] sm:$0xff] %v8132_v49  ;;  %v3743_v9 = vpop.f32.mrb[172].mxu1  ;;  %9760 = vst [vmem:[#allocation72_spill] sm:$0xff] %v8156_v50  ;;  %v9761_v36 = vmax.f32 %v8132_v49, 0.0 }
 0x3e6   : > { %9754 = vst [vmem:[#allocation69_spill] sm:$0xff] %v8141_v45  ;;  %v8147_v5 = vmax.f32 %v9755_v29, %v9495_v4  ;;  %v8150_v41 = vadd.f32 %v3743_v9, %v6560_v2  ;;  %v3745_v59 = vpop.f32.mrb[173].mxu1  ;;  %v9767_v4 = vmax.f32 %v7906_v34, 0.0 }
 0x3e7   : > { %v8162_v51 = vmax.f32 %v9762_v0, %v9761_v36  ;;  %v8165_v6 = vadd.f32 %v3745_v59, %v6560_v2  ;;  %v9773_v0 = vmax.f32 %v7917_v21, 0.0 }
 0x3e8   : > { %9756 = vst [vmem:[#allocation70_spill] sm:$0xff] %v8147_v5  ;;  %9757 = vst [vmem:[#allocation71_spill] sm:$0xff] %v8150_v41  ;;  %v9500_v56 = vmax.f32 %v8150_v41, 0.0 }
 0x3e9   : > { %9763 = vst [vmem:[#allocation73_spill] sm:$0xff] %v8162_v51  ;;  %9764 = vst [vmem:[#allocation74_spill] sm:$0xff] %v8165_v6  ;;  %v3749_v29 = vpop.f32.mrb[174].mxu1  ;;  %v9772_v26 = vmax.f32 %v8165_v6, 0.0 }
 0x3ea   : > { %v8173_v57 = vadd.f32 %v3749_v29, %v6582_v63  ;;  %v3751_v13 = vpop.f32.mrb[175].mxu1  ;;  %v8185_v49 = vmax.f32 %v9767_v4, %v9500_v56  ;;  %v9769_v29 = vmax.f32 %v7941_v61, 0.0  ;;  %v9776_v4 = vmax.f32 %v7952_v37, 0.0 }
 0x3eb   : > { %v8177_v36 = vadd.f32 %v3751_v13, %v6582_v63  ;;  %v8200_v18 = vmax.f32 %v9773_v0, %v9772_v26 }
 0x3ec   : > { %9765 = vst [vmem:[#allocation75_spill] sm:$0xff] %v8173_v57  ;;  %v9501_v59 = vmax.f32 %v8173_v57, 0.0  ;;  %9768 = vst [vmem:[#allocation77_spill] sm:$0xff] %v8185_v49 }
 0x3ed   : > { %9766 = vst [vmem:[#allocation76_spill] sm:$0xff] %v8177_v36  ;;  %v3755_v9 = vpop.f32.mrb[176].mxu1  ;;  %9774 = vst [vmem:[#allocation80_spill] sm:$0xff] %v8200_v18  ;;  %v9775_v34 = vmax.f32 %v8177_v36, 0.0 }
 0x3ee   : > { %v8191_v8 = vmax.f32 %v9769_v29, %v9501_v59  ;;  %v8194_v13 = vadd.f32 %v3755_v9, %v6601_v17  ;;  %v3757_v35 = vpop.f32.mrb[177].mxu1  ;;  %v9781_v59 = vmax.f32 %v7974_v15, 0.0 }
 0x3ef   : > { %v8206_v56 = vmax.f32 %v9776_v4, %v9775_v34  ;;  %v8209_v61 = vadd.f32 %v3757_v35, %v6601_v17  ;;  %v9787_v4 = vmax.f32 %v7985_v32, 0.0 }
 0x3f0   : > { %9770 = vst [vmem:[#allocation78_spill] sm:$0xff] %v8191_v8  ;;  %9771 = vst [vmem:[#allocation79_spill] sm:$0xff] %v8194_v13  ;;  %v9506_v21 = vmax.f32 %v8194_v13, 0.0 }
 0x3f1   : > { %9777 = vst [vmem:[#allocation81_spill] sm:$0xff] %v8206_v56  ;;  %9778 = vst [vmem:[#allocation82_spill] sm:$0xff] %v8209_v61  ;;  %v3761_v29 = vpop.f32.mrb[178].mxu1  ;;  %v9786_v57 = vmax.f32 %v8209_v61, 0.0 }
 0x3f2   : > { %v8217_v26 = vadd.f32 %v3761_v29, %v6629_v27  ;;  %v3763_v0 = vpop.f32.mrb[179].mxu1  ;;  %v8229_v36 = vmax.f32 %v9781_v59, %v9506_v21  ;;  %v9783_v29 = vmax.f32 %v8011_v22, 0.0  ;;  %v9790_v59 = vmax.f32 %v8022_v39, 0.0 }
 0x3f3   : > { %v8221_v34 = vadd.f32 %v3763_v0, %v6629_v27  ;;  %v8244_v41 = vmax.f32 %v9787_v4, %v9786_v57 }
 0x3f4   : > { %9779 = vst [vmem:[#allocation83_spill] sm:$0xff] %v8217_v26  ;;  %v9507_v35 = vmax.f32 %v8217_v26, 0.0  ;;  %9782 = vst [vmem:[#allocation85_spill] sm:$0xff] %v8229_v36  ;;  %v9800_v26 = vmax.f32 %v8055_v12, 0.0 }
 0x3f5   : > { %9780 = vst [vmem:[#allocation84_spill] sm:$0xff] %v8221_v34  ;;  %v3767_v9 = vpop.f32.mrb[180].mxu1  ;;  %9788 = vst [vmem:[#allocation88_spill] sm:$0xff] %v8244_v41  ;;  %v9789_v15 = vmax.f32 %v8221_v34, 0.0 }
 0x3f6   : > { %v8235_v6 = vmax.f32 %v9783_v29, %v9507_v35  ;;  %v8238_v0 = vadd.f32 %v3767_v9, %v6637_v33  ;;  %v3769_v37 = vpop.f32.mrb[181].mxu1  ;;  %v9795_v35 = vmax.f32 %v8044_v40, 0.0 }
 0x3f7   : > { %v8250_v21 = vmax.f32 %v9790_v59, %v9789_v15  ;;  %v8253_v22 = vadd.f32 %v3769_v37, %v6637_v33 }
 0x3f8   : > { %9784 = vst [vmem:[#allocation86_spill] sm:$0xff] %v8235_v6  ;;  %9785 = vst [vmem:[#allocation87_spill] sm:$0xff] %v8238_v0  ;;  %v9513_v32 = vmax.f32 %v8238_v0, 0.0  ;;  %v9802_v0 = vmax.f32 %v8092_v52, 0.0 }
 0x3f9   : > { %9791 = vst [vmem:[#allocation89_spill] sm:$0xff] %v8250_v21  ;;  %9792 = vst [vmem:[#allocation90_spill] sm:$0xff] %v8253_v22  ;;  %v3773_v29 = vpop.f32.mrb[182].mxu1 }
 0x3fa   : > { %v8261_v57 = vadd.f32 %v3773_v29, %v6663_v47  ;;  %v3775_v4 = vpop.f32.mrb[183].mxu1  ;;  %v8273_v34 = vmax.f32 %v9795_v35, %v9513_v32  ;;  %v9797_v29 = vmax.f32 %v8081_v23, 0.0 }
 0x3fb   : > { %v8265_v15 = vadd.f32 %v3775_v4, %v6663_v47  ;;  %v9799_v4 = vmax.f32 %v8253_v22, 0.0 }
 0x3fc   : > { %9793 = vst [vmem:[#allocation91_spill] sm:$0xff] %v8261_v57  ;;  %v9514_v37 = vmax.f32 %v8261_v57, 0.0  ;;  %9796 = vst [vmem:[#allocation93_spill] sm:$0xff] %v8273_v34 }
 0x3fd   : > { %9794 = vst [vmem:[#allocation92_spill] sm:$0xff] %v8265_v15  ;;  %v9519_v59 = vmax.f32 %v8265_v15, 0.0  ;;  %v4173_v9 = vpop.f32.mrb[184].mxu1  ;;  %v8285_v13 = vmax.f32 %v9800_v26, %v9799_v4 }
 0x3fe   : > { %v8279_v61 = vmax.f32 %v9797_v29, %v9514_v37  ;;  %v4175_v39 = vpop.f32.mrb[185].mxu1  ;;  %v8310_v23 = vadd.f32 %v4173_v9, %v6530_v44 }
 0x3ff   : > { %9801 = vst [vmem:[#allocation95_spill] sm:$0xff] %v8285_v13  ;;  %v8291_v40 = vmax.f32 %v9802_v0, %v9519_v59  ;;  %v8313_v34 = vadd.f32 %v4175_v39, %v6530_v44 }
 0x400   : > { %9798 = vst [vmem:[#allocation94_spill] sm:$0xff] %v8279_v61  ;;  %9804 = vst [vmem:[#allocation97_spill] sm:$0xff] %v8310_v23  ;;  %v9533_v41 = vmax.f32 %v8310_v23, 0.0 }
 0x401   : > { %9803 = vst [vmem:[#allocation96_spill] sm:$0xff] %v8291_v40  ;;  %v4179_v32 = vpop.f32.mrb[186].mxu1  ;;  %9805 = vst [vmem:[#allocation98_spill] sm:$0xff] %v8313_v34  ;;  %v9537_v9 = vmax.f32 %v8313_v34, 0.0 }
 0x402   : > { %v4181_v29 = vpop.f32.mrb[187].mxu1  ;;  %v8323_v21 = vadd.f32 %v4179_v32, %v9710_v60 }
 0x403   : > { %v8328_v39 = vadd.f32 %v4181_v29, %v9710_v60 }
 0x404   : > { %9806 = vst [vmem:[#allocation99_spill] sm:$0xff] %v8323_v21  ;;  %v9541_v45 = vmax.f32 %v8323_v21, 0.0 }
 0x405   : > { %v4185_v37 = vpop.f32.mrb[188].mxu1  ;;  %9807 = vst [vmem:[#allocation100_spill] sm:$0xff] %v8328_v39 }
 0x406   : > { %v4187_v22 = vpop.f32.mrb[189].mxu1  ;;  %v8351_v5 = vadd.f32 %v4185_v37, %v6560_v2 }
 0x408   : > { %9810 = vst [vmem:[#allocation103_spill] sm:$0xff] %v8351_v5  ;;  %v9549_v50 = vmax.f32 %v8351_v5, 0.0 }
 0x409   : > { %v4191_v57 = vpop.f32.mrb[190].mxu1 }
 0x40a   : > { %v4193_v12 = vpop.f32.mrb[191].mxu1  ;;  %v8379_v51 = vadd.f32 %v4191_v57, %v6582_v63 }
 0x40b   : > { %v8386_v21 = vadd.f32 %v4193_v12, %v6582_v63 }
 0x40c   : > { %9814 = vst [vmem:[#allocation107_spill] sm:$0xff] %v8379_v51 }
 0x40d   : > { %v4197_v26 = vpop.f32.mrb[192].mxu1  ;;  %9815 = vst [vmem:[#allocation108_spill] sm:$0xff] %v8386_v21 }
 0x40e   : > { %v4199_v4 = vpop.f32.mrb[193].mxu1 }
 0x411   : > { %v8297_v36 = vpop.f32.mrb[194].mxu1 }
 0x412   : > { %v8299_v15 = vpop.f32.mrb[195].mxu1 }
 0x415   : > { %v8301_v52 = vpop.f32.mrb[196].mxu1 }
 0x416   : > { %v8303_v0 = vpop.f32.mrb[197].mxu1 }
 0x419   : > { %v8305_v59 = vpop.f32.mrb[198].mxu1 }
 0x41a   : > { %v8307_v35 = vpop.f32.mrb[199].mxu1 }
 0x41d   : > { %v4394_v61 = vpop.f32.mrb[200].mxu1 }
 0x41e   : > { %v8316_v13 = vadd.f32 %v4394_v61, %v6530_v44  ;;  %v4396_v40 = vpop.f32.mrb[201].mxu1 }
 0x41f   : > { %v8319_v6 = vadd.f32 %v4396_v40, %v6530_v44 }
 0x420   : > { %v9534_v49 = vmax.f32 %v8316_v13, 0.0 }
 0x421   : > { %v9538_v8 = vmax.f32 %v8319_v6, 0.0  ;;  %v4400_v61 = vpop.f32.mrb[202].mxu1 }
 0x422   : > { %v8335_v40 = vmax.f32 %v9533_v41, %v9534_v49  ;;  %v8338_v18 = vadd.f32 %v4400_v61, %v9710_v60  ;;  %v4402_v32 = vpop.f32.mrb[203].mxu1  ;;  %v9544_v61 = vmax.f32 %v8328_v39, 0.0  ;;  %v8356_v49 = vadd.f32 %v4187_v22, %v6560_v2 }
 0x423   : > { %v8344_v56 = vmax.f32 %v9537_v9, %v9538_v8  ;;  %v8347_v29 = vadd.f32 %v4402_v32, %v9710_v60 }
 0x424   : > { %9808 = vst [vmem:[#allocation101_spill] sm:$0xff] %v8335_v40  ;;  %v9542_v41 = vmax.f32 %v8338_v18, 0.0  ;;  %9811 = vst [vmem:[#allocation104_spill] sm:$0xff] %v8356_v49 }
 0x425   : > { %9809 = vst [vmem:[#allocation102_spill] sm:$0xff] %v8344_v56  ;;  %v9545_v23 = vmax.f32 %v8347_v29, 0.0  ;;  %v4406_v34 = vpop.f32.mrb[204].mxu1  ;;  %v8411_v56 = vadd.f32 %v4197_v26, %v6601_v17 }
 0x426   : > { %v8363_v32 = vmax.f32 %v9541_v45, %v9542_v41  ;;  %v8366_v9 = vadd.f32 %v4406_v34, %v6560_v2  ;;  %v4408_v37 = vpop.f32.mrb[205].mxu1  ;;  %v9553_v41 = vmax.f32 %v8356_v49, 0.0 }
 0x427   : > { %v8372_v8 = vmax.f32 %v9544_v61, %v9545_v23  ;;  %v8375_v22 = vadd.f32 %v4408_v37, %v6560_v2  ;;  %v9557_v37 = vmax.f32 %v8379_v51, 0.0  ;;  %9818 = vst [vmem:[#allocation111_spill] sm:$0xff] %v8411_v56  ;;  %v8440_v51 = vadd.f32 %v8297_v36, %v6629_v27 }
 0x428   : > { %9812 = vst [vmem:[#allocation105_spill] sm:$0xff] %v8363_v32  ;;  %v9550_v34 = vmax.f32 %v8366_v9, 0.0  ;;  %v9824_v36 = vmax.f32 %v8411_v56, 0.0 }
 0x429   : > { %9813 = vst [vmem:[#allocation106_spill] sm:$0xff] %v8372_v8  ;;  %v9554_v61 = vmax.f32 %v8375_v22, 0.0  ;;  %v4412_v23 = vpop.f32.mrb[206].mxu1  ;;  %9822 = vst [vmem:[#allocation115_spill] sm:$0xff] %v8440_v51  ;;  %v9571_v5 = vmax.f32 %v8440_v51, 0.0  ;;  %v8504_v51 = vadd.f32 %v8305_v59, %v6663_v47 }
 0x42a   : > { %v8395_v57 = vmax.f32 %v9549_v50, %v9550_v34  ;;  %v8398_v45 = vadd.f32 %v4412_v23, %v6582_v63  ;;  %v4414_v40 = vpop.f32.mrb[207].mxu1  ;;  %v9559_v23 = vmax.f32 %v8386_v21, 0.0  ;;  %v8416_v34 = vadd.f32 %v4199_v4, %v6601_v17 }
 0x42b   : > { %v8404_v12 = vmax.f32 %v9553_v41, %v9554_v61  ;;  %v8407_v32 = vadd.f32 %v4414_v40, %v6582_v63  ;;  %9832 = vst [vmem:[#allocation123_spill] sm:$0xff] %v8504_v51  ;;  %v9587_v56 = vmax.f32 %v8504_v51, 0.0 }
 0x42c   : > { %9816 = vst [vmem:[#allocation109_spill] sm:$0xff] %v8395_v57  ;;  %v9558_v50 = vmax.f32 %v8398_v45, 0.0  ;;  %9819 = vst [vmem:[#allocation112_spill] sm:$0xff] %v8416_v34 }
 0x42d   : > { %9817 = vst [vmem:[#allocation110_spill] sm:$0xff] %v8404_v12  ;;  %v9560_v8 = vmax.f32 %v8407_v32, 0.0  ;;  %v4418_v49 = vpop.f32.mrb[208].mxu1  ;;  %v8474_v12 = vadd.f32 %v8301_v52, %v6637_v33 }
 0x42e   : > { %v8423_v40 = vmax.f32 %v9557_v37, %v9558_v50  ;;  %v8426_v41 = vadd.f32 %v4418_v49, %v6601_v17  ;;  %v4420_v26 = vpop.f32.mrb[209].mxu1 }
 0x42f   : > { %v8432_v61 = vmax.f32 %v9559_v23, %v9560_v8  ;;  %v8435_v4 = vadd.f32 %v4420_v26, %v6601_v17  ;;  %v8448_v23 = vadd.f32 %v8299_v15, %v6629_v27  ;;  %v9826_v15 = vmax.f32 %v8416_v34, 0.0  ;;  %9828 = vst [vmem:[#allocation119_spill] sm:$0xff] %v8474_v12 }
 0x430   : > { %9820 = vst [vmem:[#allocation113_spill] sm:$0xff] %v8423_v40  ;;  %v9565_v37 = vmax.f32 %v8426_v41, 0.0  ;;  %v9834_v59 = vmax.f32 %v8474_v12, 0.0 }
 0x431   : > { %9821 = vst [vmem:[#allocation114_spill] sm:$0xff] %v8432_v61  ;;  %9823 = vst [vmem:[#allocation116_spill] sm:$0xff] %v8448_v23  ;;  %v9566_v26 = vmax.f32 %v8435_v4, 0.0  ;;  %v4424_v8 = vpop.f32.mrb[210].mxu1 }
 0x432   : > { %v8457_v21 = vmax.f32 %v9824_v36, %v9565_v37  ;;  %v8460_v49 = vadd.f32 %v4424_v8, %v6629_v27  ;;  %v4426_v50 = vpop.f32.mrb[211].mxu1  ;;  %v9573_v8 = vmax.f32 %v8448_v23, 0.0  ;;  %v8480_v37 = vadd.f32 %v8303_v0, %v6637_v33 }
 0x433   : > { %v8466_v57 = vmax.f32 %v9826_v15, %v9566_v26  ;;  %v8469_v40 = vadd.f32 %v4426_v50, %v6629_v27 }
 0x434   : > { %9825 = vst [vmem:[#allocation117_spill] sm:$0xff] %v8457_v21  ;;  %v9572_v36 = vmax.f32 %v8460_v49, 0.0  ;;  %9829 = vst [vmem:[#allocation120_spill] sm:$0xff] %v8480_v37 }
 0x435   : > { %9827 = vst [vmem:[#allocation118_spill] sm:$0xff] %v8466_v57  ;;  %v9574_v15 = vmax.f32 %v8469_v40, 0.0  ;;  %v4430_v26 = vpop.f32.mrb[212].mxu1 }
 0x436   : > { %v8487_v50 = vmax.f32 %v9571_v5, %v9572_v36  ;;  %v8490_v52 = vadd.f32 %v4430_v26, %v6637_v33  ;;  %v4432_v61 = vpop.f32.mrb[213].mxu1 }
 0x437   : > { %v8496_v34 = vmax.f32 %v9573_v8, %v9574_v15  ;;  %v8499_v0 = vadd.f32 %v4432_v61, %v6637_v33  ;;  %v8512_v8 = vadd.f32 %v8307_v35, %v6663_v47  ;;  %v9836_v35 = vmax.f32 %v8480_v37, 0.0 }
 0x438   : > { %9830 = vst [vmem:[#allocation121_spill] sm:$0xff] %v8487_v50  ;;  %v9579_v5 = vmax.f32 %v8490_v52, 0.0 }
 0x439   : > { %9831 = vst [vmem:[#allocation122_spill] sm:$0xff] %v8496_v34  ;;  %9833 = vst [vmem:[#allocation124_spill] sm:$0xff] %v8512_v8  ;;  %v9581_v61 = vmax.f32 %v8499_v0, 0.0  ;;  %v4436_v15 = vpop.f32.mrb[214].mxu1 }
 0x43a   : > { %v8521_v23 = vmax.f32 %v9834_v59, %v9579_v5  ;;  %v8524_v26 = vadd.f32 %v4436_v15, %v6663_v47  ;;  %v4438_v36 = vpop.f32.mrb[215].mxu1  ;;  %v9591_v59 = vmax.f32 %v8512_v8, 0.0 }
 0x43b   : > { %v8530_v21 = vmax.f32 %v9836_v35, %v9581_v61  ;;  %v8533_v50 = vadd.f32 %v4438_v36, %v6663_v47 }
 0x43c   : > { %9835 = vst [vmem:[#allocation125_spill] sm:$0xff] %v8521_v23  ;;  %v9588_v57 = vmax.f32 %v8524_v26, 0.0  ;;  %v9844_v23 = vmax.f32 %v8338_v18, 0.0 }
 0x43d   : > { %9837 = vst [vmem:[#allocation126_spill] sm:$0xff] %v8530_v21  ;;  %v9592_v5 = vmax.f32 %v8533_v50, 0.0  ;;  %v4615_v15 = vpop.f32.mrb[216].mxu1  ;;  %v9906_v21 = vmax.f32 %v7731_v20, 0.0  ;;  %v9910_v20 = vld [vmem:[#allocation49_spill] sm:$0xff] }
 0x43e   : > { %v8543_v34 = vmax.f32 %v9587_v56, %v9588_v57  ;;  %v4616_v35 = vadd.f32 %v4615_v15, %v6530_v44  ;;  %v4617_v61 = vpop.f32.mrb[217].mxu1  ;;  %v9840_v15 = vmax.f32 %v8316_v13, 0.0 }
 0x43f   : > { %v8550_v36 = vmax.f32 %v9591_v59, %v9592_v5  ;;  %v4618_v37 = vadd.f32 %v4617_v61, %v6530_v44  ;;  %v9842_v59 = vmax.f32 %v8319_v6, 0.0 }
 0x440   : > { %9838 = vst [vmem:[#allocation127_spill] sm:$0xff] %v8543_v34  ;;  %v4662_v39 = vmax.f32 %v4616_v35, 0.0 }
 0x441   : > { %9839 = vst [vmem:[#allocation128_spill] sm:$0xff] %v8550_v36  ;;  %v4663_v38 = vmax.f32 %v4618_v37, 0.0  ;;  %v4621_v25 = vpop.f32.mrb[218].mxu1 }
 0x442   : > { %v8559_v57 = vmax.f32 %v9840_v15, %v4662_v39  ;;  %v4622_v51 = vadd.f32 %v4621_v25, %v9710_v60  ;;  %v4623_v8 = vpop.f32.mrb[219].mxu1  ;;  %v9846_v15 = vmax.f32 %v8347_v29, 0.0 }
 0x443   : > { %v8564_v5 = vmax.f32 %v9842_v59, %v4663_v38  ;;  %v4624_v61 = vadd.f32 %v4623_v8, %v9710_v60  ;;  %v9852_v38 = vmax.f32 %v8398_v45, 0.0 }
 0x444   : > { %9841 = vst [vmem:[#allocation129_spill] sm:$0xff] %v8559_v57  ;;  %v4664_v12 = vmax.f32 %v4622_v51, 0.0 }
 0x445   : > { %9843 = vst [vmem:[#allocation130_spill] sm:$0xff] %v8564_v5  ;;  %v4665_v35 = vmax.f32 %v4624_v61, 0.0  ;;  %v4627_v37 = vpop.f32.mrb[220].mxu1  ;;  %v9902_v5 = vmax.f32 %v7719_v53, 0.0 }
 0x446   : > { %v8569_v34 = vmax.f32 %v9844_v23, %v4664_v12  ;;  %v4628_v13 = vadd.f32 %v4627_v37, %v6560_v2  ;;  %v4629_v39 = vpop.f32.mrb[221].mxu1  ;;  %v9848_v12 = vmax.f32 %v8366_v9, 0.0 }
 0x447   : > { %v8574_v25 = vmax.f32 %v9846_v15, %v4665_v35  ;;  %v4630_v6 = vadd.f32 %v4629_v39, %v6560_v2  ;;  %v9850_v35 = vmax.f32 %v8375_v22, 0.0 }
 0x448   : > { %9845 = vst [vmem:[#allocation131_spill] sm:$0xff] %v8569_v34  ;;  %v4666_v8 = vmax.f32 %v4628_v13, 0.0 }
 0x449   : > { %9847 = vst [vmem:[#allocation132_spill] sm:$0xff] %v8574_v25  ;;  %v4667_v51 = vmax.f32 %v4630_v6, 0.0  ;;  %v4633_v59 = vpop.f32.mrb[222].mxu1 }
 0x44a   : > { %v8583_v23 = vmax.f32 %v9848_v12, %v4666_v8  ;;  %v4634_v61 = vadd.f32 %v4633_v59, %v6582_v63  ;;  %v4635_v29 = vpop.f32.mrb[223].mxu1  ;;  %v9854_v12 = vmax.f32 %v8407_v32, 0.0 }
 0x44b   : > { %v8588_v37 = vmax.f32 %v9850_v35, %v4667_v51  ;;  %v4636_v39 = vadd.f32 %v4635_v29, %v6582_v63  ;;  %v9860_v51 = vmax.f32 %v8460_v49, 0.0  ;;  %v9870_v49 = vmax.f32 %v8533_v50, 0.0 }
 0x44c   : > { %9849 = vst [vmem:[#allocation133_spill] sm:$0xff] %v8583_v23  ;;  %v4668_v15 = vmax.f32 %v4634_v61, 0.0 }
 0x44d   : > { %9851 = vst [vmem:[#allocation134_spill] sm:$0xff] %v8588_v37  ;;  %v4669_v13 = vmax.f32 %v4636_v39, 0.0  ;;  %v4639_v6 = vpop.f32.mrb[224].mxu1  ;;  %v9892_v37 = vld [vmem:[#allocation40_spill] sm:$0xff] }
 0x44e   : > { %v8593_v56 = vmax.f32 %v9852_v38, %v4668_v15  ;;  %v4640_v9 = vadd.f32 %v4639_v6, %v6601_v17  ;;  %v4641_v8 = vpop.f32.mrb[225].mxu1  ;;  %v9856_v38 = vmax.f32 %v8426_v41, 0.0 }
 0x44f   : > { %v8598_v59 = vmax.f32 %v9854_v12, %v4669_v13  ;;  %v4642_v22 = vadd.f32 %v4641_v8, %v6601_v17  ;;  %v9858_v13 = vmax.f32 %v8435_v4, 0.0 }
 0x450   : > { %9853 = vst [vmem:[#allocation135_spill] sm:$0xff] %v8593_v56  ;;  %v4670_v29 = vmax.f32 %v4640_v9, 0.0 }
 0x451   : > { %9855 = vst [vmem:[#allocation136_spill] sm:$0xff] %v8598_v59  ;;  %v4671_v61 = vmax.f32 %v4642_v22, 0.0  ;;  %v4645_v35 = vpop.f32.mrb[226].mxu1 }
 0x452   : > { %v8607_v39 = vmax.f32 %v9856_v38, %v4670_v29  ;;  %v4646_v15 = vadd.f32 %v4645_v35, %v6629_v27  ;;  %v4647_v32 = vpop.f32.mrb[227].mxu1  ;;  %v9862_v38 = vmax.f32 %v8469_v40, 0.0 }
 0x453   : > { %v8612_v6 = vmax.f32 %v9858_v13, %v4671_v61  ;;  %v4648_v8 = vadd.f32 %v4647_v32, %v6629_v27 }
 0x454   : > { %9857 = vst [vmem:[#allocation137_spill] sm:$0xff] %v8607_v39  ;;  %v4672_v12 = vmax.f32 %v4646_v15, 0.0 }
 0x455   : > { %9859 = vst [vmem:[#allocation138_spill] sm:$0xff] %v8612_v6  ;;  %v4673_v9 = vmax.f32 %v4648_v8, 0.0  ;;  %v4651_v22 = vpop.f32.mrb[228].mxu1 }
 0x456   : > { %v8617_v18 = vmax.f32 %v9860_v51, %v4672_v12  ;;  %v4652_v41 = vadd.f32 %v4651_v22, %v6637_v33  ;;  %v4653_v29 = vpop.f32.mrb[229].mxu1  ;;  %v9864_v51 = vmax.f32 %v8490_v52, 0.0 }
 0x457   : > { %v8622_v35 = vmax.f32 %v9862_v38, %v4673_v9  ;;  %v4654_v4 = vadd.f32 %v4653_v29, %v6637_v33  ;;  %v9866_v9 = vmax.f32 %v8499_v0, 0.0 }
 0x458   : > { %9861 = vst [vmem:[#allocation139_spill] sm:$0xff] %v8617_v18  ;;  %v4674_v32 = vmax.f32 %v4652_v41, 0.0  ;;  %v9881_v18 = vld [vmem:[#allocation36_spill] sm:$0xff] }
 0x459   : > { %9863 = vst [vmem:[#allocation140_spill] sm:$0xff] %v8622_v35  ;;  %v4675_v15 = vmax.f32 %v4654_v4, 0.0  ;;  %v4657_v13 = vpop.f32.mrb[230].mxu1  ;;  %v9868_v4 = vmax.f32 %v8524_v26, 0.0  ;;  %v9873_v26 = vld [vmem:[#allocation34_spill] sm:$0xff] }
 0x45a   : > { %v8631_v8 = vmax.f32 %v9864_v51, %v4674_v32  ;;  %v4658_v12 = vadd.f32 %v4657_v13, %v6663_v47  ;;  %v4659_v40 = vpop.f32.mrb[231].mxu1 }
 0x45b   : > { %v8636_v22 = vmax.f32 %v9866_v9, %v4675_v15  ;;  %v4660_v29 = vadd.f32 %v4659_v40, %v6663_v47  ;;  %v8658_v9 = vadd.f32 %v9873_v26, %v6530_v44 }
 0x45c   : > { %9865 = vst [vmem:[#allocation141_spill] sm:$0xff] %v8631_v8  ;;  %v4676_v38 = vmax.f32 %v4658_v12, 0.0  ;;  %v9872_v12 = vld [vmem:[#allocation32_spill] sm:$0xff] }
 0x45d   : > { %9867 = vst [vmem:[#allocation142_spill] sm:$0xff] %v8636_v22  ;;  %v4677_v41 = vmax.f32 %v4660_v29, 0.0  ;;  %v8654_v40 = vadd.f32 %v9872_v12, %v6530_v44 }
 0x45e   : > { %v8641_v61 = vmax.f32 %v9868_v4, %v4676_v38  ;;  %v9875_v38 = vld [vmem:[#allocation37_spill] sm:$0xff] }
 0x45f   : > { %v8645_v52 = vmax.f32 %v9870_v49, %v4677_v41  ;;  %v9874_v49 = vld [vmem:[#allocation35_spill] sm:$0xff]  ;;  %v8667_v41 = vadd.f32 %v9875_v38, %v9710_v60  ;;  %v9879_v26 = vmax.f32 %v8654_v40, 0.0 }
 0x460   : > { %9869 = vst [vmem:[#allocation143_spill] sm:$0xff] %v8641_v61  ;;  %v8663_v29 = vadd.f32 %v9874_v49, %v9710_v60  ;;  %v9876_v61 = vld [vmem:[#allocation38_spill] sm:$0xff]  ;;  %v9880_v49 = vmax.f32 %v7627_v54, 0.0 }
 0x461   : > { %9871 = vst [vmem:[#allocation144_spill] sm:$0xff] %v8645_v52  ;;  %v8677_v38 = vadd.f32 %v9876_v61, %v6560_v2  ;;  %v9882_v61 = vmax.f32 %v9881_v18, 0.0  ;;  %v9886_v54 = vmax.f32 %v8667_v41, 0.0 }
 0x499   : > { %v2626_v15 = vpop.f32.mrb[58].mxu0 }
 0x49a   : > { %v2627_v13 = vadd.f32 %v2626_v15, %v6530_v44  ;;  %v2628_v51 = vpop.f32.mrb[59].mxu0 }
 0x49b   : > { %v2629_v50 = vadd.f32 %v2628_v51, %v6530_v44 }
 0x49c   : > { %v2673_v4 = vmax.f32 %v2627_v13, 0.0 }
 0x49d   : > { %v2632_v15 = vpop.f32.mrb[60].mxu0  ;;  %v2674_v32 = vmax.f32 %v2629_v50, 0.0  ;;  %v8681_v50 = vadd.f32 %v7666_v58, %v6560_v2 }
 0x49e   : > { %v2633_v12 = vadd.f32 %v2632_v15, %v9710_v60  ;;  %v2634_v0 = vpop.f32.mrb[61].mxu0  ;;  %v9877_v15 = vld [vmem:[#allocation33_spill] sm:$0xff]  ;;  %v8687_v52 = vmax.f32 %v2673_v4, %v9879_v26 }
 0x49f   : > { %v2635_v51 = vadd.f32 %v2634_v0, %v9710_v60  ;;  %v9878_v22 = vmax.f32 %v9877_v15, 0.0  ;;  %v2690_v39 = vmax.f32 %v9880_v49, %v2674_v32  ;;  %v8711_v49 = vadd.f32 %v7681_v14, %v6582_v63 }
 0x4a0   : > { %v2675_v13 = vmax.f32 %v2633_v12, 0.0  ;;  %v9883_v12 = vmax.f32 %v8663_v29, 0.0  ;;  %v9608_v14 = vmax.f32 %v8677_v38, 0.0 }
 0x4a1   : > { %v2689_v45 = vmax.f32 %v9878_v22, %v2673_v4  ;;  %v2676_v0 = vmax.f32 %v2635_v51, 0.0  ;;  %v2638_v8 = vpop.f32.mrb[62].mxu0  ;;  %v9884_v22 = vmax.f32 %v8658_v9, 0.0  ;;  %v9885_v4 = vmax.f32 %v7646_v7, 0.0 }
 0x4a2   : > { %v2691_v6 = vmax.f32 %v9882_v61, %v2675_v13  ;;  %v8695_v35 = vmax.f32 %v2675_v13, %v9883_v12  ;;  %v2639_v58 = vadd.f32 %v2638_v8, %v6560_v2  ;;  %v2640_v15 = vpop.f32.mrb[63].mxu0  ;;  %v9887_v8 = vld [vmem:[#allocation41_spill] sm:$0xff] }
 0x4a3   : > { %v8700_v23 = vmax.f32 %v2674_v32, %v9884_v22  ;;  %v2692_v26 = vmax.f32 %v9885_v4, %v2676_v0  ;;  %v8706_v51 = vmax.f32 %v2676_v0, %v9886_v54  ;;  %v2641_v18 = vadd.f32 %v2640_v15, %v6560_v2 }
 0x4a4   : > { %v8715_v13 = vadd.f32 %v9887_v8, %v6582_v63  ;;  %v5292_v61 = vpack.c.bf16 %v2691_v6, %v2689_v45  ;;  %v2677_v7 = vmax.f32 %v2639_v58, 0.0  ;;  %v9891_v45 = vmax.f32 %v7677_v48, 0.0 }
 0x4a5   : > { %v2644_v12 = vpop.f32.mrb[64].mxu0  ;;  %v5290_v22 = vpack.c.bf16 %v2692_v26, %v2690_v39  ;;  %v2678_v4 = vmax.f32 %v2641_v18, 0.0  ;;  %v9888_v39 = vld [vmem:[#allocation42_spill] sm:$0xff]  ;;  %v9889_v18 = vld [vmem:[#allocation39_spill] sm:$0xff]  ;;  %v9893_v58 = vmax.f32 %v9892_v37, 0.0 }
 0x4a6   : > { %v2645_v15 = vadd.f32 %v2644_v12, %v6582_v63  ;;  %v2646_v54 = vpop.f32.mrb[65].mxu0  ;;  %v8729_v26 = vadd.f32 %v9888_v39, %v6601_v17  ;;  %v9890_v12 = vmax.f32 %v9889_v18, 0.0  ;;  %v8735_v0 = vmax.f32 %v2677_v7, %v9608_v14 }
 0x4a7   : > { %v2647_v56 = vadd.f32 %v2646_v54, %v6582_v63  ;;  %5291 = vmatprep.subr.bf16.mxu0 %v5290_v22  ;;  %v2694_v6 = vmax.f32 %v9891_v45, %v2678_v4  ;;  %v9897_v48 = vmax.f32 %v8715_v13, 0.0 }
 0x4a8   : > { %v2679_v8 = vmax.f32 %v2645_v15, 0.0  ;;  %5293 = vmatpush1.bf16.msra.mxu0 %v5292_v61  ;;  %v2693_v32 = vmax.f32 %v9890_v12, %v2677_v7  ;;  %v9894_v61 = vmax.f32 %v8711_v49, 0.0  ;;  %v9895_v12 = vmax.f32 %v8681_v50, 0.0 }
 0x4a9   : > { %v2680_v22 = vmax.f32 %v2647_v56, 0.0  ;;  %v2650_v54 = vpop.f32.mrb[66].mxu0  ;;  %v9896_v56 = vmax.f32 %v7691_v3, 0.0  ;;  %v8769_v3 = vadd.f32 %v7727_v1, %v6629_v27 }
 0x4aa   : > { %v2695_v15 = vmax.f32 %v9893_v58, %v2679_v8  ;;  %v8743_v59 = vmax.f32 %v2679_v8, %v9894_v61  ;;  %v2651_v39 = vadd.f32 %v2650_v54, %v6601_v17  ;;  %v2652_v18 = vpop.f32.mrb[67].mxu0  ;;  %v8748_v57 = vmax.f32 %v2678_v4, %v9895_v12  ;;  %v9898_v58 = vld [vmem:[#allocation44_spill] sm:$0xff] }
 0x4ab   : > { %v2696_v7 = vmax.f32 %v9896_v56, %v2680_v22  ;;  %v8754_v45 = vmax.f32 %v2680_v22, %v9897_v48  ;;  %v2653_v37 = vadd.f32 %v2652_v18, %v6601_v17  ;;  %v8759_v8 = vadd.f32 %v9898_v58, %v6601_v17  ;;  %9899 = vst [vmem:[#allocation32_spill] sm:$0xff] %v8769_v3 }
 0x4ac   : > { %v8763_v54 = vadd.f32 %v7721_v55, %v6629_v27  ;;  %v5296_v61 = vpack.c.bf16 %v2695_v15, %v2693_v32  ;;  %v2681_v22 = vmax.f32 %v2651_v39, 0.0  ;;  %v9613_v55 = vmax.f32 %v8729_v26, 0.0  ;;  %v9900_v39 = vld [vmem:[#allocation43_spill] sm:$0xff] }
 0x4ad   : > { %v2656_v12 = vpop.f32.mrb[68].mxu0  ;;  %v5294_v56 = vpack.c.bf16 %v2696_v7, %v2694_v6  ;;  %v2682_v48 = vmax.f32 %v2653_v37, 0.0  ;;  %v9901_v7 = vmax.f32 %v9900_v39, 0.0  ;;  %v9905_v39 = vmax.f32 %v8759_v8, 0.0 }
 0x4ae   : > { %v2657_v58 = vadd.f32 %v2656_v12, %v6629_v27  ;;  %v2658_v14 = vpop.f32.mrb[69].mxu0  ;;  %v9614_v1 = vmax.f32 %v8763_v54, 0.0  ;;  %v2918_v37 = vmax.f32 %v2681_v22, %v9613_v55 }
 0x4af   : > { %v2659_v32 = vadd.f32 %v2658_v14, %v6629_v27  ;;  %5295 = vmatprep.subr.bf16.mxu0 %v5294_v56  ;;  %v2697_v18 = vmax.f32 %v9901_v7, %v2681_v22  ;;  %v2698_v14 = vmax.f32 %v9902_v5, %v2682_v48  ;;  %v9903_v56 = vld [vmem:[#allocation45_spill] sm:$0xff]  ;;  %v2919_v7 = vmax.f32 %v2682_v48, %v9905_v39  ;;  %v9908_v5 = vld [vmem:[#allocation46_spill] sm:$0xff]  ;;  %v9909_v48 = vld [vmem:[#allocation48_spill] sm:$0xff] }
 0x4b0   : > { %v2683_v4 = vmax.f32 %v2657_v58, 0.0  ;;  %5297 = vmatpush1.bf16.msra.mxu0 %v5296_v61  ;;  %v9904_v25 = vmax.f32 %v9903_v56, 0.0  ;;  %v8807_v39 = vadd.f32 %v9909_v48, %v6637_v33 }
 0x4b1   : > { %v2684_v12 = vmax.f32 %v2659_v32, 0.0  ;;  %v2662_v34 = vpop.f32.mrb[70].mxu0  ;;  %v9907_v32 = vmax.f32 %v8769_v3, 0.0 }
 0x4b2   : > { %v2699_v15 = vmax.f32 %v9904_v25, %v2683_v4  ;;  %v2920_v58 = vmax.f32 %v2683_v4, %v9614_v1  ;;  %v2663_v61 = vadd.f32 %v2662_v34, %v6637_v33  ;;  %v2664_v6 = vpop.f32.mrb[71].mxu0  ;;  %v8799_v25 = vadd.f32 %v9908_v5, %v6637_v33 }
 0x4b3   : > { %v2700_v22 = vmax.f32 %v9906_v21, %v2684_v12  ;;  %v2921_v55 = vmax.f32 %v2684_v12, %v9907_v32  ;;  %v2665_v53 = vadd.f32 %v2664_v6, %v6637_v33  ;;  %v8803_v4 = vadd.f32 %v7761_v10, %v6663_v47 }
 0x4b4   : > { %v5300_v34 = vpack.c.bf16 %v2699_v15, %v2697_v18  ;;  %v5332_v56 = vpack.c.bf16 %v2920_v58, %v2918_v37  ;;  %v8811_v21 = vadd.f32 %v9910_v20, %v6663_v47  ;;  %v2685_v1 = vmax.f32 %v2663_v61, 0.0 }
 0x4b5   : > { %v2668_v12 = vpop.f32.mrb[72].mxu0  ;;  %v5298_v6 = vpack.c.bf16 %v2700_v22, %v2698_v14  ;;  %v5330_v32 = vpack.c.bf16 %v2921_v55, %v2919_v7  ;;  %v2686_v3 = vmax.f32 %v2665_v53, 0.0  ;;  %v9617_v18 = vmax.f32 %v8799_v25, 0.0  ;;  %v9911_v55 = vld [vmem:[#allocation47_spill] sm:$0xff] }
 0x4b6   : > { %v2669_v5 = vadd.f32 %v2668_v12, %v6663_v47  ;;  %v2670_v36 = vpop.f32.mrb[73].mxu0  ;;  %v2908_v15 = vmax.f32 %v8803_v4, 0.0  ;;  %v2907_v58 = vmax.f32 %v8807_v39, 0.0  ;;  %v2909_v48 = vmax.f32 %v8811_v21, 0.0  ;;  %v1920_v4 = vld [vmem:[%s9366_s7 + $0x20] sm:$0xff]  ;;  %v1921_v39 = vld [vmem:[%s9366_s7 + $0x28] sm:$0xff] }
 0x4b7   : > { %v2671_v10 = vadd.f32 %v2670_v36, %v6663_v47  ;;  %5299 = vmatprep.subr.bf16.mxu0 %v5298_v6  ;;  %v9912_v61 = vmax.f32 %v9911_v55, 0.0  ;;  %v2922_v22 = vmax.f32 %v2685_v1, %v9617_v18  ;;  %v9913_v36 = vmax.f32 %v7765_v62, 0.0  ;;  %v9967_v21 = vld [vmem:[#allocation25_spill] sm:$0xff] }
 0x4b8   : > { %v2687_v37 = vmax.f32 %v2669_v5, 0.0  ;;  %5301 = vmatpush1.bf16.msra.mxu0 %v5300_v34  ;;  %v9914_v12 = vmax.f32 %v7759_v31, 0.0  ;;  %v2923_v6 = vmax.f32 %v2686_v3, %v2907_v58  ;;  %v9915_v5 = vmax.f32 %v7771_v11, 0.0  ;;  %v1918_v31 = vld [vmem:[%s9366_s7 + $0x10] sm:$0xff] }
 0x4b9   : > { %v2688_v14 = vmax.f32 %v2671_v10, 0.0  ;;  %v2701_v7 = vmax.f32 %v9912_v61, %v2685_v1  ;;  %v9917_v11 = vpack.c.bf16 %v8695_v35, %v8687_v52  ;;  %v9920_v35 = vld [vmem:[#allocation10_spill] sm:$0xff]  ;;  %v9921_v52 = vld [vmem:[#allocation9_spill] sm:$0xff] }
 0x4ba   : > { %v2703_v53 = vmax.f32 %v9913_v36, %v2687_v37  ;;  %v2924_v20 = vmax.f32 %v2687_v37, %v2908_v15  ;;  %v2702_v34 = vmax.f32 %v9914_v12, %v2686_v3  ;;  %v9916_v37 = vpack.c.bf16 %v8706_v51, %v8700_v23  ;;  %v1919_v23 = vld [vmem:[%s9366_s7 + $0x18] sm:$0xff]  ;;  %v9924_v51 = vld [vmem:[#allocation14_spill] sm:$0xff] }
 0x4bb   : > { %v2704_v10 = vmax.f32 %v9915_v5, %v2688_v14  ;;  %v2925_v55 = vmax.f32 %v2688_v14, %v2909_v48  ;;  %v9918_v3 = vpack.c.bf16 %v8754_v45, %v8748_v57  ;;  %v9922_v57 = vld [vmem:[#allocation12_spill] sm:$0xff]  ;;  %v8876_v14 = vld [vmem:[%s9364_s5 + $0x8] sm:$0xff]  ;;  %v8900_v36 = vld [vmem:[%s9364_s5 + $0x20] sm:$0xff] }
 0x4bc   : > { %v5304_v61 = vpack.c.bf16 %v2703_v53, %v2701_v7  ;;  %v5336_v1 = vpack.c.bf16 %v2924_v20, %v2922_v22  ;;  %v9926_v45 = vld [vmem:[#allocation16_spill] sm:$0xff]  ;;  %v8892_v22 = vld [vmem:[%s9364_s5 + $0x18] sm:$0xff]  ;;  %v8908_v53 = vld [vmem:[%s9364_s5 + $0x28] sm:$0xff] }
 0x4bd   : > { %v5302_v18 = vpack.c.bf16 %v2704_v10, %v2702_v34  ;;  %v5334_v62 = vpack.c.bf16 %v2925_v55, %v2923_v6  ;;  %v8884_v7 = vld [vmem:[%s9364_s5 + $0x10] sm:$0xff]  ;;  %v8924_v12 = vld [vmem:[%s9364_s5 + $0x38] sm:$0xff] }
 0x4be   : > { %v8916_v20 = vld [vmem:[%s9364_s5 + $0x30] sm:$0xff] }
 0x4bf   : > { %5303 = vmatprep.subr.bf16.mxu0 %v5302_v18  ;;  %v9919_v18 = vpack.c.bf16 %v8743_v59, %v8735_v0  ;;  %v9923_v59 = vld [vmem:[#allocation11_spill] sm:$0xff]  ;;  %v9925_v0 = vld [vmem:[#allocation13_spill] sm:$0xff] }
 0x4c0   : > { %5305 = vmatpush1.bf16.msra.mxu0 %v5304_v61 }
 0x4c1   : > { %5323 = vmatprep.subr.bf16.mxu0 %v9916_v37 }
 0x4c3   : > { %5013 = vmatmul.mubr.msk.f32.vlgmr.msra.gmra.mrb[56].mxu0 %vm1968_vm2, %v1918_v31 }
 0x4c4   : > { %5325 = vmatpush1.bf16.msra.mxu0 %v9917_v11  ;;  %2993 = vmatprep.mubr.f32.mxu0 %v9649_v30 }
 0x4c5   : > { %5327 = vmatprep.subr.bf16.mxu0 %v9918_v3  ;;  %v9929_v3 = vmax.f32 %v7850_v19, 0.0 }
 0x4c8   : > { %5329 = vmatpush1.bf16.msra.mxu0 %v9919_v18 }
 0x4c9   : > { %5331 = vmatprep.subr.bf16.mxu0 %v5330_v32  ;;  %v8868_v32 = vld [vmem:[%s9364_s5] sm:$0xff] }
 0x4cc   : > { %5333 = vmatpush1.bf16.msra.mxu0 %v5332_v56  ;;  %v9927_v56 = vld [vmem:[#allocation15_spill] sm:$0xff] }
 0x4cd   : > { %5335 = vmatprep.subr.bf16.mxu0 %v5334_v62  ;;  %v9928_v62 = vmax.f32 %v7846_v42, 0.0 }
 0x4d0   : > { %5337 = vmatpush1.bf16.msra.mxu0 %v5336_v1 }
 0x4d1   : > { %5339 = vmatprep.subr.bf16.mxu0 %v9920_v35 }
 0x4d3   : > { %5022 = vmatmul.mubr.msk.f32.vlgmr.msra.gmra.mrb[56].mxu0 %vm1968_vm2, %v1919_v23 }
 0x4d4   : > { %5341 = vmatpush1.bf16.msra.mxu0 %v9921_v52  ;;  %3066 = vmatprep.mubr.f32.mxu0 %v9649_v30 }
 0x4d5   : > { %5343 = vmatprep.subr.bf16.mxu0 %v9922_v57 }
 0x4d8   : > { %5345 = vmatpush1.bf16.msra.mxu0 %v9923_v59  ;;  %v9930_v59 = vmax.f32 %v8654_v40, 0.0 }
 0x4d9   : > { %5347 = vmatprep.subr.bf16.mxu0 %v9924_v51 }
 0x4dc   : > { %5349 = vmatpush1.bf16.msra.mxu0 %v9925_v0  ;;  %v9931_v0 = vmax.f32 %v8663_v29, 0.0 }
 0x4dd   : > { %5351 = vmatprep.subr.bf16.mxu0 %v9926_v45  ;;  %v9932_v45 = vmax.f32 %v7861_v43, 0.0 }
 0x4e0   : > { %5353 = vmatpush1.bf16.msra.mxu0 %v9927_v56 }
 0x4e3   : > { %5023 = vmatmul.mubr.msk.f32.vlgmr.msra.gmra.mrb[74].mxu0 %vm1968_vm2, %v8868_v32 }
 0x4e4   : > { %3072 = vmatprep.mubr.f32.mxu0 %v9649_v30 }
 0x4e7   : > { %5024 = vmatmul.mubr.msk.f32.gmra.mrb[76].mxu0 %vm1968_vm2, %v8876_v14 }
 0x4e8   : > { %3078 = vmatprep.mubr.f32.mxu0 %v9649_v30 }
 0x4eb   : > { %5025 = vmatmul.mubr.msk.f32.gmra.mrb[78].mxu0 %vm1968_vm2, %v8884_v7 }
 0x4ec   : > { %3084 = vmatprep.mubr.f32.mxu0 %v9649_v30 }
 0x4ef   : > { %5026 = vmatmul.mubr.msk.f32.gmra.mrb[80].mxu0 %vm1968_vm2, %v8892_v22 }
 0x4f0   : > { %3090 = vmatprep.mubr.f32.mxu0 %v9649_v30 }
 0x4f3   : > { %5027 = vmatmul.mubr.msk.f32.gmra.mrb[82].mxu0 %vm1968_vm2, %v8900_v36 }
 0x4f4   : > { %3096 = vmatprep.mubr.f32.mxu0 %v9649_v30 }
 0x4f7   : > { %5028 = vmatmul.mubr.msk.f32.gmra.mrb[84].mxu0 %vm1968_vm2, %v8908_v53 }
 0x4f8   : > { %3102 = vmatprep.mubr.f32.mxu0 %v9649_v30 }
 0x4fb   : > { %5029 = vmatmul.mubr.msk.f32.gmra.mrb[86].mxu0 %vm1968_vm2, %v8916_v20 }
 0x4fc   : > { %3108 = vmatprep.mubr.f32.mxu0 %v9649_v30 }
 0x4ff   : > { %5030 = vmatmul.mubr.msk.f32.gmra.mrb[88].mxu0 %vm1968_vm2, %v8924_v12 }
 0x500   : > { %3214 = vmatprep.mubr.f32.mxu0 %v9649_v30 }
 0x5b6   : > { %v3068_v34 = vpop.f32.mrb[74].mxu0 }
 0x5b7   : > { %v3069_v6 = vadd.f32 %v3068_v34, %v6530_v44  ;;  %v3070_v5 = vpop.f32.mrb[75].mxu0 }
 0x5b8   : > { %v3071_v10 = vadd.f32 %v3070_v5, %v6530_v44 }
 0x5b9   : > { %v3115_v55 = vmax.f32 %v3069_v6, 0.0  ;;  %v9933_v6 = vmax.f32 %v8658_v9, 0.0 }
 0x5ba   : > { %v3116_v61 = vmax.f32 %v3071_v10, 0.0  ;;  %v3074_v1 = vpop.f32.mrb[76].mxu0  ;;  %v9934_v10 = vmax.f32 %v8667_v41, 0.0  ;;  %v9936_v41 = vmax.f32 %v7891_v16, 0.0  ;;  %v9939_v16 = vmax.f32 %v8711_v49, 0.0 }
 0x5bb   : > { %v8933_v31 = vmax.f32 %v3115_v55, %v9928_v62  ;;  %v3075_v37 = vadd.f32 %v3074_v1, %v9710_v60  ;;  %v3076_v11 = vpop.f32.mrb[77].mxu0  ;;  %v3131_v51 = vmax.f32 %v9930_v59, %v3115_v55  ;;  %v9935_v62 = vmax.f32 %v7867_v24, 0.0 }
 0x5bc   : > { %v8938_v18 = vmax.f32 %v3116_v61, %v9929_v3  ;;  %v3077_v23 = vadd.f32 %v3076_v11, %v9710_v60  ;;  %v3132_v5 = vmax.f32 %v9933_v6, %v3116_v61  ;;  %v9940_v6 = vmax.f32 %v7922_v46, 0.0 }
 0x5bd   : > { %v3117_v35 = vmax.f32 %v3075_v37, 0.0 }
 0x5be   : > { %v3118_v52 = vmax.f32 %v3077_v23, 0.0  ;;  %v3080_v57 = vpop.f32.mrb[78].mxu0 }
 0x5bf   : > { %v3133_v42 = vmax.f32 %v9931_v0, %v3117_v35  ;;  %v8947_v56 = vmax.f32 %v3117_v35, %v9932_v45  ;;  %v3081_v34 = vadd.f32 %v3080_v57, %v6560_v2  ;;  %v3082_v19 = vpop.f32.mrb[79].mxu0  ;;  %v9938_v45 = vmax.f32 %v8677_v38, 0.0 }
 0x5c0   : > { %v3134_v1 = vmax.f32 %v9934_v10, %v3118_v52  ;;  %v8956_v40 = vmax.f32 %v3118_v52, %v9935_v62  ;;  %v3083_v29 = vadd.f32 %v3082_v19, %v6560_v2  ;;  %v9937_v52 = vmax.f32 %v7896_v28, 0.0 }
 0x5c1   : > { %v5356_v55 = vpack.c.bf16 %v3133_v42, %v3131_v51  ;;  %v5388_v43 = vpack.c.bf16 %v8947_v56, %v8933_v31  ;;  %v3119_v37 = vmax.f32 %v3081_v34, 0.0  ;;  %v9971_v31 = vld [vmem:[#allocation6_spill] sm:$0xff]  ;;  %v9973_v56 = vld [vmem:[#allocation27_spill] sm:$0xff] }
 0x5c2   : > { %v3120_v11 = vmax.f32 %v3083_v29, 0.0  ;;  %v3086_v3 = vpop.f32.mrb[80].mxu0  ;;  %v5354_v23 = vpack.c.bf16 %v3134_v1, %v3132_v5  ;;  %v5386_v9 = vpack.c.bf16 %v8956_v40, %v8938_v18  ;;  %v9941_v1 = vmax.f32 %v8681_v50, 0.0  ;;  %v9945_v50 = vld [vmem:[#allocation52_spill] sm:$0xff]  ;;  %v9974_v40 = vld [vmem:[#allocation26_spill] sm:$0xff] }
 0x5c3   : > { %v8965_v61 = vmax.f32 %v3119_v37, %v9936_v41  ;;  %v3087_v24 = vadd.f32 %v3086_v3, %v6582_v63  ;;  %v3088_v35 = vpop.f32.mrb[81].mxu0  ;;  %v3135_v34 = vmax.f32 %v9938_v45, %v3119_v37  ;;  %v9942_v29 = vmax.f32 %v8715_v13, 0.0  ;;  %v9943_v3 = vld [vmem:[#allocation50_spill] sm:$0xff]  ;;  %v9947_v45 = vld [vmem:[#allocation53_spill] sm:$0xff] }
 0x5c4   : > { %v8970_v57 = vmax.f32 %v3120_v11, %v9937_v52  ;;  %v3089_v59 = vadd.f32 %v3088_v35, %v6582_v63  ;;  %5355 = vmatprep.subr.bf16.mxu0 %v5354_v23  ;;  %v3136_v62 = vmax.f32 %v9941_v1, %v3120_v11  ;;  %v9944_v23 = vmax.f32 %v9943_v3, 0.0  ;;  %v9951_v1 = vld [vmem:[#allocation55_spill] sm:$0xff] }
 0x5c5   : > { %v3121_v51 = vmax.f32 %v3087_v24, 0.0  ;;  %5357 = vmatpush1.bf16.msra.mxu0 %v5356_v55  ;;  %v9946_v11 = vmax.f32 %v9945_v50, 0.0 }
 0x5c6   : > { %v3122_v0 = vmax.f32 %v3089_v59, 0.0  ;;  %v3092_v42 = vpop.f32.mrb[82].mxu0 }
 0x5c7   : > { %v3137_v19 = vmax.f32 %v9939_v16, %v3121_v51  ;;  %v8979_v5 = vmax.f32 %v3121_v51, %v9940_v6  ;;  %v3093_v28 = vadd.f32 %v3092_v42, %v6601_v17  ;;  %v3094_v10 = vpop.f32.mrb[83].mxu0 }
 0x5c8   : > { %v3138_v55 = vmax.f32 %v9942_v29, %v3122_v0  ;;  %v3359_v38 = vmax.f32 %v3122_v0, %v9944_v23  ;;  %v3095_v37 = vadd.f32 %v3094_v10, %v6601_v17  ;;  %v9948_v0 = vmax.f32 %v9947_v45, 0.0 }
 0x5c9   : > { %v5360_v49 = vpack.c.bf16 %v3137_v19, %v3135_v34  ;;  %v5392_v46 = vpack.c.bf16 %v8979_v5, %v8965_v61  ;;  %v3123_v41 = vmax.f32 %v3093_v28, 0.0  ;;  %v9949_v5 = vmax.f32 %v8729_v26, 0.0 }
 0x5ca   : > { %v3124_v24 = vmax.f32 %v3095_v37, 0.0  ;;  %v3098_v35 = vpop.f32.mrb[84].mxu0  ;;  %v5358_v52 = vpack.c.bf16 %v3138_v55, %v3136_v62  ;;  %v5390_v59 = vpack.c.bf16 %v3359_v38, %v8970_v57  ;;  %v9950_v57 = vmax.f32 %v8763_v54, 0.0  ;;  %v9954_v37 = vld [vmem:[#allocation32_spill] sm:$0xff] }
 0x5cb   : > { %v3360_v51 = vmax.f32 %v3123_v41, %v9946_v11  ;;  %v3099_v13 = vadd.f32 %v3098_v35, %v6629_v27  ;;  %v3100_v42 = vpop.f32.mrb[85].mxu0  ;;  %v3139_v28 = vmax.f32 %v9949_v5, %v3123_v41  ;;  %v9952_v62 = vmax.f32 %v9951_v1, 0.0 }
 0x5cc   : > { %v3361_v16 = vmax.f32 %v3124_v24, %v9948_v0  ;;  %v3101_v34 = vadd.f32 %v3100_v42, %v6629_v27  ;;  %5359 = vmatprep.subr.bf16.mxu0 %v5358_v52  ;;  %v9953_v23 = vmax.f32 %v8759_v8, 0.0  ;;  %v9955_v35 = vmax.f32 %v9954_v37, 0.0  ;;  %v9956_v52 = vld [vmem:[#allocation56_spill] sm:$0xff] }
 0x5cd   : > { %v3125_v19 = vmax.f32 %v3099_v13, 0.0  ;;  %5361 = vmatpush1.bf16.msra.mxu0 %v5360_v49  ;;  %v9957_v50 = vmax.f32 %v9956_v52, 0.0 }
 0x5ce   : > { %v3126_v61 = vmax.f32 %v3101_v34, 0.0  ;;  %v3104_v6 = vpop.f32.mrb[86].mxu0  ;;  %v3140_v38 = vmax.f32 %v9953_v23, %v3124_v24 }
 0x5cf   : > { %v3141_v10 = vmax.f32 %v9950_v57, %v3125_v19  ;;  %v3362_v29 = vmax.f32 %v3125_v19, %v9952_v62  ;;  %v3105_v55 = vadd.f32 %v3104_v6, %v6637_v33  ;;  %v3106_v3 = vpop.f32.mrb[87].mxu0  ;;  %v9958_v19 = vld [vmem:[#allocation58_spill] sm:$0xff]  ;;  %v9960_v57 = vld [vmem:[#allocation59_spill] sm:$0xff] }
 0x5d0   : > { %v3142_v49 = vmax.f32 %v9955_v35, %v3126_v61  ;;  %v3363_v11 = vmax.f32 %v3126_v61, %v9957_v50  ;;  %v3107_v26 = vadd.f32 %v3106_v3, %v6637_v33  ;;  %v9959_v6 = vmax.f32 %v9958_v19, 0.0  ;;  %v9965_v35 = vld [vmem:[#allocation62_spill] sm:$0xff] }
 0x5d1   : > { %v5364_v41 = vpack.c.bf16 %v3141_v10, %v3139_v28  ;;  %v5396_v54 = vpack.c.bf16 %v3362_v29, %v3360_v51  ;;  %v3127_v13 = vmax.f32 %v3105_v55, 0.0  ;;  %v9961_v1 = vmax.f32 %v9960_v57, 0.0  ;;  %v9963_v29 = vld [vmem:[#allocation61_spill] sm:$0xff]  ;;  %v9986_v19 = vld [vmem:[#allocation30_spill] sm:$0xff]  ;;  %v1922_v57 = vld [vmem:[%s9366_s7 + $0x30] sm:$0xff] }
 0x5d2   : > { %v3128_v42 = vmax.f32 %v3107_v26, 0.0  ;;  %v3110_v45 = vpop.f32.mrb[88].mxu0  ;;  %v5362_v0 = vpack.c.bf16 %v3142_v49, %v3140_v38  ;;  %v5394_v34 = vpack.c.bf16 %v3363_v11, %v3361_v16  ;;  %v9962_v28 = vmax.f32 %v8799_v25, 0.0 }
 0x5d3   : > { %v3364_v5 = vmax.f32 %v3127_v13, %v9959_v6  ;;  %v3111_v8 = vadd.f32 %v3110_v45, %v6663_v47  ;;  %v3112_v24 = vpop.f32.mrb[89].mxu0  ;;  %v9964_v55 = vmax.f32 %v9963_v29, 0.0  ;;  %v9966_v49 = vmax.f32 %v9965_v35, 0.0  ;;  %v9983_v45 = vld [vmem:[#allocation57_spill] sm:$0xff]  ;;  %v10004_v35 = vld [vmem:[#allocation88_spill] sm:$0xff] }
 0x5d4   : > { %v3365_v62 = vmax.f32 %v3128_v42, %v9961_v1  ;;  %v3113_v61 = vadd.f32 %v3112_v24, %v6663_v47  ;;  %5363 = vmatprep.subr.bf16.mxu0 %v5362_v0  ;;  %v3143_v10 = vmax.f32 %v9962_v28, %v3127_v13  ;;  %v3144_v38 = vmax.f32 %v2907_v58, %v3128_v42  ;;  %v9982_v42 = vld [vmem:[#allocation60_spill] sm:$0xff]  ;;  %v9991_v1 = vld [vmem:[#allocation73_spill] sm:$0xff] }
 0x5d5   : > { %v3129_v3 = vmax.f32 %v3111_v8, 0.0  ;;  %5365 = vmatpush1.bf16.msra.mxu0 %v5364_v41  ;;  %v9979_v41 = vld [vmem:[#allocation29_spill] sm:$0xff]  ;;  %v9984_v0 = vpack.c.bf16 %v9982_v42, %v9983_v45  ;;  %v9989_v8 = vld [vmem:[#allocation63_spill] sm:$0xff]  ;;  %v10025_v45 = vld [vmem:[#allocation98_spill] sm:$0xff] }
 0x5d6   : > { %v3130_v51 = vmax.f32 %v3113_v61, 0.0 }
 0x5d7   : > { %v3145_v16 = vmax.f32 %v2908_v15, %v3129_v3  ;;  %v3366_v23 = vmax.f32 %v3129_v3, %v9964_v55  ;;  %v9968_v15 = vld [vmem:[#allocation8_spill] sm:$0xff]  ;;  %v9994_v3 = vld [vmem:[#allocation70_spill] sm:$0xff] }
 0x5d8   : > { %v3146_v37 = vmax.f32 %v2909_v48, %v3130_v51  ;;  %v3367_v52 = vmax.f32 %v3130_v51, %v9966_v49  ;;  %v9969_v58 = vpack.c.bf16 %v9967_v21, %v9968_v15  ;;  %v9970_v48 = vld [vmem:[#allocation7_spill] sm:$0xff]  ;;  %v9995_v51 = vld [vmem:[#allocation69_spill] sm:$0xff]  ;;  %v10000_v55 = vld [vmem:[#allocation78_spill] sm:$0xff] }
 0x5d9   : > { %v5368_v50 = vpack.c.bf16 %v3145_v16, %v3143_v10  ;;  %v5400_v11 = vpack.c.bf16 %v3366_v23, %v3364_v5  ;;  %v9972_v18 = vpack.c.bf16 %v9970_v48, %v9971_v31  ;;  %v9988_v5 = vld [vmem:[#allocation64_spill] sm:$0xff]  ;;  %v9996_v28 = vpack.c.bf16 %v9994_v3, %v9995_v51  ;;  %v9997_v10 = vld [vmem:[#allocation81_spill] sm:$0xff]  ;;  %v10015_v48 = vld [vmem:[#allocation18_spill] sm:$0xff] }
 0x5da   : > { %v5366_v26 = vpack.c.bf16 %v3146_v37, %v3144_v38  ;;  %v5398_v25 = vpack.c.bf16 %v3367_v52, %v3365_v62  ;;  %v9990_v24 = vpack.c.bf16 %v9988_v5, %v9989_v8  ;;  %v9992_v62 = vld [vmem:[#allocation72_spill] sm:$0xff]  ;;  %v10001_v23 = vld [vmem:[#allocation77_spill] sm:$0xff]  ;;  %v10006_v52 = vld [vmem:[#allocation86_spill] sm:$0xff] }
 0x5db   : > { %v9993_v61 = vpack.c.bf16 %v9991_v1, %v9992_v62  ;;  %v9998_v16 = vld [vmem:[#allocation80_spill] sm:$0xff]  ;;  %v10002_v38 = vpack.c.bf16 %v10000_v55, %v10001_v23  ;;  %v10003_v37 = vld [vmem:[#allocation89_spill] sm:$0xff] }
 0x5dc   : > { %5367 = vmatprep.subr.bf16.mxu0 %v5366_v26  ;;  %v9999_v29 = vpack.c.bf16 %v9997_v10, %v9998_v16  ;;  %v10005_v49 = vpack.c.bf16 %v10003_v37, %v10004_v35  ;;  %v10009_v26 = vld [vmem:[#allocation96_spill] sm:$0xff]  ;;  %v10013_v21 = vld [vmem:[#allocation93_spill] sm:$0xff]  ;;  %v10033_v16 = vld [vmem:[#allocation66_spill] sm:$0xff] }
 0x5dd   : > { %5369 = vmatpush1.bf16.msra.mxu0 %v5368_v50  ;;  %v10007_v50 = vld [vmem:[#allocation85_spill] sm:$0xff]  ;;  %v10037_v37 = vld [vmem:[#allocation100_spill] sm:$0xff] }
 0x5de   : > { %5387 = vmatprep.subr.bf16.mxu0 %v5386_v9  ;;  %v9976_v9 = vld [vmem:[#allocation54_spill] sm:$0xff]  ;;  %v10016_v31 = vld [vmem:[#allocation17_spill] sm:$0xff]  ;;  %v10038_v35 = vmax.f32 %v10037_v37, 0.0  ;;  %v10057_v37 = vld [vmem:[#allocation112_spill] sm:$0xff] }
 0x5e0   : > { %5031 = vmatmul.mubr.msk.f32.vlgmr.msra.gmra.mrb[56].mxu0 %vm1968_vm2, %v1920_v4 }
 0x5e1   : > { %5389 = vmatpush1.bf16.msra.mxu0 %v5388_v43  ;;  %3435 = vmatprep.mubr.f32.mxu0 %v9649_v30  ;;  %v9975_v43 = vpack.c.bf16 %v9973_v56, %v9974_v40  ;;  %v10018_v56 = vld [vmem:[#allocation19_spill] sm:$0xff]  ;;  %v10019_v40 = vld [vmem:[#allocation22_spill] sm:$0xff] }
 0x5e2   : > { %5391 = vmatprep.subr.bf16.mxu0 %v5390_v59 }
 0x5e5   : > { %5393 = vmatpush1.bf16.msra.mxu0 %v5392_v46  ;;  %v9977_v46 = vld [vmem:[#allocation51_spill] sm:$0xff] }
 0x5e6   : > { %5395 = vmatprep.subr.bf16.mxu0 %v5394_v34  ;;  %v9978_v59 = vpack.c.bf16 %v9976_v9, %v9977_v46  ;;  %v9985_v34 = vld [vmem:[#allocation31_spill] sm:$0xff]  ;;  %v10021_v9 = vld [vmem:[#allocation24_spill] sm:$0xff] }
 0x5e7   : > { %v9987_v6 = vpack.c.bf16 %v9985_v34, %v9986_v19  ;;  %v10022_v46 = vld [vmem:[#allocation23_spill] sm:$0xff] }
 0x5e9   : > { %5397 = vmatpush1.bf16.msra.mxu0 %v5396_v54  ;;  %v9980_v54 = vld [vmem:[#allocation28_spill] sm:$0xff] }
 0x5ea   : > { %5399 = vmatprep.subr.bf16.mxu0 %v5398_v25  ;;  %v9981_v13 = vpack.c.bf16 %v9979_v41, %v9980_v54  ;;  %v10010_v25 = vld [vmem:[#allocation95_spill] sm:$0xff]  ;;  %v10023_v41 = vld [vmem:[#allocation97_spill] sm:$0xff] }
 0x5eb   : > { %v10011_v4 = vpack.c.bf16 %v10009_v26, %v10010_v25  ;;  %v10024_v54 = vmax.f32 %v10023_v41, 0.0  ;;  %v10047_v41 = vld [vmem:[#allocation107_spill] sm:$0xff] }
 0x5ed   : > { %5401 = vmatpush1.bf16.msra.mxu0 %v5400_v11  ;;  %v10008_v11 = vpack.c.bf16 %v10006_v52, %v10007_v50 }
 0x5ee   : > { %5419 = vmatprep.subr.bf16.mxu0 %v9969_v58  ;;  %v1923_v58 = vld [vmem:[%s9366_s7 + $0x38] sm:$0xff] }
 0x5f0   : > { %5040 = vmatmul.mubr.msk.f32.vlgmr.msra.gmra.mrb[56].mxu0 %vm1968_vm2, %v1921_v39  ;;  %v10012_v39 = vld [vmem:[#allocation94_spill] sm:$0xff] }
 0x5f1   : > { %5421 = vmatpush1.bf16.msra.mxu0 %v9972_v18  ;;  %3656 = vmatprep.mubr.f32.mxu0 %v9649_v30  ;;  %v10014_v15 = vpack.c.bf16 %v10012_v39, %v10013_v21  ;;  %v10017_v18 = vld [vmem:[#allocation20_spill] sm:$0xff] }
 0x5f2   : > { %5423 = vmatprep.subr.bf16.mxu0 %v9975_v43  ;;  %v10020_v43 = vld [vmem:[#allocation21_spill] sm:$0xff] }
 0x5f5   : > { %5425 = vmatpush1.bf16.msra.mxu0 %v9978_v59 }
 0x5f6   : > { %5427 = vmatprep.subr.bf16.mxu0 %v9981_v13 }
 0x5f9   : > { %5429 = vmatpush1.bf16.msra.mxu0 %v9984_v0 }
 0x5fa   : > { %5431 = vmatprep.subr.bf16.mxu0 %v9987_v6 }
 0x5fd   : > { %5433 = vmatpush1.bf16.msra.mxu0 %v9990_v24 }
 0x5fe   : > { %5451 = vmatprep.subr.bf16.mxu0 %v9993_v61  ;;  %v10031_v61 = vld [vmem:[#allocation99_spill] sm:$0xff] }
 0x5ff   : > { %v10032_v3 = vmax.f32 %v10031_v61, 0.0 }
 0x600   : > { %5049 = vmatmul.mubr.msk.f32.vlgmr.msra.gmra.mrb[56].mxu0 %vm1968_vm2, %v1922_v57  ;;  %v10029_v57 = vld [vmem:[#allocation67_spill] sm:$0xff] }
 0x601   : > { %5453 = vmatpush1.bf16.msra.mxu0 %v9996_v28  ;;  %3877 = vmatprep.mubr.f32.mxu0 %v9649_v30  ;;  %v10030_v1 = vmax.f32 %v10029_v57, 0.0 }
 0x602   : > { %5455 = vmatprep.subr.bf16.mxu0 %v9999_v29  ;;  %v10034_v29 = vmax.f32 %v10033_v16, 0.0 }
 0x605   : > { %5457 = vmatpush1.bf16.msra.mxu0 %v10002_v38 }
 0x606   : > { %5459 = vmatprep.subr.bf16.mxu0 %v10005_v49 }
 0x609   : > { %5461 = vmatpush1.bf16.msra.mxu0 %v10008_v11 }
 0x60a   : > { %5463 = vmatprep.subr.bf16.mxu0 %v10011_v4 }
 0x60d   : > { %5465 = vmatpush1.bf16.msra.mxu0 %v10014_v15  ;;  %v10039_v15 = vld [vmem:[#allocation103_spill] sm:$0xff] }
 0x60e   : > { %5467 = vmatprep.subr.bf16.mxu0 %v10015_v48 }
 0x610   : > { %5058 = vmatmul.mubr.msk.f32.vlgmr.msra.gmra.mrb[56].mxu0 %vm1968_vm2, %v1923_v58  ;;  %v10040_v58 = vmax.f32 %v10039_v15, 0.0 }
 0x611   : > { %5469 = vmatpush1.bf16.msra.mxu0 %v10016_v31  ;;  %3950 = vmatprep.mubr.f32.mxu0 %v9649_v30 }
 0x612   : > { %5471 = vmatprep.subr.bf16.mxu0 %v10017_v18 }
 0x615   : > { %5473 = vmatpush1.bf16.msra.mxu0 %v10018_v56  ;;  %v10041_v56 = vld [vmem:[#allocation104_spill] sm:$0xff] }
 0x616   : > { %5475 = vmatprep.subr.bf16.mxu0 %v10019_v40 }
 0x619   : > { %5477 = vmatpush1.bf16.msra.mxu0 %v10020_v43 }
 0x61a   : > { %5479 = vmatprep.subr.bf16.mxu0 %v10021_v9 }
 0x61d   : > { %5481 = vmatpush1.bf16.msra.mxu0 %v10022_v46 }
 0x620   : > { %5059 = vmatmul.mubr.msk.f32.vlgmr.msra.gmra.mrb[90].mxu0 %vm1968_vm2, %v8868_v32 }
 0x621   : > { %3956 = vmatprep.mubr.f32.mxu0 %v9649_v30 }
 0x624   : > { %5060 = vmatmul.mubr.msk.f32.gmra.mrb[92].mxu0 %vm1968_vm2, %v8876_v14 }
 0x625   : > { %3962 = vmatprep.mubr.f32.mxu0 %v9649_v30 }
 0x628   : > { %5061 = vmatmul.mubr.msk.f32.gmra.mrb[94].mxu0 %vm1968_vm2, %v8884_v7 }
 0x629   : > { %3968 = vmatprep.mubr.f32.mxu0 %v9649_v30 }
 0x62c   : > { %5062 = vmatmul.mubr.msk.f32.gmra.mrb[96].mxu0 %vm1968_vm2, %v8892_v22 }
 0x62d   : > { %3974 = vmatprep.mubr.f32.mxu0 %v9649_v30 }
 0x630   : > { %5063 = vmatmul.mubr.msk.f32.gmra.mrb[98].mxu0 %vm1968_vm2, %v8900_v36 }
 0x631   : > { %3980 = vmatprep.mubr.f32.mxu0 %v9649_v30 }
 0x634   : > { %5064 = vmatmul.mubr.msk.f32.gmra.mrb[100].mxu0 %vm1968_vm2, %v8908_v53 }
 0x635   : > { %3986 = vmatprep.mubr.f32.mxu0 %v9649_v30 }
 0x638   : > { %5065 = vmatmul.mubr.msk.f32.gmra.mrb[102].mxu0 %vm1968_vm2, %v8916_v20 }
 0x639   : > { %3992 = vmatprep.mubr.f32.mxu0 %v9649_v30 }
 0x63c   : > { %5066 = vmatmul.mubr.msk.f32.gmra.mrb[104].mxu0 %vm1968_vm2, %v8924_v12  ;;  %v10026_v12 = vmax.f32 %v10025_v45, 0.0 }
 0x63d   : > { %4098 = vmatprep.mubr.f32.mxu0 %v9649_v30 }
 0x6f3   : > { %v3952_v32 = vpop.f32.mrb[90].mxu0 }
 0x6f4   : > { %v3953_v14 = vadd.f32 %v3952_v32, %v6530_v44  ;;  %v3954_v7 = vpop.f32.mrb[91].mxu0 }
 0x6f5   : > { %v3955_v22 = vadd.f32 %v3954_v7, %v6530_v44  ;;  %v10027_v44 = vld [vmem:[#allocation65_spill] sm:$0xff] }
 0x6f6   : > { %v3999_v36 = vmax.f32 %v3953_v14, 0.0  ;;  %v10028_v8 = vmax.f32 %v10027_v44, 0.0  ;;  %v10043_v14 = vld [vmem:[#allocation71_spill] sm:$0xff]  ;;  %v10053_v44 = vld [vmem:[#allocation108_spill] sm:$0xff] }
 0x6f7   : > { %v4000_v53 = vmax.f32 %v3955_v22, 0.0  ;;  %v3958_v59 = vpop.f32.mrb[92].mxu0  ;;  %v10044_v7 = vmax.f32 %v10043_v14, 0.0 }
 0x6f8   : > { %v9140_v13 = vmax.f32 %v3999_v36, %v10024_v54  ;;  %v3959_v20 = vadd.f32 %v3958_v59, %v9710_v60  ;;  %v3960_v42 = vpop.f32.mrb[93].mxu0  ;;  %v4015_v24 = vmax.f32 %v10028_v8, %v3999_v36  ;;  %v10045_v36 = vld [vmem:[#allocation75_spill] sm:$0xff]  ;;  %v10048_v54 = vmax.f32 %v10047_v41, 0.0 }
 0x6f9   : > { %v9145_v0 = vmax.f32 %v4000_v53, %v10026_v12  ;;  %v3961_v34 = vadd.f32 %v3960_v42, %v9710_v60  ;;  %v4016_v55 = vmax.f32 %v10034_v29, %v4000_v53  ;;  %v10035_v60 = vld [vmem:[#allocation68_spill] sm:$0xff]  ;;  %v10046_v53 = vmax.f32 %v10045_v36, 0.0  ;;  %v10049_v12 = vld [vmem:[#allocation74_spill] sm:$0xff]  ;;  %v10055_v29 = vld [vmem:[#allocation111_spill] sm:$0xff] }
 0x6fa   : > { %v4001_v19 = vmax.f32 %v3959_v20, 0.0  ;;  %v10036_v23 = vmax.f32 %v10035_v60, 0.0  ;;  %v10054_v8 = vmax.f32 %v10053_v44, 0.0 }
 0x6fb   : > { %v4002_v6 = vmax.f32 %v3961_v34, 0.0  ;;  %v3964_v5 = vpop.f32.mrb[94].mxu0 }
 0x6fc   : > { %v4017_v62 = vmax.f32 %v10030_v1, %v4001_v19  ;;  %v9154_v51 = vmax.f32 %v4001_v19, %v10032_v3  ;;  %v3965_v28 = vadd.f32 %v3964_v5, %v6560_v2  ;;  %v3966_v10 = vpop.f32.mrb[95].mxu0  ;;  %v10051_v19 = vld [vmem:[#allocation76_spill] sm:$0xff] }
 0x6fd   : > { %v4018_v38 = vmax.f32 %v10036_v23, %v4002_v6  ;;  %v9163_v49 = vmax.f32 %v4002_v6, %v10038_v35  ;;  %v3967_v52 = vadd.f32 %v3966_v10, %v6560_v2  ;;  %v10042_v2 = vmax.f32 %v10041_v56, 0.0 }
 0x6fe   : > { %v5484_v50 = vpack.c.bf16 %v4017_v62, %v4015_v24  ;;  %v5516_v11 = vpack.c.bf16 %v9154_v51, %v9140_v13  ;;  %v4003_v26 = vmax.f32 %v3965_v28, 0.0  ;;  %v10052_v6 = vmax.f32 %v10051_v19, 0.0  ;;  %v10090_v13 = vld [vmem:[#allocation105_spill] sm:$0xff] }
 0x6ff   : > { %v4004_v25 = vmax.f32 %v3967_v52, 0.0  ;;  %v3970_v4 = vpop.f32.mrb[96].mxu0  ;;  %v5482_v39 = vpack.c.bf16 %v4018_v38, %v4016_v55  ;;  %v5514_v21 = vpack.c.bf16 %v9163_v49, %v9145_v0  ;;  %v10056_v55 = vmax.f32 %v10055_v29, 0.0  ;;  %v10077_v29 = vld [vmem:[#allocation91_spill] sm:$0xff]  ;;  %v10087_v0 = vld [vmem:[#allocation106_spill] sm:$0xff]  ;;  %v10091_v51 = vld [vmem:[#allocation101_spill] sm:$0xff] }
 0x700   : > { %v9172_v48 = vmax.f32 %v4003_v26, %v10040_v58  ;;  %v3971_v31 = vadd.f32 %v3970_v4, %v6582_v63  ;;  %v3972_v18 = vpop.f32.mrb[97].mxu0  ;;  %v4019_v22 = vmax.f32 %v10044_v7, %v4003_v26  ;;  %v10058_v35 = vmax.f32 %v10057_v37, 0.0  ;;  %v10059_v4 = vld [vmem:[#allocation79_spill] sm:$0xff]  ;;  %v10088_v49 = vld [vmem:[#allocation102_spill] sm:$0xff] }
 0x701   : > { %v9177_v40 = vmax.f32 %v4004_v25, %v10042_v2  ;;  %v3973_v43 = vadd.f32 %v3972_v18, %v6582_v63  ;;  %5483 = vmatprep.subr.bf16.mxu0 %v5482_v39  ;;  %v10050_v63 = vmax.f32 %v10049_v12, 0.0  ;;  %v10060_v39 = vmax.f32 %v10059_v4, 0.0  ;;  %v10061_v58 = vld [vmem:[#allocation83_spill] sm:$0xff] }
 0x702   : > { %v4005_v9 = vmax.f32 %v3971_v31, 0.0  ;;  %5485 = vmatpush1.bf16.msra.mxu0 %v5484_v50  ;;  %v10063_v18 = vld [vmem:[#allocation115_spill] sm:$0xff] }
 0x703   : > { %v4006_v46 = vmax.f32 %v3973_v43, 0.0  ;;  %v3976_v32 = vpop.f32.mrb[98].mxu0  ;;  %v4020_v34 = vmax.f32 %v10050_v63, %v4004_v25  ;;  %v10064_v56 = vmax.f32 %v10063_v18, 0.0  ;;  %v1924_v18 = vld [vmem:[%s9366_s7 + $0x40] sm:$0xff] }
 0x704   : > { %v4021_v59 = vmax.f32 %v10046_v53, %v4005_v9  ;;  %v9186_v20 = vmax.f32 %v4005_v9, %v10048_v54  ;;  %v3977_v42 = vadd.f32 %v3976_v32, %v6601_v17  ;;  %v3978_v45 = vpop.f32.mrb[99].mxu0  ;;  %v10065_v9 = vld [vmem:[#allocation82_spill] sm:$0xff]  ;;  %v10067_v32 = vld [vmem:[#allocation84_spill] sm:$0xff] }
 0x705   : > { %v4022_v5 = vmax.f32 %v10052_v6, %v4006_v46  ;;  %v4243_v24 = vmax.f32 %v4006_v46, %v10054_v8  ;;  %v3979_v57 = vadd.f32 %v3978_v45, %v6601_v17  ;;  %v10066_v46 = vmax.f32 %v10065_v9, 0.0  ;;  %v10073_v8 = vld [vmem:[#allocation120_spill] sm:$0xff] }
 0x706   : > { %v5488_v1 = vpack.c.bf16 %v4021_v59, %v4019_v22  ;;  %v5520_v62 = vpack.c.bf16 %v9186_v20, %v9172_v48  ;;  %v4007_v61 = vmax.f32 %v3977_v42, 0.0  ;;  %v10062_v48 = vmax.f32 %v10061_v58, 0.0  ;;  %v10069_v22 = vld [vmem:[#allocation116_spill] sm:$0xff] }
 0x707   : > { %v4008_v3 = vmax.f32 %v3979_v57, 0.0  ;;  %v3982_v28 = vpop.f32.mrb[100].mxu0  ;;  %v5486_v10 = vpack.c.bf16 %v4022_v5, %v4020_v34  ;;  %v5518_v16 = vpack.c.bf16 %v4243_v24, %v9177_v40  ;;  %v10068_v14 = vmax.f32 %v10067_v32, 0.0  ;;  %v10071_v34 = vld [vmem:[#allocation119_spill] sm:$0xff] }
 0x708   : > { %v4244_v60 = vmax.f32 %v4007_v61, %v10056_v55  ;;  %v3983_v23 = vadd.f32 %v3982_v28, %v6629_v27  ;;  %v3984_v38 = vpop.f32.mrb[101].mxu0  ;;  %v4023_v15 = vmax.f32 %v10060_v39, %v4007_v61  ;;  %v10070_v36 = vmax.f32 %v10069_v22, 0.0 }
 0x709   : > { %v4245_v52 = vmax.f32 %v4008_v3, %v10058_v35  ;;  %v3985_v17 = vadd.f32 %v3984_v38, %v6629_v27  ;;  %5487 = vmatprep.subr.bf16.mxu0 %v5486_v10  ;;  %v4024_v27 = vmax.f32 %v10066_v46, %v4008_v3  ;;  %v10072_v19 = vmax.f32 %v10071_v34, 0.0  ;;  %v10075_v3 = vld [vmem:[#allocation87_spill] sm:$0xff]  ;;  %v10081_v35 = vld [vmem:[#allocation90_spill] sm:$0xff] }
 0x70a   : > { %v4009_v50 = vmax.f32 %v3983_v23, 0.0  ;;  %5489 = vmatpush1.bf16.msra.mxu0 %v5488_v1  ;;  %v10074_v24 = vmax.f32 %v10073_v8, 0.0  ;;  %v10076_v28 = vmax.f32 %v10075_v3, 0.0  ;;  %v10078_v55 = vmax.f32 %v10077_v29, 0.0  ;;  %v10079_v23 = vld [vmem:[#allocation123_spill] sm:$0xff]  ;;  %v10099_v46 = vld [vmem:[#allocation122_spill] sm:$0xff] }
 0x70b   : > { %v4010_v26 = vmax.f32 %v3985_v17, 0.0  ;;  %v3988_v25 = vpop.f32.mrb[102].mxu0  ;;  %v10080_v38 = vmax.f32 %v10079_v23, 0.0  ;;  %v10114_v34 = vld [vmem:[#allocation131_spill] sm:$0xff] }
 0x70c   : > { %v4025_v31 = vmax.f32 %v10062_v48, %v4009_v50  ;;  %v4246_v2 = vmax.f32 %v4009_v50, %v10064_v56  ;;  %v3989_v40 = vadd.f32 %v3988_v25, %v6637_v33  ;;  %v3990_v43 = vpop.f32.mrb[103].mxu0  ;;  %v10083_v50 = vld [vmem:[#allocation92_spill] sm:$0xff]  ;;  %v1925_v56 = vld [vmem:[%s9366_s7 + $0x48] sm:$0xff] }
 0x70d   : > { %v4026_v7 = vmax.f32 %v10068_v14, %v4010_v26  ;;  %v4247_v53 = vmax.f32 %v4010_v26, %v10070_v36  ;;  %v3991_v59 = vadd.f32 %v3990_v43, %v6637_v33  ;;  %v10084_v26 = vmax.f32 %v10083_v50, 0.0  ;;  %v10097_v43 = vld [vmem:[#allocation109_spill] sm:$0xff]  ;;  %v10105_v36 = vld [vmem:[#allocation128_spill] sm:$0xff] }
 0x70e   : > { %v5492_v41 = vpack.c.bf16 %v4025_v31, %v4023_v15  ;;  %v5524_v54 = vpack.c.bf16 %v4246_v2, %v4244_v60  ;;  %v4011_v20 = vmax.f32 %v3989_v40, 0.0  ;;  %v10096_v40 = vld [vmem:[#allocation113_spill] sm:$0xff] }
 0x70f   : > { %v4012_v42 = vmax.f32 %v3991_v59, 0.0  ;;  %v3994_v45 = vpop.f32.mrb[104].mxu0  ;;  %v5490_v12 = vpack.c.bf16 %v4026_v7, %v4024_v27  ;;  %v5522_v63 = vpack.c.bf16 %v4247_v53, %v4245_v52  ;;  %v10082_v52 = vmax.f32 %v10081_v35, 0.0  ;;  %v10100_v27 = vld [vmem:[#allocation118_spill] sm:$0xff]  ;;  %v10102_v14 = vld [vmem:[#allocation121_spill] sm:$0xff] }
 0x710   : > { %v4248_v6 = vmax.f32 %v4011_v20, %v10072_v19  ;;  %v3995_v5 = vadd.f32 %v3994_v45, %v6663_v47  ;;  %v3996_v44 = vpop.f32.mrb[105].mxu0  ;;  %v4027_v10 = vmax.f32 %v10076_v28, %v4011_v20  ;;  %v10098_v9 = vpack.c.bf16 %v10096_v40, %v10097_v43  ;;  %v10103_v7 = vld [vmem:[#allocation117_spill] sm:$0xff]  ;;  %v10106_v53 = vld [vmem:[#allocation126_spill] sm:$0xff]  ;;  %v10111_v45 = vld [vmem:[#allocation132_spill] sm:$0xff] }
 0x711   : > { %v4249_v57 = vmax.f32 %v4012_v42, %v10074_v24  ;;  %v3997_v1 = vadd.f32 %v3996_v44, %v6663_v47  ;;  %5491 = vmatprep.subr.bf16.mxu0 %v5490_v12  ;;  %v4028_v17 = vmax.f32 %v10082_v52, %v4012_v42  ;;  %v10085_v47 = vld [vmem:[#allocation124_spill] sm:$0xff]  ;;  %v10101_v32 = vpack.c.bf16 %v10099_v46, %v10100_v27  ;;  %v10112_v12 = vld [vmem:[#allocation130_spill] sm:$0xff]  ;;  %v10115_v19 = vld [vmem:[#allocation129_spill] sm:$0xff]  ;;  %v4774_v52 = vpop.permute.xlu0 %4773 }
 0x712   : > { %v4013_v33 = vmax.f32 %v3995_v5, 0.0  ;;  %5493 = vmatpush1.bf16.msra.mxu0 %v5492_v41  ;;  %v10086_v4 = vmax.f32 %v10085_v47, 0.0  ;;  %v10104_v22 = vpack.c.bf16 %v10102_v14, %v10103_v7  ;;  %v10107_v59 = vpack.c.bf16 %v10105_v36, %v10106_v53  ;;  %v10108_v41 = vld [vmem:[#allocation127_spill] sm:$0xff]  ;;  %v1926_v42 = vld [vmem:[%s9366_s7 + $0x50] sm:$0xff]  ;;  %v10118_v44 = vld [vmem:[#allocation134_spill] sm:$0xff] }
 0x713   : > { %v4014_v61 = vmax.f32 %v3997_v1, 0.0  ;;  %v10117_v5 = vld [vmem:[#allocation136_spill] sm:$0xff]  ;;  %v10120_v24 = vld [vmem:[#allocation135_spill] sm:$0xff]  ;;  %v1927_v35 = vld [vmem:[%s9366_s7 + $0x58] sm:$0xff] }
 0x714   : > { %v4029_v60 = vmax.f32 %v10078_v55, %v4013_v33  ;;  %v4250_v37 = vmax.f32 %v4013_v33, %v10080_v38  ;;  %v10119_v8 = vpack.c.bf16 %v10117_v5, %v10118_v44  ;;  %v10123_v33 = vld [vmem:[#allocation140_spill] sm:$0xff]  ;;  %v10126_v28 = vld [vmem:[#allocation139_spill] sm:$0xff]  ;;  %v10133_v38 = vld [vmem:[#allocation141_spill] sm:$0xff] }
 0x715   : > { %v4030_v25 = vmax.f32 %v10084_v26, %v4014_v61  ;;  %v4251_v39 = vmax.f32 %v4014_v61, %v10086_v4  ;;  %v10124_v61 = vld [vmem:[#allocation138_spill] sm:$0xff]  ;;  %v10129_v55 = vld [vmem:[#allocation144_spill] sm:$0xff] }
 0x716   : > { %v5496_v15 = vpack.c.bf16 %v4029_v60, %v4027_v10  ;;  %v5528_v58 = vpack.c.bf16 %v4250_v37, %v4248_v6  ;;  %v10116_v6 = vpack.c.bf16 %v10114_v34, %v10115_v19  ;;  %v10125_v3 = vpack.c.bf16 %v10123_v33, %v10124_v61  ;;  %v10127_v10 = vld [vmem:[#allocation137_spill] sm:$0xff]  ;;  %v10130_v60 = vld [vmem:[#allocation142_spill] sm:$0xff] }
 0x717   : > { %v5494_v48 = vpack.c.bf16 %v4030_v25, %v4028_v17  ;;  %v5526_v31 = vpack.c.bf16 %v4251_v39, %v4249_v57  ;;  %v10121_v57 = vld [vmem:[#allocation133_spill] sm:$0xff]  ;;  %v10128_v29 = vpack.c.bf16 %v10126_v28, %v10127_v10  ;;  %v10131_v23 = vpack.c.bf16 %v10129_v55, %v10130_v60 }
 0x718   : > { %v10122_v1 = vpack.c.bf16 %v10120_v24, %v10121_v57 }
 0x719   : > { %5495 = vmatprep.subr.bf16.mxu0 %v5494_v48 }
 0x71a   : > { %5497 = vmatpush1.bf16.msra.mxu0 %v5496_v15 }
 0x71b   : > { %5515 = vmatprep.subr.bf16.mxu0 %v5514_v21  ;;  %v10089_v21 = vpack.c.bf16 %v10087_v0, %v10088_v49 }
 0x71d   : > { %5067 = vmatmul.mubr.msk.f32.vlgmr.msra.gmra.mrb[56].mxu0 %vm1968_vm2, %v1924_v18 }
 0x71e   : > { %5517 = vmatpush1.bf16.msra.mxu0 %v5516_v11  ;;  %4319 = vmatprep.mubr.f32.mxu0 %v9649_v30  ;;  %v10092_v11 = vpack.c.bf16 %v10090_v13, %v10091_v51 }
 0x71f   : > { %5519 = vmatprep.subr.bf16.mxu0 %v5518_v16  ;;  %v10094_v16 = vld [vmem:[#allocation110_spill] sm:$0xff] }
 0x722   : > { %5521 = vmatpush1.bf16.msra.mxu0 %v5520_v62  ;;  %v10093_v62 = vld [vmem:[#allocation114_spill] sm:$0xff] }
 0x723   : > { %5523 = vmatprep.subr.bf16.mxu0 %v5522_v63  ;;  %v10095_v2 = vpack.c.bf16 %v10093_v62, %v10094_v16  ;;  %v10113_v63 = vpack.c.bf16 %v10111_v45, %v10112_v12 }
 0x726   : > { %5525 = vmatpush1.bf16.msra.mxu0 %v5524_v54  ;;  %v10109_v54 = vld [vmem:[#allocation125_spill] sm:$0xff] }
 0x727   : > { %5527 = vmatprep.subr.bf16.mxu0 %v5526_v31  ;;  %v10110_v20 = vpack.c.bf16 %v10108_v41, %v10109_v54 }
 0x72a   : > { %5529 = vmatpush1.bf16.msra.mxu0 %v5528_v58 }
 0x72b   : > { %5547 = vmatprep.subr.bf16.mxu0 %v10089_v21 }
 0x72d   : > { %5076 = vmatmul.mubr.msk.f32.vlgmr.msra.gmra.mrb[56].mxu0 %vm1968_vm2, %v1925_v56 }
 0x72e   : > { %5549 = vmatpush1.bf16.msra.mxu0 %v10092_v11  ;;  %4540 = vmatprep.mubr.f32.mxu0 %v9649_v30 }
 0x72f   : > { %5551 = vmatprep.subr.bf16.mxu0 %v10095_v2 }
 0x732   : > { %5553 = vmatpush1.bf16.msra.mxu0 %v10098_v9 }
 0x733   : > { %5555 = vmatprep.subr.bf16.mxu0 %v10101_v32 }
 0x736   : > { %5557 = vmatpush1.bf16.msra.mxu0 %v10104_v22 }
 0x737   : > { %5559 = vmatprep.subr.bf16.mxu0 %v10107_v59 }
 0x73a   : > { %5561 = vmatpush1.bf16.msra.mxu0 %v10110_v20 }
 0x73b   : > { %5579 = vmatprep.subr.bf16.mxu0 %v10113_v63 }
 0x73d   : > { %5085 = vmatmul.mubr.msk.f32.vlgmr.msra.gmra.mrb[56].mxu0 %vm1968_vm2, %v1926_v42 }
 0x73e   : > { %5581 = vmatpush1.bf16.msra.mxu0 %v10116_v6  ;;  %4761 = vmatprep.mubr.f32.mxu0 %v9649_v30  ;;  %v10132_v30 = vld [vmem:[#allocation143_spill] sm:$0xff] }
 0x73f   : > { %5583 = vmatprep.subr.bf16.mxu0 %v10119_v8  ;;  %v10134_v37 = vpack.c.bf16 %v10132_v30, %v10133_v38 }
 0x742   : > { %5585 = vmatpush1.bf16.msra.mxu0 %v10122_v1 }
 0x743   : > { %5587 = vmatprep.subr.bf16.mxu0 %v10125_v3 }
 0x746   : > { %5589 = vmatpush1.bf16.msra.mxu0 %v10128_v29 }
 0x747   : > { %5591 = vmatprep.subr.bf16.mxu0 %v10131_v23 }
 0x74a   : > { %5593 = vmatpush1.bf16.msra.mxu0 %v10134_v37 }
 0x74d   : > { %5094 = vmatmul.mubr.msk.f32.vlgmr.msra.gmra.mrb[56].mxu0 %vm1968_vm2, %v1927_v35 }
 0x820   : > { %v4763_v17 = vpop.f32.mrb[56].mxu0 }
 0x821   : > { %v4776_v50 = vadd.f32 %v4774_v52, %v4763_v17  ;;  %v4765_v26 = vpop.f32.mrb[57].mxu0 }
 0x822   : > { %v4777_v25 = vadd.f32 %v4774_v52, %v4765_v26 }
 0x823   : > { %4778 = vst [vmem:[%s380_s22] sm:$0xff] %v4776_v50 }
 0x824   : > { %4779 = vst [vmem:[%s380_s22 + $0x8] sm:$0xff] %v4777_v25 }
 0x825   : > { %5688 = shalt.err (!%p5685_p7)
}
 0x826   : > { %s5689_s23 = scalar_lea.hbm %s9315_s24, 256  ;;  %s5693_s22 = scalar_lea.hbm %s9368_s9, 512 }
 0x827   : > { %p5690_p10 = scmp.ne.s32.totalorder %s9315_s24, %s5689_s23  ;;  %p5694_p13 = scmp.lt.u32.totalorder %s9315_s24, %s9368_s9 }
 0x828   : > { %p5695_p0 = scmp.lt.u32.totalorder %s5693_s22, %s5689_s23  ;;  %p5697_p2 = scmp.lt.u32.totalorder %s5689_s23, %s9315_s24 }
 0x829   : > { %p5691_p11 = pnand %p5690_p10, %p5831_p6 }
 0x82a   : > { %p5696_p1 = por %p5695_p0, %p5694_p13 }
 0x82b   : > { %p5692_p12 = pneg %p5691_p11 }
 0x82c   : > { %p5698_p3 = por %p5697_p2, %p5696_p1 }
 0x82e   : > { %p5699_p4 = pnand %p5698_p3, %p5692_p12 }
 0x830   : > { %5702 = shalt.err (!%p5699_p4)
}
 0x831   : > { %5616 = dma.vmem_to_hbm [thread:$0]  (%p5831_p6), %s9317_s25, 256, %s9315_s24, %s4781_s13  }
 0x832 PF: > { %s4807_s28 = sand.u32 1, %s5725_s30   ;;  %p5619_p5 = pnand %p4874_p9, %p5835_p8 }
 0x833   : > { %s4808_s29 = scalar_lea.sflag [#allocation4], %s4807_s28 }
 0x834   : > { %5720 = dma.done.wait (!%p5619_p5), %s4808_s29, 256  }
 0x835   : > { %5722 = vsyncadd (!%p5619_p5), %s4808_s29, 4294967040  ;;  %p19_p7 = scmp.ge.s32.totalorder %s5817_s15, 4   ;;  %s10135_s30 = smov %s5729_s10 }
 0x836   : > { %s10136_s10 = smov %s5733_s11  ;;  %s10137_s11 = smov %s5829_s18 }
 0x837   : > { %s10138_s12 = smov %s5817_s15  ;;  %21 = sbr.rel (!%p19_p7) target bundleno = 3 (0x3), region = 122 }
 0x83e   :  { %4813 = vsyncpa [#allocation4], 1 }
 0x83f   :  { %4815 = vsyncpa [#allocation4 + $0x1], 1 }

</bundles_post_ra>
